<compile_context>
chip_gen: v7x
topology: tpu7x:2x2x1
jax: 0.10.0
libtpu: 0.0.40
codegen_flags: <defaults>
</compile_context>

<pallas_src>
import functools

import jax
import jax.numpy as jnp
from jax import lax
from jax.experimental import pallas as pl
from jax.experimental.pallas import tpu as pltpu


def _round_up(x, m):
    return (x + m - 1) // m * m


def _cdiv(a, b):
    return -(-a // b)


# ----------------------------------------------------------------------------
# Kernel
# ----------------------------------------------------------------------------
def _unet_conv_block_kernel(*refs, n_blk, th, wp, img_h, img_w):
    """One (batch, row-tile) grid step: Conv3x3+ReLU -> Conv3x3+ReLU.

    refs layout:
      refs[0:n_blk]        n_blk consecutive S-lane views of the flattened,
                           zero-padded input, each (Cin, S), S = th*wp.
                           View j covers padded rows [ (i+j)*th, (i+j+1)*th ).
      refs[n_blk+0..3]     w1 (Cout, 9*Cin), b1 (Cout, 1),
                           w2 (Cout, 9*Cout), b2 (Cout, 1)
      refs[n_blk+4]        out_ref (Cout, S)   -- th output rows, flattened
      refs[n_blk+5]        x_sc  VMEM scratch (Cin, n_blk*S)
      refs[n_blk+6]        h1_sc VMEM scratch (Cout, (th+3)*wp)

    Flat layout: lane q = u*wp + v of a tile maps to padded-image row
    (tile_row0 + u), col v.  A 3x3 tap shift (dy, dx) is a flat lane shift of
    dy*wp + dx, so each conv is one fused-K matmul per output row.
    """
    x_views = refs[:n_blk]
    w1_ref, b1_ref, w2_ref, b2_ref = refs[n_blk:n_blk + 4]
    out_ref = refs[n_blk + 4]
    x_sc, h1_sc = refs[n_blk + 5], refs[n_blk + 6]

    i = pl.program_id(1)
    s = th * wp

    # ---- assemble the contiguous halo'd input window in VMEM ---------------
    # The S-lane views arrive through the normal double/triple-buffered
    # BlockSpec pipeline; gluing them here replaces the old wrapper-side
    # halo-duplicated HBM repack with one cheap VMEM copy.
    for j in range(n_blk):
        x_sc[:, j * s:(j + 1) * s] = x_views[j][...]

    w1 = w1_ref[...]            # (Cout, 9*Cin)
    w2 = w2_ref[...]            # (Cout, 9*Cout)
    b1 = b1_ref[...]            # (Cout, 1) f32
    b2 = b2_ref[...]            # (Cout, 1) f32

    # Column validity, shared by every row: flat lane v maps to image col v-1.
    v = lax.broadcasted_iota(jnp.int32, (1, wp), 1)
    col_valid = jnp.logical_and(v >= 1, v <= img_w)

    # ---- conv1 + ReLU -------------------------------------------------------
    # One fused-K dot per h1 row; row-sized chunks keep the operands / result
    # vreg-resident.  h1 row u corresponds to image row r = i*th + u - 1 and is
    # zeroed wherever nn.Conv2d(padding=1) would have supplied zeros, so conv2
    # sees exactly the reference operand.
    # NOTE: static Python row loop (all offsets static).  For very tall tiles
    # this could become a fori_loop over 128-aligned row offsets.
    for u in range(th + 3):
        taps = []
        for dy in range(3):
            for dx in range(3):
                s0 = (u + dy) * wp + dx
                taps.append(x_sc[:, s0:s0 + wp])
        xk = jnp.concatenate(taps, axis=0)                       # (9*Cin, wp)
        acc = jnp.dot(w1, xk, preferred_element_type=jnp.float32)
        h = jnp.maximum(acc + b1, 0.0)
        r = i * th + (u - 1)
        valid = jnp.logical_and(col_valid,
                                jnp.logical_and(r >= 0, r < img_h))
        h = jnp.where(valid, h, 0.0)
        h1_sc[:, u * wp:(u + 1) * wp] = h.astype(h1_sc.dtype)

    # ---- conv2 + ReLU -------------------------------------------------------
    for u2 in range(th):
        taps = []
        for dy in range(3):
            for dx in range(3):
                s0 = (u2 + dy) * wp + dx
                taps.append(h1_sc[:, s0:s0 + wp])
        hk = jnp.concatenate(taps, axis=0)                       # (9*Cout, wp)
        acc = jnp.dot(w2, hk, preferred_element_type=jnp.float32)
        o = jnp.maximum(acc + b2, 0.0)
        out_ref[:, u2 * wp:(u2 + 1) * wp] = o.astype(out_ref.dtype)


# ----------------------------------------------------------------------------
# VMEM budgeting / tile selection
# ----------------------------------------------------------------------------
def _vmem_bytes(th, wp, cin, cout, nt, itemsize):
    """Rough per-step VMEM estimate (pipelined input/output buffers + scratch)."""
    n_blk = 1 + _cdiv(6, th)
    s = th * wp
    bufs = 3 if nt >= 3 else 2          # matches the pipeline_mode choice
    x_views = n_blk * bufs * cin * s * itemsize
    out_buf = 2 * cout * s * 4          # output stays f32
    x_sc = cin * n_blk * s * itemsize
    h1_sc = cout * (th + 3) * wp * itemsize
    weights = 2 * (cout * 9 * cin + cout * 9 * cout + 2 * cout) * 4
    return x_views + out_buf + x_sc + h1_sc + weights


def _select_tile_h(H, wp, cin, cout, itemsize, budget, batch):
    """Largest row tile that fits the VMEM budget, with >=2 (prefer even) grid
    steps so v7x's two TensorCores / megacore get balanced work."""
    cands = sorted({H} | {t for t in (256, 128, 96, 64, 48, 32, 24, 16, 12,
                                      8, 6, 4, 3, 2, 1) if t < H},
                   reverse=True)
    th = 1
    for t in cands:
        if _vmem_bytes(t, wp, cin, cout, _cdiv(H, t), itemsize) <= budget:
            th = t
            break
    nt = _cdiv(H, th)
    if batch * nt < 2 and th > 1:
        th = _cdiv(H, 2)
        nt = _cdiv(H, th)
    if (batch * nt) % 2 == 1 and nt < H:
        t2 = max(1, _cdiv(H, nt + 1))
        n2 = _cdiv(H, t2)
        if (batch * n2) % 2 == 0 and \
                _vmem_bytes(t2, wp, cin, cout, n2, itemsize) <= budget:
            th, nt = t2, n2
    return th, nt


def _buffered_kwargs(n):
    """Per-spec deeper pipelining; falls back cleanly if unsupported."""
    try:
        pl.BlockSpec((8, 128), lambda i: (0, 0), pipeline_mode=pl.Buffered(n))
        return {"pipeline_mode": pl.Buffered(n)}
    except Exception:
        return {}


# ----------------------------------------------------------------------------
# Wrapper
# ----------------------------------------------------------------------------
def unet_conv_block(x_nchw, w1, b1, w2, b2, crop_size, *,
                    tile_h=None, use_bf16=False,
                    vmem_budget_bytes=20 * 1024 * 1024):
    """UNetConvBlock forward.

    x_nchw: (B, Cin, H, W) f32.  w1: (3,3,Cin,Cout) HWIO.  w2: (3,3,Cout,Cout).
    Returns (out, crop) matching the PyTorch module (out = block(x),
    crop = CenterCrop(crop_size)(out)).
    """
    B, Cin, H, W = map(int, x_nchw.shape)
    Cout = int(w1.shape[-1])
    in_dtype = jnp.bfloat16 if use_bf16 else jnp.float32
    itemsize = jnp.dtype(in_dtype).itemsize

    # Row width padded to a lane multiple: flat lane u*Wp + v <-> padded row u,
    # col v.  Keeps every block, slice and row offset 128-lane aligned.
    Wp = _round_up(W + 4, 128)

    # VMEM-budgeted row tiling (v7x: 64 MiB VMEM, 2 TCs).
    if tile_h is None:
        TH, nt = _select_tile_h(H, Wp, Cin, Cout, itemsize,
                                vmem_budget_bytes, B)
    else:
        TH = max(1, min(int(tile_h), H))
        nt = _cdiv(H, TH)

    n_blk = 1 + _cdiv(6, TH)            # views per step: covers TH+6 input rows
    S = TH * Wp
    R = (nt - 1 + n_blk) * TH           # total padded rows fed to the kernel
    assert R >= H + 4

    # Single zero-pad (2 rows/cols for both convs' padding=1, plus row/col
    # round-up); the reshape to flat lanes is free (rows are contiguous).
    xd = x_nchw.astype(in_dtype)
    x_pad = jnp.pad(xd, ((0, 0), (0, 0), (2, R - (H + 2)), (2, Wp - (W + 2))))
    x_flat = x_pad.reshape(B, Cin, R * Wp)

    # Fused-K weights: w1f[co, (dy*3+dx)*Cin + ci] = w1[dy, dx, ci, co].
    w1f = jnp.transpose(w1, (3, 0, 1, 2)).reshape(Cout, 9 * Cin).astype(in_dtype)
    w2f = jnp.transpose(w2, (3, 0, 1, 2)).reshape(Cout, 9 * Cout).astype(in_dtype)
    b1v = b1.reshape(Cout, 1).astype(jnp.float32)
    b2v = b2.reshape(Cout, 1).astype(jnp.float32)

    kernel = functools.partial(_unet_conv_block_kernel, n_blk=n_blk, th=TH,
                               wp=Wp, img_h=H, img_w=W)

    # n_blk overlapping views of the SAME flat array (no HBM repack): view j of
    # grid step i is flat block i+j (each S lanes, non-overlapping per view).
    xspec_kwargs = _buffered_kwargs(3) if nt >= 3 else {}
    x_specs = [
        pl.BlockSpec((None, Cin, S), (lambda b, i, j=j: (b, 0, i + j)),
                     **xspec_kwargs)
        for j in range(n_blk)
    ]

    est = _vmem_bytes(TH, Wp, Cin, Cout, nt, itemsize)
    vmem_limit = int(min(100 * 1024 * 1024,
                         max(2 * est + 4 * 1024 * 1024, 16 * 1024 * 1024)))

    out_flat = pl.pallas_call(
        kernel,
        out_shape=jax.ShapeDtypeStruct((B, Cout, nt * S), jnp.float32),
        grid_spec=pltpu.PrefetchScalarGridSpec(
            num_scalar_prefetch=0,
            grid=(B, nt),
            in_specs=x_specs + [
                pl.BlockSpec((Cout, 9 * Cin), lambda b, i: (0, 0)),
                pl.BlockSpec((Cout, 1), lambda b, i: (0, 0)),
                pl.BlockSpec((Cout, 9 * Cout), lambda b, i: (0, 0)),
                pl.BlockSpec((Cout, 1), lambda b, i: (0, 0)),
            ],
            out_specs=pl.BlockSpec((None, Cout, S), lambda b, i: (b, 0, i)),
            scratch_shapes=[
                pltpu.VMEM((Cin, n_blk * S), in_dtype),
                pltpu.VMEM((Cout, (TH + 3) * Wp), in_dtype),
            ]),
        compiler_params=pltpu.CompilerParams(
            dimension_semantics=("parallel", "parallel"),
            vmem_limit_bytes=vmem_limit),
    )(*([x_flat] * n_blk), w1f, b1v, w2f, b2v)

    # Unfold: lane q of tile i <-> output row i*TH + q//Wp, col q%Wp.  The
    # ragged last tile / lane padding is discarded here (pure layout plumbing).
    out = out_flat.reshape(B, Cout, nt * TH, Wp)[:, :, :H, :W]

    # CenterCrop (torchvision semantics) as a wrapper-side slice.
    top = int(round((H - crop_size) / 2.0))
    left = int(round((W - crop_size) / 2.0))
    crop = out[:, :, top:top + crop_size, left:left + crop_size]
    return out, crop


# ----------------------------------------------------------------------------
# Pure-JAX reference
# ----------------------------------------------------------------------------
def _reference(x_nchw, w1, b1, w2, b2, crop_size):
    dn = ("NCHW", "HWIO", "NCHW")
    h = lax.conv_general_dilated(x_nchw, w1, (1, 1), "SAME",
                                 dimension_numbers=dn,
                                 precision=lax.Precision.HIGHEST)
    h = jnp.maximum(h + b1.reshape(1, -1, 1, 1), 0.0)
    h = lax.conv_general_dilated(h, w2, (1, 1), "SAME", dimension_numbers=dn,
                                 precision=lax.Precision.HIGHEST)
    h = jnp.maximum(h + b2.reshape(1, -1, 1, 1), 0.0)
    H, W = h.shape[2], h.shape[3]
    top = int(round((H - crop_size) / 2.0))
    left = int(round((W - crop_size) / 2.0))
    crop = h[:, :, top:top + crop_size, left:left + crop_size]
    return h, crop


if __name__ == "__main__":
    B, Cin, Cout, H, W = 2, 4, 8, 16, 16
    crop_size = 8

    key = jax.random.PRNGKey(0)
    kx, kw1, kb1, kw2, kb2 = jax.random.split(key, 5)
    x = jax.random.normal(kx, (B, Cin, H, W), dtype=jnp.float32)
    w1 = jax.random.normal(kw1, (3, 3, Cin, Cout), dtype=jnp.float32) * 0.1
    b1 = jax.random.normal(kb1, (Cout,), dtype=jnp.float32) * 0.1
    w2 = jax.random.normal(kw2, (3, 3, Cout, Cout), dtype=jnp.float32) * 0.1
    b2 = jax.random.normal(kb2, (Cout,), dtype=jnp.float32) * 0.1

    ref_out, ref_crop = _reference(x, w1, b1, w2, b2, crop_size)

    # 1) default VMEM-budgeted tiling, exact f32 path.
    out, crop = unet_conv_block(x, w1, b1, w2, b2, crop_size)
    jax.block_until_ready((out, crop))
    assert out.shape == (B, Cout, H, W)
    assert crop.shape == (B, Cout, crop_size, crop_size)
    assert jnp.allclose(out, ref_out, atol=1e-4, rtol=1e-4)
    assert jnp.allclose(crop, ref_crop, atol=1e-4, rtol=1e-4)

    # 2) explicit row tiling: exercises the multi-view halo path, a ragged
    #    last tile (16 % 6 != 0) and the deeper-buffered input pipeline.
    out_t, crop_t = unet_conv_block(x, w1, b1, w2, b2, crop_size, tile_h=6)
    jax.block_until_ready((out_t, crop_t))
    assert jnp.allclose(out_t, ref_out, atol=1e-4, rtol=1e-4)
    assert jnp.allclose(crop_t, ref_crop, atol=1e-4, rtol=1e-4)

    # 3) bf16 MXU operands (v6e/v7x fast path), f32 accumulation, looser tol.
    out_bf, crop_bf = unet_conv_block(x, w1, b1, w2, b2, crop_size,
                                      use_bf16=True)
    jax.block_until_ready((out_bf, crop_bf))
    assert jnp.allclose(out_bf, ref_out, atol=1e-1, rtol=1e-1)
    assert jnp.allclose(crop_bf, ref_crop, atol=1e-1, rtol=1e-1)

    print("KERNEL_OK")
</pallas_src>

<mosaic_0001>
module attributes {stable_mosaic.version = 11 : i64} {
  func.func @_unet_conv_block_kernel(%arg0: i32, %arg1: i32, %arg2: memref<1x4x2048xf32, #tpu.memory_space<vmem>>, %arg3: memref<1x4x2048xf32, #tpu.memory_space<vmem>>, %arg4: memref<8x36xf32, #tpu.memory_space<vmem>>, %arg5: memref<8x1xf32, #tpu.memory_space<vmem>>, %arg6: memref<8x72xf32, #tpu.memory_space<vmem>>, %arg7: memref<8x1xf32, #tpu.memory_space<vmem>>, %arg8: memref<1x8x2048xf32, #tpu.memory_space<vmem>>, %arg9: memref<4x4096xf32, #tpu.memory_space<vmem>>, %arg10: memref<8x2432xf32, #tpu.memory_space<vmem>>) attributes {dimension_semantics = [#tpu.dimension_semantics<parallel>, #tpu.dimension_semantics<parallel>], iteration_bounds = array<i64: 2, 1>, scalar_prefetch = 0 : i64, scratch_operands = 2 : i64, tpu.core_type = #tpu.core_type<tc>, window_params = [{transform_indices = @transform_0, window_bounds = array<i64: 1, 4, 2048>}, {transform_indices = @transform_1, window_bounds = array<i64: 1, 4, 2048>}, {pipeline_mode = #tpu.pipeline_mode<synchronous>, transform_indices = @transform_2, window_bounds = array<i64: 8, 36>}, {pipeline_mode = #tpu.pipeline_mode<synchronous>, transform_indices = @transform_3, window_bounds = array<i64: 8, 1>}, {pipeline_mode = #tpu.pipeline_mode<synchronous>, transform_indices = @transform_4, window_bounds = array<i64: 8, 72>}, {pipeline_mode = #tpu.pipeline_mode<synchronous>, transform_indices = @transform_5, window_bounds = array<i64: 8, 1>}, {transform_indices = @transform_6, window_bounds = array<i64: 1, 8, 2048>}]} {
    %c0 = arith.constant 0 : index
    %c0_0 = arith.constant 0 : index
    %c0_1 = arith.constant 0 : index
    %0 = vector.load %arg2[%c0, %c0_0, %c0_1] : memref<1x4x2048xf32, #tpu.memory_space<vmem>>, vector<1x4x2048xf32>
    %1 = vector.shape_cast %0 : vector<1x4x2048xf32> to vector<4x2048xf32>
    %c0_2 = arith.constant 0 : index
    %c0_3 = arith.constant 0 : index
    %2 = vector.load %arg9[%c0_2, %c0_3] : memref<4x4096xf32, #tpu.memory_space<vmem>>, vector<4x2048xf32>
    tpu.vector_store %arg9[%c0_2, %c0_3], %1 {strides = array<i32>} : memref<4x4096xf32, #tpu.memory_space<vmem>>, vector<4x2048xf32>,
    %c0_4 = arith.constant 0 : index
    %c0_5 = arith.constant 0 : index
    %c0_6 = arith.constant 0 : index
    %3 = vector.load %arg3[%c0_4, %c0_5, %c0_6] : memref<1x4x2048xf32, #tpu.memory_space<vmem>>, vector<1x4x2048xf32>
    %4 = vector.shape_cast %3 : vector<1x4x2048xf32> to vector<4x2048xf32>
    %c0_7 = arith.constant 0 : index
    %c2048 = arith.constant 2048 : index
    %5 = vector.load %arg9[%c0_7, %c2048] : memref<4x4096xf32, #tpu.memory_space<vmem>>, vector<4x2048xf32>
    tpu.vector_store %arg9[%c0_7, %c2048], %4 {strides = array<i32>} : memref<4x4096xf32, #tpu.memory_space<vmem>>, vector<4x2048xf32>,
    %c0_8 = arith.constant 0 : index
    %c0_9 = arith.constant 0 : index
    %6 = vector.load %arg4[%c0_8, %c0_9] : memref<8x36xf32, #tpu.memory_space<vmem>>, vector<8x36xf32>
    %c0_10 = arith.constant 0 : index
    %c0_11 = arith.constant 0 : index
    %7 = vector.load %arg6[%c0_10, %c0_11] : memref<8x72xf32, #tpu.memory_space<vmem>>, vector<8x72xf32>
    %c0_12 = arith.constant 0 : index
    %c0_13 = arith.constant 0 : index
    %8 = vector.load %arg5[%c0_12, %c0_13] : memref<8x1xf32, #tpu.memory_space<vmem>>, vector<8x1xf32>
    %c0_14 = arith.constant 0 : index
    %c0_15 = arith.constant 0 : index
    %9 = vector.load %arg7[%c0_14, %c0_15] : memref<8x1xf32, #tpu.memory_space<vmem>>, vector<8x1xf32>
    %10 = tpu.iota {dimensions = array<i32: 1>} : vector<1x128xi32>
    %c1_i32 = arith.constant 1 : i32
    %11 = vector.broadcast %c1_i32 : i32 to vector<1x128xi32>
    %12 = arith.cmpi sge, %10, %11 : vector<1x128xi32>
    %c16_i32 = arith.constant 16 : i32
    %13 = vector.broadcast %c16_i32 : i32 to vector<1x128xi32>
    %14 = arith.cmpi sle, %10, %13 : vector<1x128xi32>
    %15 = arith.andi %12, %14 : vector<1x128xi1>
    %c0_16 = arith.constant 0 : index
    %c0_17 = arith.constant 0 : index
    %16 = vector.load %arg9[%c0_16, %c0_17] : memref<4x4096xf32, #tpu.memory_space<vmem>>, vector<4x128xf32>
    %c0_18 = arith.constant 0 : index
    %c1 = arith.constant 1 : index
    %17 = vector.load %arg9[%c0_18, %c1] : memref<4x4096xf32, #tpu.memory_space<vmem>>, vector<4x128xf32>
    %c0_19 = arith.constant 0 : index
    %c2 = arith.constant 2 : index
    %18 = vector.load %arg9[%c0_19, %c2] : memref<4x4096xf32, #tpu.memory_space<vmem>>, vector<4x128xf32>
    %c0_20 = arith.constant 0 : index
    %c128 = arith.constant 128 : index
    %19 = vector.load %arg9[%c0_20, %c128] : memref<4x4096xf32, #tpu.memory_space<vmem>>, vector<4x128xf32>
    %c0_21 = arith.constant 0 : index
    %c129 = arith.constant 129 : index
    %20 = vector.load %arg9[%c0_21, %c129] : memref<4x4096xf32, #tpu.memory_space<vmem>>, vector<4x128xf32>
    %c0_22 = arith.constant 0 : index
    %c130 = arith.constant 130 : index
    %21 = vector.load %arg9[%c0_22, %c130] : memref<4x4096xf32, #tpu.memory_space<vmem>>, vector<4x128xf32>
    %c0_23 = arith.constant 0 : index
    %c256 = arith.constant 256 : index
    %22 = vector.load %arg9[%c0_23, %c256] : memref<4x4096xf32, #tpu.memory_space<vmem>>, vector<4x128xf32>
    %c0_24 = arith.constant 0 : index
    %c257 = arith.constant 257 : index
    %23 = vector.load %arg9[%c0_24, %c257] : memref<4x4096xf32, #tpu.memory_space<vmem>>, vector<4x128xf32>
    %c0_25 = arith.constant 0 : index
    %c258 = arith.constant 258 : index
    %24 = vector.load %arg9[%c0_25, %c258] : memref<4x4096xf32, #tpu.memory_space<vmem>>, vector<4x128xf32>
    %25 = tpu.concatenate %16, %17, %18, %19, %20, %21, %22, %23, %24 in 0 : vector<4x128xf32>, vector<4x128xf32>, vector<4x128xf32>, vector<4x128xf32>, vector<4x128xf32>, vector<4x128xf32>, vector<4x128xf32>, vector<4x128xf32>, vector<4x128xf32> -> vector<36x128xf32>
    %cst = arith.constant dense<0.000000e+00> : vector<8x128xf32>
    %26 = tpu.matmul %6, %25, %cst {dimension_numbers = #tpu.dot_dimension_numbers<[1], [0], [0], [1], [0, 0, 1, 1], [], []>} : vector<8x36xf32>, vector<36x128xf32>, vector<8x128xf32> -> vector<8x128xf32>
    %27 = vector.broadcast %8 : vector<8x1xf32> to vector<8x128xf32>
    %28 = arith.addf %26, %27 : vector<8x128xf32>
    %cst_26 = arith.constant 0.000000e+00 : f32
    %29 = vector.broadcast %cst_26 : f32 to vector<8x128xf32>
    %30 = arith.maximumf %28, %29 : vector<8x128xf32>
    %c16_i32_27 = arith.constant 16 : i32
    %31 = arith.muli %arg1, %c16_i32_27 : i32
    %c-1_i32 = arith.constant -1 : i32
    %32 = arith.addi %31, %c-1_i32 : i32
    %c0_i32 = arith.constant 0 : i32
    %33 = arith.cmpi sge, %32, %c0_i32 : i32
    %c16_i32_28 = arith.constant 16 : i32
    %34 = arith.cmpi slt, %32, %c16_i32_28 : i32
    %35 = arith.andi %33, %34 : i1
    %36 = vector.broadcast %35 : i1 to vector<1x128xi1>
    %37 = arith.andi %15, %36 : vector<1x128xi1>
    %cst_29 = arith.constant 0.000000e+00 : f32
    %38 = vector.shape_cast %37 : vector<1x128xi1> to vector<1x128xi1>
    %39 = vector.broadcast %38 : vector<1x128xi1> to vector<8x128xi1>
    %40 = vector.broadcast %cst_29 : f32 to vector<8x128xf32>
    %41 = arith.select %39, %30, %40 : vector<8x128xi1>, vector<8x128xf32>
    %c0_30 = arith.constant 0 : index
    %c0_31 = arith.constant 0 : index
    %42 = vector.load %arg10[%c0_30, %c0_31] : memref<8x2432xf32, #tpu.memory_space<vmem>>, vector<8x128xf32>
    tpu.vector_store %arg10[%c0_30, %c0_31], %41 {strides = array<i32>} : memref<8x2432xf32, #tpu.memory_space<vmem>>, vector<8x128xf32>,
    %c0_32 = arith.constant 0 : index
    %c128_33 = arith.constant 128 : index
    %43 = vector.load %arg9[%c0_32, %c128_33] : memref<4x4096xf32, #tpu.memory_space<vmem>>, vector<4x128xf32>
    %c0_34 = arith.constant 0 : index
    %c129_35 = arith.constant 129 : index
    %44 = vector.load %arg9[%c0_34, %c129_35] : memref<4x4096xf32, #tpu.memory_space<vmem>>, vector<4x128xf32>
    %c0_36 = arith.constant 0 : index
    %c130_37 = arith.constant 130 : index
    %45 = vector.load %arg9[%c0_36, %c130_37] : memref<4x4096xf32, #tpu.memory_space<vmem>>, vector<4x128xf32>
    %c0_38 = arith.constant 0 : index
    %c256_39 = arith.constant 256 : index
    %46 = vector.load %arg9[%c0_38, %c256_39] : memref<4x4096xf32, #tpu.memory_space<vmem>>, vector<4x128xf32>
    %c0_40 = arith.constant 0 : index
    %c257_41 = arith.constant 257 : index
    %47 = vector.load %arg9[%c0_40, %c257_41] : memref<4x4096xf32, #tpu.memory_space<vmem>>, vector<4x128xf32>
    %c0_42 = arith.constant 0 : index
    %c258_43 = arith.constant 258 : index
    %48 = vector.load %arg9[%c0_42, %c258_43] : memref<4x4096xf32, #tpu.memory_space<vmem>>, vector<4x128xf32>
    %c0_44 = arith.constant 0 : index
    %c384 = arith.constant 384 : index
    %49 = vector.load %arg9[%c0_44, %c384] : memref<4x4096xf32, #tpu.memory_space<vmem>>, vector<4x128xf32>
    %c0_45 = arith.constant 0 : index
    %c385 = arith.constant 385 : index
    %50 = vector.load %arg9[%c0_45, %c385] : memref<4x4096xf32, #tpu.memory_space<vmem>>, vector<4x128xf32>
    %c0_46 = arith.constant 0 : index
    %c386 = arith.constant 386 : index
    %51 = vector.load %arg9[%c0_46, %c386] : memref<4x4096xf32, #tpu.memory_space<vmem>>, vector<4x128xf32>
    %52 = tpu.concatenate %43, %44, %45, %46, %47, %48, %49, %50, %51 in 0 : vector<4x128xf32>, vector<4x128xf32>, vector<4x128xf32>, vector<4x128xf32>, vector<4x128xf32>, vector<4x128xf32>, vector<4x128xf32>, vector<4x128xf32>, vector<4x128xf32> -> vector<36x128xf32>
    %cst_47 = arith.constant dense<0.000000e+00> : vector<8x128xf32>
    %53 = tpu.matmul %6, %52, %cst_47 {dimension_numbers = #tpu.dot_dimension_numbers<[1], [0], [0], [1], [0, 0, 1, 1], [], []>} : vector<8x36xf32>, vector<36x128xf32>, vector<8x128xf32> -> vector<8x128xf32>
    %54 = vector.broadcast %8 : vector<8x1xf32> to vector<8x128xf32>
    %55 = arith.addf %53, %54 : vector<8x128xf32>
    %cst_48 = arith.constant 0.000000e+00 : f32
    %56 = vector.broadcast %cst_48 : f32 to vector<8x128xf32>
    %57 = arith.maximumf %55, %56 : vector<8x128xf32>
    %c16_i32_49 = arith.constant 16 : i32
    %58 = arith.muli %arg1, %c16_i32_49 : i32
    %c0_i32_50 = arith.constant 0 : i32
    %59 = arith.addi %58, %c0_i32_50 : i32
    %c0_i32_51 = arith.constant 0 : i32
    %60 = arith.cmpi sge, %59, %c0_i32_51 : i32
    %c16_i32_52 = arith.constant 16 : i32
    %61 = arith.cmpi slt, %59, %c16_i32_52 : i32
    %62 = arith.andi %60, %61 : i1
    %63 = vector.broadcast %62 : i1 to vector<1x128xi1>
    %64 = arith.andi %15, %63 : vector<1x128xi1>
    %cst_53 = arith.constant 0.000000e+00 : f32
    %65 = vector.shape_cast %64 : vector<1x128xi1> to vector<1x128xi1>
    %66 = vector.broadcast %65 : vector<1x128xi1> to vector<8x128xi1>
    %67 = vector.broadcast %cst_53 : f32 to vector<8x128xf32>
    %68 = arith.select %66, %57, %67 : vector<8x128xi1>, vector<8x128xf32>
    %c0_54 = arith.constant 0 : index
    %c128_55 = arith.constant 128 : index
    %69 = vector.load %arg10[%c0_54, %c128_55] : memref<8x2432xf32, #tpu.memory_space<vmem>>, vector<8x128xf32>
    tpu.vector_store %arg10[%c0_54, %c128_55], %68 {strides = array<i32>} : memref<8x2432xf32, #tpu.memory_space<vmem>>, vector<8x128xf32>,
    %c0_56 = arith.constant 0 : index
    %c256_57 = arith.constant 256 : index
    %70 = vector.load %arg9[%c0_56, %c256_57] : memref<4x4096xf32, #tpu.memory_space<vmem>>, vector<4x128xf32>
    %c0_58 = arith.constant 0 : index
    %c257_59 = arith.constant 257 : index
    %71 = vector.load %arg9[%c0_58, %c257_59] : memref<4x4096xf32, #tpu.memory_space<vmem>>, vector<4x128xf32>
    %c0_60 = arith.constant 0 : index
    %c258_61 = arith.constant 258 : index
    %72 = vector.load %arg9[%c0_60, %c258_61] : memref<4x4096xf32, #tpu.memory_space<vmem>>, vector<4x128xf32>
    %c0_62 = arith.constant 0 : index
    %c384_63 = arith.constant 384 : index
    %73 = vector.load %arg9[%c0_62, %c384_63] : memref<4x4096xf32, #tpu.memory_space<vmem>>, vector<4x128xf32>
    %c0_64 = arith.constant 0 : index
    %c385_65 = arith.constant 385 : index
    %74 = vector.load %arg9[%c0_64, %c385_65] : memref<4x4096xf32, #tpu.memory_space<vmem>>, vector<4x128xf32>
    %c0_66 = arith.constant 0 : index
    %c386_67 = arith.constant 386 : index
    %75 = vector.load %arg9[%c0_66, %c386_67] : memref<4x4096xf32, #tpu.memory_space<vmem>>, vector<4x128xf32>
    %c0_68 = arith.constant 0 : index
    %c512 = arith.constant 512 : index
    %76 = vector.load %arg9[%c0_68, %c512] : memref<4x4096xf32, #tpu.memory_space<vmem>>, vector<4x128xf32>
    %c0_69 = arith.constant 0 : index
    %c513 = arith.constant 513 : index
    %77 = vector.load %arg9[%c0_69, %c513] : memref<4x4096xf32, #tpu.memory_space<vmem>>, vector<4x128xf32>
    %c0_70 = arith.constant 0 : index
    %c514 = arith.constant 514 : index
    %78 = vector.load %arg9[%c0_70, %c514] : memref<4x4096xf32, #tpu.memory_space<vmem>>, vector<4x128xf32>
    %79 = tpu.concatenate %70, %71, %72, %73, %74, %75, %76, %77, %78 in 0 : vector<4x128xf32>, vector<4x128xf32>, vector<4x128xf32>, vector<4x128xf32>, vector<4x128xf32>, vector<4x128xf32>, vector<4x128xf32>, vector<4x128xf32>, vector<4x128xf32> -> vector<36x128xf32>
    %cst_71 = arith.constant dense<0.000000e+00> : vector<8x128xf32>
    %80 = tpu.matmul %6, %79, %cst_71 {dimension_numbers = #tpu.dot_dimension_numbers<[1], [0], [0], [1], [0, 0, 1, 1], [], []>} : vector<8x36xf32>, vector<36x128xf32>, vector<8x128xf32> -> vector<8x128xf32>
    %81 = vector.broadcast %8 : vector<8x1xf32> to vector<8x128xf32>
    %82 = arith.addf %80, %81 : vector<8x128xf32>
    %cst_72 = arith.constant 0.000000e+00 : f32
    %83 = vector.broadcast %cst_72 : f32 to vector<8x128xf32>
    %84 = arith.maximumf %82, %83 : vector<8x128xf32>
    %c16_i32_73 = arith.constant 16 : i32
    %85 = arith.muli %arg1, %c16_i32_73 : i32
    %c1_i32_74 = arith.constant 1 : i32
    %86 = arith.addi %85, %c1_i32_74 : i32
    %c0_i32_75 = arith.constant 0 : i32
    %87 = arith.cmpi sge, %86, %c0_i32_75 : i32
    %c16_i32_76 = arith.constant 16 : i32
    %88 = arith.cmpi slt, %86, %c16_i32_76 : i32
    %89 = arith.andi %87, %88 : i1
    %90 = vector.broadcast %89 : i1 to vector<1x128xi1>
    %91 = arith.andi %15, %90 : vector<1x128xi1>
    %cst_77 = arith.constant 0.000000e+00 : f32
    %92 = vector.shape_cast %91 : vector<1x128xi1> to vector<1x128xi1>
    %93 = vector.broadcast %92 : vector<1x128xi1> to vector<8x128xi1>
    %94 = vector.broadcast %cst_77 : f32 to vector<8x128xf32>
    %95 = arith.select %93, %84, %94 : vector<8x128xi1>, vector<8x128xf32>
    %c0_78 = arith.constant 0 : index
    %c256_79 = arith.constant 256 : index
    %96 = vector.load %arg10[%c0_78, %c256_79] : memref<8x2432xf32, #tpu.memory_space<vmem>>, vector<8x128xf32>
    tpu.vector_store %arg10[%c0_78, %c256_79], %95 {strides = array<i32>} : memref<8x2432xf32, #tpu.memory_space<vmem>>, vector<8x128xf32>,
    %c0_80 = arith.constant 0 : index
    %c384_81 = arith.constant 384 : index
    %97 = vector.load %arg9[%c0_80, %c384_81] : memref<4x4096xf32, #tpu.memory_space<vmem>>, vector<4x128xf32>
    %c0_82 = arith.constant 0 : index
    %c385_83 = arith.constant 385 : index
    %98 = vector.load %arg9[%c0_82, %c385_83] : memref<4x4096xf32, #tpu.memory_space<vmem>>, vector<4x128xf32>
    %c0_84 = arith.constant 0 : index
    %c386_85 = arith.constant 386 : index
    %99 = vector.load %arg9[%c0_84, %c386_85] : memref<4x4096xf32, #tpu.memory_space<vmem>>, vector<4x128xf32>
    %c0_86 = arith.constant 0 : index
    %c512_87 = arith.constant 512 : index
    %100 = vector.load %arg9[%c0_86, %c512_87] : memref<4x4096xf32, #tpu.memory_space<vmem>>, vector<4x128xf32>
    %c0_88 = arith.constant 0 : index
    %c513_89 = arith.constant 513 : index
    %101 = vector.load %arg9[%c0_88, %c513_89] : memref<4x4096xf32, #tpu.memory_space<vmem>>, vector<4x128xf32>
    %c0_90 = arith.constant 0 : index
    %c514_91 = arith.constant 514 : index
    %102 = vector.load %arg9[%c0_90, %c514_91] : memref<4x4096xf32, #tpu.memory_space<vmem>>, vector<4x128xf32>
    %c0_92 = arith.constant 0 : index
    %c640 = arith.constant 640 : index
    %103 = vector.load %arg9[%c0_92, %c640] : memref<4x4096xf32, #tpu.memory_space<vmem>>, vector<4x128xf32>
    %c0_93 = arith.constant 0 : index
    %c641 = arith.constant 641 : index
    %104 = vector.load %arg9[%c0_93, %c641] : memref<4x4096xf32, #tpu.memory_space<vmem>>, vector<4x128xf32>
    %c0_94 = arith.constant 0 : index
    %c642 = arith.constant 642 : index
    %105 = vector.load %arg9[%c0_94, %c642] : memref<4x4096xf32, #tpu.memory_space<vmem>>, vector<4x128xf32>
    %106 = tpu.concatenate %97, %98, %99, %100, %101, %102, %103, %104, %105 in 0 : vector<4x128xf32>, vector<4x128xf32>, vector<4x128xf32>, vector<4x128xf32>, vector<4x128xf32>, vector<4x128xf32>, vector<4x128xf32>, vector<4x128xf32>, vector<4x128xf32> -> vector<36x128xf32>
    %cst_95 = arith.constant dense<0.000000e+00> : vector<8x128xf32>
    %107 = tpu.matmul %6, %106, %cst_95 {dimension_numbers = #tpu.dot_dimension_numbers<[1], [0], [0], [1], [0, 0, 1, 1], [], []>} : vector<8x36xf32>, vector<36x128xf32>, vector<8x128xf32> -> vector<8x128xf32>
    %108 = vector.broadcast %8 : vector<8x1xf32> to vector<8x128xf32>
    %109 = arith.addf %107, %108 : vector<8x128xf32>
    %cst_96 = arith.constant 0.000000e+00 : f32
    %110 = vector.broadcast %cst_96 : f32 to vector<8x128xf32>
    %111 = arith.maximumf %109, %110 : vector<8x128xf32>
    %c16_i32_97 = arith.constant 16 : i32
    %112 = arith.muli %arg1, %c16_i32_97 : i32
    %c2_i32 = arith.constant 2 : i32
    %113 = arith.addi %112, %c2_i32 : i32
    %c0_i32_98 = arith.constant 0 : i32
    %114 = arith.cmpi sge, %113, %c0_i32_98 : i32
    %c16_i32_99 = arith.constant 16 : i32
    %115 = arith.cmpi slt, %113, %c16_i32_99 : i32
    %116 = arith.andi %114, %115 : i1
    %117 = vector.broadcast %116 : i1 to vector<1x128xi1>
    %118 = arith.andi %15, %117 : vector<1x128xi1>
    %cst_100 = arith.constant 0.000000e+00 : f32
    %119 = vector.shape_cast %118 : vector<1x128xi1> to vector<1x128xi1>
    %120 = vector.broadcast %119 : vector<1x128xi1> to vector<8x128xi1>
    %121 = vector.broadcast %cst_100 : f32 to vector<8x128xf32>
    %122 = arith.select %120, %111, %121 : vector<8x128xi1>, vector<8x128xf32>
    %c0_101 = arith.constant 0 : index
    %c384_102 = arith.constant 384 : index
    %123 = vector.load %arg10[%c0_101, %c384_102] : memref<8x2432xf32, #tpu.memory_space<vmem>>, vector<8x128xf32>
    tpu.vector_store %arg10[%c0_101, %c384_102], %122 {strides = array<i32>} : memref<8x2432xf32, #tpu.memory_space<vmem>>, vector<8x128xf32>,
    %c0_103 = arith.constant 0 : index
    %c512_104 = arith.constant 512 : index
    %124 = vector.load %arg9[%c0_103, %c512_104] : memref<4x4096xf32, #tpu.memory_space<vmem>>, vector<4x128xf32>
    %c0_105 = arith.constant 0 : index
    %c513_106 = arith.constant 513 : index
    %125 = vector.load %arg9[%c0_105, %c513_106] : memref<4x4096xf32, #tpu.memory_space<vmem>>, vector<4x128xf32>
    %c0_107 = arith.constant 0 : index
    %c514_108 = arith.constant 514 : index
    %126 = vector.load %arg9[%c0_107, %c514_108] : memref<4x4096xf32, #tpu.memory_space<vmem>>, vector<4x128xf32>
    %c0_109 = arith.constant 0 : index
    %c640_110 = arith.constant 640 : index
    %127 = vector.load %arg9[%c0_109, %c640_110] : memref<4x4096xf32, #tpu.memory_space<vmem>>, vector<4x128xf32>
    %c0_111 = arith.constant 0 : index
    %c641_112 = arith.constant 641 : index
    %128 = vector.load %arg9[%c0_111, %c641_112] : memref<4x4096xf32, #tpu.memory_space<vmem>>, vector<4x128xf32>
    %c0_113 = arith.constant 0 : index
    %c642_114 = arith.constant 642 : index
    %129 = vector.load %arg9[%c0_113, %c642_114] : memref<4x4096xf32, #tpu.memory_space<vmem>>, vector<4x128xf32>
    %c0_115 = arith.constant 0 : index
    %c768 = arith.constant 768 : index
    %130 = vector.load %arg9[%c0_115, %c768] : memref<4x4096xf32, #tpu.memory_space<vmem>>, vector<4x128xf32>
    %c0_116 = arith.constant 0 : index
    %c769 = arith.constant 769 : index
    %131 = vector.load %arg9[%c0_116, %c769] : memref<4x4096xf32, #tpu.memory_space<vmem>>, vector<4x128xf32>
    %c0_117 = arith.constant 0 : index
    %c770 = arith.constant 770 : index
    %132 = vector.load %arg9[%c0_117, %c770] : memref<4x4096xf32, #tpu.memory_space<vmem>>, vector<4x128xf32>
    %133 = tpu.concatenate %124, %125, %126, %127, %128, %129, %130, %131, %132 in 0 : vector<4x128xf32>, vector<4x128xf32>, vector<4x128xf32>, vector<4x128xf32>, vector<4x128xf32>, vector<4x128xf32>, vector<4x128xf32>, vector<4x128xf32>, vector<4x128xf32> -> vector<36x128xf32>
    %cst_118 = arith.constant dense<0.000000e+00> : vector<8x128xf32>
    %134 = tpu.matmul %6, %133, %cst_118 {dimension_numbers = #tpu.dot_dimension_numbers<[1], [0], [0], [1], [0, 0, 1, 1], [], []>} : vector<8x36xf32>, vector<36x128xf32>, vector<8x128xf32> -> vector<8x128xf32>
    %135 = vector.broadcast %8 : vector<8x1xf32> to vector<8x128xf32>
    %136 = arith.addf %134, %135 : vector<8x128xf32>
    %cst_119 = arith.constant 0.000000e+00 : f32
    %137 = vector.broadcast %cst_119 : f32 to vector<8x128xf32>
    %138 = arith.maximumf %136, %137 : vector<8x128xf32>
    %c16_i32_120 = arith.constant 16 : i32
    %139 = arith.muli %arg1, %c16_i32_120 : i32
    %c3_i32 = arith.constant 3 : i32
    %140 = arith.addi %139, %c3_i32 : i32
    %c0_i32_121 = arith.constant 0 : i32
    %141 = arith.cmpi sge, %140, %c0_i32_121 : i32
    %c16_i32_122 = arith.constant 16 : i32
    %142 = arith.cmpi slt, %140, %c16_i32_122 : i32
    %143 = arith.andi %141, %142 : i1
    %144 = vector.broadcast %143 : i1 to vector<1x128xi1>
    %145 = arith.andi %15, %144 : vector<1x128xi1>
    %cst_123 = arith.constant 0.000000e+00 : f32
    %146 = vector.shape_cast %145 : vector<1x128xi1> to vector<1x128xi1>
    %147 = vector.broadcast %146 : vector<1x128xi1> to vector<8x128xi1>
    %148 = vector.broadcast %cst_123 : f32 to vector<8x128xf32>
    %149 = arith.select %147, %138, %148 : vector<8x128xi1>, vector<8x128xf32>
    %c0_124 = arith.constant 0 : index
    %c512_125 = arith.constant 512 : index
    %150 = vector.load %arg10[%c0_124, %c512_125] : memref<8x2432xf32, #tpu.memory_space<vmem>>, vector<8x128xf32>
    tpu.vector_store %arg10[%c0_124, %c512_125], %149 {strides = array<i32>} : memref<8x2432xf32, #tpu.memory_space<vmem>>, vector<8x128xf32>,
    %c0_126 = arith.constant 0 : index
    %c640_127 = arith.constant 640 : index
    %151 = vector.load %arg9[%c0_126, %c640_127] : memref<4x4096xf32, #tpu.memory_space<vmem>>, vector<4x128xf32>
    %c0_128 = arith.constant 0 : index
    %c641_129 = arith.constant 641 : index
    %152 = vector.load %arg9[%c0_128, %c641_129] : memref<4x4096xf32, #tpu.memory_space<vmem>>, vector<4x128xf32>
    %c0_130 = arith.constant 0 : index
    %c642_131 = arith.constant 642 : index
    %153 = vector.load %arg9[%c0_130, %c642_131] : memref<4x4096xf32, #tpu.memory_space<vmem>>, vector<4x128xf32>
    %c0_132 = arith.constant 0 : index
    %c768_133 = arith.constant 768 : index
    %154 = vector.load %arg9[%c0_132, %c768_133] : memref<4x4096xf32, #tpu.memory_space<vmem>>, vector<4x128xf32>
    %c0_134 = arith.constant 0 : index
    %c769_135 = arith.constant 769 : index
    %155 = vector.load %arg9[%c0_134, %c769_135] : memref<4x4096xf32, #tpu.memory_space<vmem>>, vector<4x128xf32>
    %c0_136 = arith.constant 0 : index
    %c770_137 = arith.constant 770 : index
    %156 = vector.load %arg9[%c0_136, %c770_137] : memref<4x4096xf32, #tpu.memory_space<vmem>>, vector<4x128xf32>
    %c0_138 = arith.constant 0 : index
    %c896 = arith.constant 896 : index
    %157 = vector.load %arg9[%c0_138, %c896] : memref<4x4096xf32, #tpu.memory_space<vmem>>, vector<4x128xf32>
    %c0_139 = arith.constant 0 : index
    %c897 = arith.constant 897 : index
    %158 = vector.load %arg9[%c0_139, %c897] : memref<4x4096xf32, #tpu.memory_space<vmem>>, vector<4x128xf32>
    %c0_140 = arith.constant 0 : index
    %c898 = arith.constant 898 : index
    %159 = vector.load %arg9[%c0_140, %c898] : memref<4x4096xf32, #tpu.memory_space<vmem>>, vector<4x128xf32>
    %160 = tpu.concatenate %151, %152, %153, %154, %155, %156, %157, %158, %159 in 0 : vector<4x128xf32>, vector<4x128xf32>, vector<4x128xf32>, vector<4x128xf32>, vector<4x128xf32>, vector<4x128xf32>, vector<4x128xf32>, vector<4x128xf32>, vector<4x128xf32> -> vector<36x128xf32>
    %cst_141 = arith.constant dense<0.000000e+00> : vector<8x128xf32>
    %161 = tpu.matmul %6, %160, %cst_141 {dimension_numbers = #tpu.dot_dimension_numbers<[1], [0], [0], [1], [0, 0, 1, 1], [], []>} : vector<8x36xf32>, vector<36x128xf32>, vector<8x128xf32> -> vector<8x128xf32>
    %162 = vector.broadcast %8 : vector<8x1xf32> to vector<8x128xf32>
    %163 = arith.addf %161, %162 : vector<8x128xf32>
    %cst_142 = arith.constant 0.000000e+00 : f32
    %164 = vector.broadcast %cst_142 : f32 to vector<8x128xf32>
    %165 = arith.maximumf %163, %164 : vector<8x128xf32>
    %c16_i32_143 = arith.constant 16 : i32
    %166 = arith.muli %arg1, %c16_i32_143 : i32
    %c4_i32 = arith.constant 4 : i32
    %167 = arith.addi %166, %c4_i32 : i32
    %c0_i32_144 = arith.constant 0 : i32
    %168 = arith.cmpi sge, %167, %c0_i32_144 : i32
    %c16_i32_145 = arith.constant 16 : i32
    %169 = arith.cmpi slt, %167, %c16_i32_145 : i32
    %170 = arith.andi %168, %169 : i1
    %171 = vector.broadcast %170 : i1 to vector<1x128xi1>
    %172 = arith.andi %15, %171 : vector<1x128xi1>
    %cst_146 = arith.constant 0.000000e+00 : f32
    %173 = vector.shape_cast %172 : vector<1x128xi1> to vector<1x128xi1>
    %174 = vector.broadcast %173 : vector<1x128xi1> to vector<8x128xi1>
    %175 = vector.broadcast %cst_146 : f32 to vector<8x128xf32>
    %176 = arith.select %174, %165, %175 : vector<8x128xi1>, vector<8x128xf32>
    %c0_147 = arith.constant 0 : index
    %c640_148 = arith.constant 640 : index
    %177 = vector.load %arg10[%c0_147, %c640_148] : memref<8x2432xf32, #tpu.memory_space<vmem>>, vector<8x128xf32>
    tpu.vector_store %arg10[%c0_147, %c640_148], %176 {strides = array<i32>} : memref<8x2432xf32, #tpu.memory_space<vmem>>, vector<8x128xf32>,
    %c0_149 = arith.constant 0 : index
    %c768_150 = arith.constant 768 : index
    %178 = vector.load %arg9[%c0_149, %c768_150] : memref<4x4096xf32, #tpu.memory_space<vmem>>, vector<4x128xf32>
    %c0_151 = arith.constant 0 : index
    %c769_152 = arith.constant 769 : index
    %179 = vector.load %arg9[%c0_151, %c769_152] : memref<4x4096xf32, #tpu.memory_space<vmem>>, vector<4x128xf32>
    %c0_153 = arith.constant 0 : index
    %c770_154 = arith.constant 770 : index
    %180 = vector.load %arg9[%c0_153, %c770_154] : memref<4x4096xf32, #tpu.memory_space<vmem>>, vector<4x128xf32>
    %c0_155 = arith.constant 0 : index
    %c896_156 = arith.constant 896 : index
    %181 = vector.load %arg9[%c0_155, %c896_156] : memref<4x4096xf32, #tpu.memory_space<vmem>>, vector<4x128xf32>
    %c0_157 = arith.constant 0 : index
    %c897_158 = arith.constant 897 : index
    %182 = vector.load %arg9[%c0_157, %c897_158] : memref<4x4096xf32, #tpu.memory_space<vmem>>, vector<4x128xf32>
    %c0_159 = arith.constant 0 : index
    %c898_160 = arith.constant 898 : index
    %183 = vector.load %arg9[%c0_159, %c898_160] : memref<4x4096xf32, #tpu.memory_space<vmem>>, vector<4x128xf32>
    %c0_161 = arith.constant 0 : index
    %c1024 = arith.constant 1024 : index
    %184 = vector.load %arg9[%c0_161, %c1024] : memref<4x4096xf32, #tpu.memory_space<vmem>>, vector<4x128xf32>
    %c0_162 = arith.constant 0 : index
    %c1025 = arith.constant 1025 : index
    %185 = vector.load %arg9[%c0_162, %c1025] : memref<4x4096xf32, #tpu.memory_space<vmem>>, vector<4x128xf32>
    %c0_163 = arith.constant 0 : index
    %c1026 = arith.constant 1026 : index
    %186 = vector.load %arg9[%c0_163, %c1026] : memref<4x4096xf32, #tpu.memory_space<vmem>>, vector<4x128xf32>
    %187 = tpu.concatenate %178, %179, %180, %181, %182, %183, %184, %185, %186 in 0 : vector<4x128xf32>, vector<4x128xf32>, vector<4x128xf32>, vector<4x128xf32>, vector<4x128xf32>, vector<4x128xf32>, vector<4x128xf32>, vector<4x128xf32>, vector<4x128xf32> -> vector<36x128xf32>
    %cst_164 = arith.constant dense<0.000000e+00> : vector<8x128xf32>
    %188 = tpu.matmul %6, %187, %cst_164 {dimension_numbers = #tpu.dot_dimension_numbers<[1], [0], [0], [1], [0, 0, 1, 1], [], []>} : vector<8x36xf32>, vector<36x128xf32>, vector<8x128xf32> -> vector<8x128xf32>
    %189 = vector.broadcast %8 : vector<8x1xf32> to vector<8x128xf32>
    %190 = arith.addf %188, %189 : vector<8x128xf32>
    %cst_165 = arith.constant 0.000000e+00 : f32
    %191 = vector.broadcast %cst_165 : f32 to vector<8x128xf32>
    %192 = arith.maximumf %190, %191 : vector<8x128xf32>
    %c16_i32_166 = arith.constant 16 : i32
    %193 = arith.muli %arg1, %c16_i32_166 : i32
    %c5_i32 = arith.constant 5 : i32
    %194 = arith.addi %193, %c5_i32 : i32
    %c0_i32_167 = arith.constant 0 : i32
    %195 = arith.cmpi sge, %194, %c0_i32_167 : i32
    %c16_i32_168 = arith.constant 16 : i32
    %196 = arith.cmpi slt, %194, %c16_i32_168 : i32
    %197 = arith.andi %195, %196 : i1
    %198 = vector.broadcast %197 : i1 to vector<1x128xi1>
    %199 = arith.andi %15, %198 : vector<1x128xi1>
    %cst_169 = arith.constant 0.000000e+00 : f32
    %200 = vector.shape_cast %199 : vector<1x128xi1> to vector<1x128xi1>
    %201 = vector.broadcast %200 : vector<1x128xi1> to vector<8x128xi1>
    %202 = vector.broadcast %cst_169 : f32 to vector<8x128xf32>
    %203 = arith.select %201, %192, %202 : vector<8x128xi1>, vector<8x128xf32>
    %c0_170 = arith.constant 0 : index
    %c768_171 = arith.constant 768 : index
    %204 = vector.load %arg10[%c0_170, %c768_171] : memref<8x2432xf32, #tpu.memory_space<vmem>>, vector<8x128xf32>
    tpu.vector_store %arg10[%c0_170, %c768_171], %203 {strides = array<i32>} : memref<8x2432xf32, #tpu.memory_space<vmem>>, vector<8x128xf32>,
    %c0_172 = arith.constant 0 : index
    %c896_173 = arith.constant 896 : index
    %205 = vector.load %arg9[%c0_172, %c896_173] : memref<4x4096xf32, #tpu.memory_space<vmem>>, vector<4x128xf32>
    %c0_174 = arith.constant 0 : index
    %c897_175 = arith.constant 897 : index
    %206 = vector.load %arg9[%c0_174, %c897_175] : memref<4x4096xf32, #tpu.memory_space<vmem>>, vector<4x128xf32>
    %c0_176 = arith.constant 0 : index
    %c898_177 = arith.constant 898 : index
    %207 = vector.load %arg9[%c0_176, %c898_177] : memref<4x4096xf32, #tpu.memory_space<vmem>>, vector<4x128xf32>
    %c0_178 = arith.constant 0 : index
    %c1024_179 = arith.constant 1024 : index
    %208 = vector.load %arg9[%c0_178, %c1024_179] : memref<4x4096xf32, #tpu.memory_space<vmem>>, vector<4x128xf32>
    %c0_180 = arith.constant 0 : index
    %c1025_181 = arith.constant 1025 : index
    %209 = vector.load %arg9[%c0_180, %c1025_181] : memref<4x4096xf32, #tpu.memory_space<vmem>>, vector<4x128xf32>
    %c0_182 = arith.constant 0 : index
    %c1026_183 = arith.constant 1026 : index
    %210 = vector.load %arg9[%c0_182, %c1026_183] : memref<4x4096xf32, #tpu.memory_space<vmem>>, vector<4x128xf32>
    %c0_184 = arith.constant 0 : index
    %c1152 = arith.constant 1152 : index
    %211 = vector.load %arg9[%c0_184, %c1152] : memref<4x4096xf32, #tpu.memory_space<vmem>>, vector<4x128xf32>
    %c0_185 = arith.constant 0 : index
    %c1153 = arith.constant 1153 : index
    %212 = vector.load %arg9[%c0_185, %c1153] : memref<4x4096xf32, #tpu.memory_space<vmem>>, vector<4x128xf32>
    %c0_186 = arith.constant 0 : index
    %c1154 = arith.constant 1154 : index
    %213 = vector.load %arg9[%c0_186, %c1154] : memref<4x4096xf32, #tpu.memory_space<vmem>>, vector<4x128xf32>
    %214 = tpu.concatenate %205, %206, %207, %208, %209, %210, %211, %212, %213 in 0 : vector<4x128xf32>, vector<4x128xf32>, vector<4x128xf32>, vector<4x128xf32>, vector<4x128xf32>, vector<4x128xf32>, vector<4x128xf32>, vector<4x128xf32>, vector<4x128xf32> -> vector<36x128xf32>
    %cst_187 = arith.constant dense<0.000000e+00> : vector<8x128xf32>
    %215 = tpu.matmul %6, %214, %cst_187 {dimension_numbers = #tpu.dot_dimension_numbers<[1], [0], [0], [1], [0, 0, 1, 1], [], []>} : vector<8x36xf32>, vector<36x128xf32>, vector<8x128xf32> -> vector<8x128xf32>
    %216 = vector.broadcast %8 : vector<8x1xf32> to vector<8x128xf32>
    %217 = arith.addf %215, %216 : vector<8x128xf32>
    %cst_188 = arith.constant 0.000000e+00 : f32
    %218 = vector.broadcast %cst_188 : f32 to vector<8x128xf32>
    %219 = arith.maximumf %217, %218 : vector<8x128xf32>
    %c16_i32_189 = arith.constant 16 : i32
    %220 = arith.muli %arg1, %c16_i32_189 : i32
    %c6_i32 = arith.constant 6 : i32
    %221 = arith.addi %220, %c6_i32 : i32
    %c0_i32_190 = arith.constant 0 : i32
    %222 = arith.cmpi sge, %221, %c0_i32_190 : i32
    %c16_i32_191 = arith.constant 16 : i32
    %223 = arith.cmpi slt, %221, %c16_i32_191 : i32
    %224 = arith.andi %222, %223 : i1
    %225 = vector.broadcast %224 : i1 to vector<1x128xi1>
    %226 = arith.andi %15, %225 : vector<1x128xi1>
    %cst_192 = arith.constant 0.000000e+00 : f32
    %227 = vector.shape_cast %226 : vector<1x128xi1> to vector<1x128xi1>
    %228 = vector.broadcast %227 : vector<1x128xi1> to vector<8x128xi1>
    %229 = vector.broadcast %cst_192 : f32 to vector<8x128xf32>
    %230 = arith.select %228, %219, %229 : vector<8x128xi1>, vector<8x128xf32>
    %c0_193 = arith.constant 0 : index
    %c896_194 = arith.constant 896 : index
    %231 = vector.load %arg10[%c0_193, %c896_194] : memref<8x2432xf32, #tpu.memory_space<vmem>>, vector<8x128xf32>
    tpu.vector_store %arg10[%c0_193, %c896_194], %230 {strides = array<i32>} : memref<8x2432xf32, #tpu.memory_space<vmem>>, vector<8x128xf32>,
    %c0_195 = arith.constant 0 : index
    %c1024_196 = arith.constant 1024 : index
    %232 = vector.load %arg9[%c0_195, %c1024_196] : memref<4x4096xf32, #tpu.memory_space<vmem>>, vector<4x128xf32>
    %c0_197 = arith.constant 0 : index
    %c1025_198 = arith.constant 1025 : index
    %233 = vector.load %arg9[%c0_197, %c1025_198] : memref<4x4096xf32, #tpu.memory_space<vmem>>, vector<4x128xf32>
    %c0_199 = arith.constant 0 : index
    %c1026_200 = arith.constant 1026 : index
    %234 = vector.load %arg9[%c0_199, %c1026_200] : memref<4x4096xf32, #tpu.memory_space<vmem>>, vector<4x128xf32>
    %c0_201 = arith.constant 0 : index
    %c1152_202 = arith.constant 1152 : index
    %235 = vector.load %arg9[%c0_201, %c1152_202] : memref<4x4096xf32, #tpu.memory_space<vmem>>, vector<4x128xf32>
    %c0_203 = arith.constant 0 : index
    %c1153_204 = arith.constant 1153 : index
    %236 = vector.load %arg9[%c0_203, %c1153_204] : memref<4x4096xf32, #tpu.memory_space<vmem>>, vector<4x128xf32>
    %c0_205 = arith.constant 0 : index
    %c1154_206 = arith.constant 1154 : index
    %237 = vector.load %arg9[%c0_205, %c1154_206] : memref<4x4096xf32, #tpu.memory_space<vmem>>, vector<4x128xf32>
    %c0_207 = arith.constant 0 : index
    %c1280 = arith.constant 1280 : index
    %238 = vector.load %arg9[%c0_207, %c1280] : memref<4x4096xf32, #tpu.memory_space<vmem>>, vector<4x128xf32>
    %c0_208 = arith.constant 0 : index
    %c1281 = arith.constant 1281 : index
    %239 = vector.load %arg9[%c0_208, %c1281] : memref<4x4096xf32, #tpu.memory_space<vmem>>, vector<4x128xf32>
    %c0_209 = arith.constant 0 : index
    %c1282 = arith.constant 1282 : index
    %240 = vector.load %arg9[%c0_209, %c1282] : memref<4x4096xf32, #tpu.memory_space<vmem>>, vector<4x128xf32>
    %241 = tpu.concatenate %232, %233, %234, %235, %236, %237, %238, %239, %240 in 0 : vector<4x128xf32>, vector<4x128xf32>, vector<4x128xf32>, vector<4x128xf32>, vector<4x128xf32>, vector<4x128xf32>, vector<4x128xf32>, vector<4x128xf32>, vector<4x128xf32> -> vector<36x128xf32>
    %cst_210 = arith.constant dense<0.000000e+00> : vector<8x128xf32>
    %242 = tpu.matmul %6, %241, %cst_210 {dimension_numbers = #tpu.dot_dimension_numbers<[1], [0], [0], [1], [0, 0, 1, 1], [], []>} : vector<8x36xf32>, vector<36x128xf32>, vector<8x128xf32> -> vector<8x128xf32>
    %243 = vector.broadcast %8 : vector<8x1xf32> to vector<8x128xf32>
    %244 = arith.addf %242, %243 : vector<8x128xf32>
    %cst_211 = arith.constant 0.000000e+00 : f32
    %245 = vector.broadcast %cst_211 : f32 to vector<8x128xf32>
    %246 = arith.maximumf %244, %245 : vector<8x128xf32>
    %c16_i32_212 = arith.constant 16 : i32
    %247 = arith.muli %arg1, %c16_i32_212 : i32
    %c7_i32 = arith.constant 7 : i32
    %248 = arith.addi %247, %c7_i32 : i32
    %c0_i32_213 = arith.constant 0 : i32
    %249 = arith.cmpi sge, %248, %c0_i32_213 : i32
    %c16_i32_214 = arith.constant 16 : i32
    %250 = arith.cmpi slt, %248, %c16_i32_214 : i32
    %251 = arith.andi %249, %250 : i1
    %252 = vector.broadcast %251 : i1 to vector<1x128xi1>
    %253 = arith.andi %15, %252 : vector<1x128xi1>
    %cst_215 = arith.constant 0.000000e+00 : f32
    %254 = vector.shape_cast %253 : vector<1x128xi1> to vector<1x128xi1>
    %255 = vector.broadcast %254 : vector<1x128xi1> to vector<8x128xi1>
    %256 = vector.broadcast %cst_215 : f32 to vector<8x128xf32>
    %257 = arith.select %255, %246, %256 : vector<8x128xi1>, vector<8x128xf32>
    %c0_216 = arith.constant 0 : index
    %c1024_217 = arith.constant 1024 : index
    %258 = vector.load %arg10[%c0_216, %c1024_217] : memref<8x2432xf32, #tpu.memory_space<vmem>>, vector<8x128xf32>
    tpu.vector_store %arg10[%c0_216, %c1024_217], %257 {strides = array<i32>} : memref<8x2432xf32, #tpu.memory_space<vmem>>, vector<8x128xf32>,
    %c0_218 = arith.constant 0 : index
    %c1152_219 = arith.constant 1152 : index
    %259 = vector.load %arg9[%c0_218, %c1152_219] : memref<4x4096xf32, #tpu.memory_space<vmem>>, vector<4x128xf32>
    %c0_220 = arith.constant 0 : index
    %c1153_221 = arith.constant 1153 : index
    %260 = vector.load %arg9[%c0_220, %c1153_221] : memref<4x4096xf32, #tpu.memory_space<vmem>>, vector<4x128xf32>
    %c0_222 = arith.constant 0 : index
    %c1154_223 = arith.constant 1154 : index
    %261 = vector.load %arg9[%c0_222, %c1154_223] : memref<4x4096xf32, #tpu.memory_space<vmem>>, vector<4x128xf32>
    %c0_224 = arith.constant 0 : index
    %c1280_225 = arith.constant 1280 : index
    %262 = vector.load %arg9[%c0_224, %c1280_225] : memref<4x4096xf32, #tpu.memory_space<vmem>>, vector<4x128xf32>
    %c0_226 = arith.constant 0 : index
    %c1281_227 = arith.constant 1281 : index
    %263 = vector.load %arg9[%c0_226, %c1281_227] : memref<4x4096xf32, #tpu.memory_space<vmem>>, vector<4x128xf32>
    %c0_228 = arith.constant 0 : index
    %c1282_229 = arith.constant 1282 : index
    %264 = vector.load %arg9[%c0_228, %c1282_229] : memref<4x4096xf32, #tpu.memory_space<vmem>>, vector<4x128xf32>
    %c0_230 = arith.constant 0 : index
    %c1408 = arith.constant 1408 : index
    %265 = vector.load %arg9[%c0_230, %c1408] : memref<4x4096xf32, #tpu.memory_space<vmem>>, vector<4x128xf32>
    %c0_231 = arith.constant 0 : index
    %c1409 = arith.constant 1409 : index
    %266 = vector.load %arg9[%c0_231, %c1409] : memref<4x4096xf32, #tpu.memory_space<vmem>>, vector<4x128xf32>
    %c0_232 = arith.constant 0 : index
    %c1410 = arith.constant 1410 : index
    %267 = vector.load %arg9[%c0_232, %c1410] : memref<4x4096xf32, #tpu.memory_space<vmem>>, vector<4x128xf32>
    %268 = tpu.concatenate %259, %260, %261, %262, %263, %264, %265, %266, %267 in 0 : vector<4x128xf32>, vector<4x128xf32>, vector<4x128xf32>, vector<4x128xf32>, vector<4x128xf32>, vector<4x128xf32>, vector<4x128xf32>, vector<4x128xf32>, vector<4x128xf32> -> vector<36x128xf32>
    %cst_233 = arith.constant dense<0.000000e+00> : vector<8x128xf32>
    %269 = tpu.matmul %6, %268, %cst_233 {dimension_numbers = #tpu.dot_dimension_numbers<[1], [0], [0], [1], [0, 0, 1, 1], [], []>} : vector<8x36xf32>, vector<36x128xf32>, vector<8x128xf32> -> vector<8x128xf32>
    %270 = vector.broadcast %8 : vector<8x1xf32> to vector<8x128xf32>
    %271 = arith.addf %269, %270 : vector<8x128xf32>
    %cst_234 = arith.constant 0.000000e+00 : f32
    %272 = vector.broadcast %cst_234 : f32 to vector<8x128xf32>
    %273 = arith.maximumf %271, %272 : vector<8x128xf32>
    %c16_i32_235 = arith.constant 16 : i32
    %274 = arith.muli %arg1, %c16_i32_235 : i32
    %c8_i32 = arith.constant 8 : i32
    %275 = arith.addi %274, %c8_i32 : i32
    %c0_i32_236 = arith.constant 0 : i32
    %276 = arith.cmpi sge, %275, %c0_i32_236 : i32
    %c16_i32_237 = arith.constant 16 : i32
    %277 = arith.cmpi slt, %275, %c16_i32_237 : i32
    %278 = arith.andi %276, %277 : i1
    %279 = vector.broadcast %278 : i1 to vector<1x128xi1>
    %280 = arith.andi %15, %279 : vector<1x128xi1>
    %cst_238 = arith.constant 0.000000e+00 : f32
    %281 = vector.shape_cast %280 : vector<1x128xi1> to vector<1x128xi1>
    %282 = vector.broadcast %281 : vector<1x128xi1> to vector<8x128xi1>
    %283 = vector.broadcast %cst_238 : f32 to vector<8x128xf32>
    %284 = arith.select %282, %273, %283 : vector<8x128xi1>, vector<8x128xf32>
    %c0_239 = arith.constant 0 : index
    %c1152_240 = arith.constant 1152 : index
    %285 = vector.load %arg10[%c0_239, %c1152_240] : memref<8x2432xf32, #tpu.memory_space<vmem>>, vector<8x128xf32>
    tpu.vector_store %arg10[%c0_239, %c1152_240], %284 {strides = array<i32>} : memref<8x2432xf32, #tpu.memory_space<vmem>>, vector<8x128xf32>,
    %c0_241 = arith.constant 0 : index
    %c1280_242 = arith.constant 1280 : index
    %286 = vector.load %arg9[%c0_241, %c1280_242] : memref<4x4096xf32, #tpu.memory_space<vmem>>, vector<4x128xf32>
    %c0_243 = arith.constant 0 : index
    %c1281_244 = arith.constant 1281 : index
    %287 = vector.load %arg9[%c0_243, %c1281_244] : memref<4x4096xf32, #tpu.memory_space<vmem>>, vector<4x128xf32>
    %c0_245 = arith.constant 0 : index
    %c1282_246 = arith.constant 1282 : index
    %288 = vector.load %arg9[%c0_245, %c1282_246] : memref<4x4096xf32, #tpu.memory_space<vmem>>, vector<4x128xf32>
    %c0_247 = arith.constant 0 : index
    %c1408_248 = arith.constant 1408 : index
    %289 = vector.load %arg9[%c0_247, %c1408_248] : memref<4x4096xf32, #tpu.memory_space<vmem>>, vector<4x128xf32>
    %c0_249 = arith.constant 0 : index
    %c1409_250 = arith.constant 1409 : index
    %290 = vector.load %arg9[%c0_249, %c1409_250] : memref<4x4096xf32, #tpu.memory_space<vmem>>, vector<4x128xf32>
    %c0_251 = arith.constant 0 : index
    %c1410_252 = arith.constant 1410 : index
    %291 = vector.load %arg9[%c0_251, %c1410_252] : memref<4x4096xf32, #tpu.memory_space<vmem>>, vector<4x128xf32>
    %c0_253 = arith.constant 0 : index
    %c1536 = arith.constant 1536 : index
    %292 = vector.load %arg9[%c0_253, %c1536] : memref<4x4096xf32, #tpu.memory_space<vmem>>, vector<4x128xf32>
    %c0_254 = arith.constant 0 : index
    %c1537 = arith.constant 1537 : index
    %293 = vector.load %arg9[%c0_254, %c1537] : memref<4x4096xf32, #tpu.memory_space<vmem>>, vector<4x128xf32>
    %c0_255 = arith.constant 0 : index
    %c1538 = arith.constant 1538 : index
    %294 = vector.load %arg9[%c0_255, %c1538] : memref<4x4096xf32, #tpu.memory_space<vmem>>, vector<4x128xf32>
    %295 = tpu.concatenate %286, %287, %288, %289, %290, %291, %292, %293, %294 in 0 : vector<4x128xf32>, vector<4x128xf32>, vector<4x128xf32>, vector<4x128xf32>, vector<4x128xf32>, vector<4x128xf32>, vector<4x128xf32>, vector<4x128xf32>, vector<4x128xf32> -> vector<36x128xf32>
    %cst_256 = arith.constant dense<0.000000e+00> : vector<8x128xf32>
    %296 = tpu.matmul %6, %295, %cst_256 {dimension_numbers = #tpu.dot_dimension_numbers<[1], [0], [0], [1], [0, 0, 1, 1], [], []>} : vector<8x36xf32>, vector<36x128xf32>, vector<8x128xf32> -> vector<8x128xf32>
    %297 = vector.broadcast %8 : vector<8x1xf32> to vector<8x128xf32>
    %298 = arith.addf %296, %297 : vector<8x128xf32>
    %cst_257 = arith.constant 0.000000e+00 : f32
    %299 = vector.broadcast %cst_257 : f32 to vector<8x128xf32>
    %300 = arith.maximumf %298, %299 : vector<8x128xf32>
    %c16_i32_258 = arith.constant 16 : i32
    %301 = arith.muli %arg1, %c16_i32_258 : i32
    %c9_i32 = arith.constant 9 : i32
    %302 = arith.addi %301, %c9_i32 : i32
    %c0_i32_259 = arith.constant 0 : i32
    %303 = arith.cmpi sge, %302, %c0_i32_259 : i32
    %c16_i32_260 = arith.constant 16 : i32
    %304 = arith.cmpi slt, %302, %c16_i32_260 : i32
    %305 = arith.andi %303, %304 : i1
    %306 = vector.broadcast %305 : i1 to vector<1x128xi1>
    %307 = arith.andi %15, %306 : vector<1x128xi1>
    %cst_261 = arith.constant 0.000000e+00 : f32
    %308 = vector.shape_cast %307 : vector<1x128xi1> to vector<1x128xi1>
    %309 = vector.broadcast %308 : vector<1x128xi1> to vector<8x128xi1>
    %310 = vector.broadcast %cst_261 : f32 to vector<8x128xf32>
    %311 = arith.select %309, %300, %310 : vector<8x128xi1>, vector<8x128xf32>
    %c0_262 = arith.constant 0 : index
    %c1280_263 = arith.constant 1280 : index
    %312 = vector.load %arg10[%c0_262, %c1280_263] : memref<8x2432xf32, #tpu.memory_space<vmem>>, vector<8x128xf32>
    tpu.vector_store %arg10[%c0_262, %c1280_263], %311 {strides = array<i32>} : memref<8x2432xf32, #tpu.memory_space<vmem>>, vector<8x128xf32>,
    %c0_264 = arith.constant 0 : index
    %c1408_265 = arith.constant 1408 : index
    %313 = vector.load %arg9[%c0_264, %c1408_265] : memref<4x4096xf32, #tpu.memory_space<vmem>>, vector<4x128xf32>
    %c0_266 = arith.constant 0 : index
    %c1409_267 = arith.constant 1409 : index
    %314 = vector.load %arg9[%c0_266, %c1409_267] : memref<4x4096xf32, #tpu.memory_space<vmem>>, vector<4x128xf32>
    %c0_268 = arith.constant 0 : index
    %c1410_269 = arith.constant 1410 : index
    %315 = vector.load %arg9[%c0_268, %c1410_269] : memref<4x4096xf32, #tpu.memory_space<vmem>>, vector<4x128xf32>
    %c0_270 = arith.constant 0 : index
    %c1536_271 = arith.constant 1536 : index
    %316 = vector.load %arg9[%c0_270, %c1536_271] : memref<4x4096xf32, #tpu.memory_space<vmem>>, vector<4x128xf32>
    %c0_272 = arith.constant 0 : index
    %c1537_273 = arith.constant 1537 : index
    %317 = vector.load %arg9[%c0_272, %c1537_273] : memref<4x4096xf32, #tpu.memory_space<vmem>>, vector<4x128xf32>
    %c0_274 = arith.constant 0 : index
    %c1538_275 = arith.constant 1538 : index
    %318 = vector.load %arg9[%c0_274, %c1538_275] : memref<4x4096xf32, #tpu.memory_space<vmem>>, vector<4x128xf32>
    %c0_276 = arith.constant 0 : index
    %c1664 = arith.constant 1664 : index
    %319 = vector.load %arg9[%c0_276, %c1664] : memref<4x4096xf32, #tpu.memory_space<vmem>>, vector<4x128xf32>
    %c0_277 = arith.constant 0 : index
    %c1665 = arith.constant 1665 : index
    %320 = vector.load %arg9[%c0_277, %c1665] : memref<4x4096xf32, #tpu.memory_space<vmem>>, vector<4x128xf32>
    %c0_278 = arith.constant 0 : index
    %c1666 = arith.constant 1666 : index
    %321 = vector.load %arg9[%c0_278, %c1666] : memref<4x4096xf32, #tpu.memory_space<vmem>>, vector<4x128xf32>
    %322 = tpu.concatenate %313, %314, %315, %316, %317, %318, %319, %320, %321 in 0 : vector<4x128xf32>, vector<4x128xf32>, vector<4x128xf32>, vector<4x128xf32>, vector<4x128xf32>, vector<4x128xf32>, vector<4x128xf32>, vector<4x128xf32>, vector<4x128xf32> -> vector<36x128xf32>
    %cst_279 = arith.constant dense<0.000000e+00> : vector<8x128xf32>
    %323 = tpu.matmul %6, %322, %cst_279 {dimension_numbers = #tpu.dot_dimension_numbers<[1], [0], [0], [1], [0, 0, 1, 1], [], []>} : vector<8x36xf32>, vector<36x128xf32>, vector<8x128xf32> -> vector<8x128xf32>
    %324 = vector.broadcast %8 : vector<8x1xf32> to vector<8x128xf32>
    %325 = arith.addf %323, %324 : vector<8x128xf32>
    %cst_280 = arith.constant 0.000000e+00 : f32
    %326 = vector.broadcast %cst_280 : f32 to vector<8x128xf32>
    %327 = arith.maximumf %325, %326 : vector<8x128xf32>
    %c16_i32_281 = arith.constant 16 : i32
    %328 = arith.muli %arg1, %c16_i32_281 : i32
    %c10_i32 = arith.constant 10 : i32
    %329 = arith.addi %328, %c10_i32 : i32
    %c0_i32_282 = arith.constant 0 : i32
    %330 = arith.cmpi sge, %329, %c0_i32_282 : i32
    %c16_i32_283 = arith.constant 16 : i32
    %331 = arith.cmpi slt, %329, %c16_i32_283 : i32
    %332 = arith.andi %330, %331 : i1
    %333 = vector.broadcast %332 : i1 to vector<1x128xi1>
    %334 = arith.andi %15, %333 : vector<1x128xi1>
    %cst_284 = arith.constant 0.000000e+00 : f32
    %335 = vector.shape_cast %334 : vector<1x128xi1> to vector<1x128xi1>
    %336 = vector.broadcast %335 : vector<1x128xi1> to vector<8x128xi1>
    %337 = vector.broadcast %cst_284 : f32 to vector<8x128xf32>
    %338 = arith.select %336, %327, %337 : vector<8x128xi1>, vector<8x128xf32>
    %c0_285 = arith.constant 0 : index
    %c1408_286 = arith.constant 1408 : index
    %339 = vector.load %arg10[%c0_285, %c1408_286] : memref<8x2432xf32, #tpu.memory_space<vmem>>, vector<8x128xf32>
    tpu.vector_store %arg10[%c0_285, %c1408_286], %338 {strides = array<i32>} : memref<8x2432xf32, #tpu.memory_space<vmem>>, vector<8x128xf32>,
    %c0_287 = arith.constant 0 : index
    %c1536_288 = arith.constant 1536 : index
    %340 = vector.load %arg9[%c0_287, %c1536_288] : memref<4x4096xf32, #tpu.memory_space<vmem>>, vector<4x128xf32>
    %c0_289 = arith.constant 0 : index
    %c1537_290 = arith.constant 1537 : index
    %341 = vector.load %arg9[%c0_289, %c1537_290] : memref<4x4096xf32, #tpu.memory_space<vmem>>, vector<4x128xf32>
    %c0_291 = arith.constant 0 : index
    %c1538_292 = arith.constant 1538 : index
    %342 = vector.load %arg9[%c0_291, %c1538_292] : memref<4x4096xf32, #tpu.memory_space<vmem>>, vector<4x128xf32>
    %c0_293 = arith.constant 0 : index
    %c1664_294 = arith.constant 1664 : index
    %343 = vector.load %arg9[%c0_293, %c1664_294] : memref<4x4096xf32, #tpu.memory_space<vmem>>, vector<4x128xf32>
    %c0_295 = arith.constant 0 : index
    %c1665_296 = arith.constant 1665 : index
    %344 = vector.load %arg9[%c0_295, %c1665_296] : memref<4x4096xf32, #tpu.memory_space<vmem>>, vector<4x128xf32>
    %c0_297 = arith.constant 0 : index
    %c1666_298 = arith.constant 1666 : index
    %345 = vector.load %arg9[%c0_297, %c1666_298] : memref<4x4096xf32, #tpu.memory_space<vmem>>, vector<4x128xf32>
    %c0_299 = arith.constant 0 : index
    %c1792 = arith.constant 1792 : index
    %346 = vector.load %arg9[%c0_299, %c1792] : memref<4x4096xf32, #tpu.memory_space<vmem>>, vector<4x128xf32>
    %c0_300 = arith.constant 0 : index
    %c1793 = arith.constant 1793 : index
    %347 = vector.load %arg9[%c0_300, %c1793] : memref<4x4096xf32, #tpu.memory_space<vmem>>, vector<4x128xf32>
    %c0_301 = arith.constant 0 : index
    %c1794 = arith.constant 1794 : index
    %348 = vector.load %arg9[%c0_301, %c1794] : memref<4x4096xf32, #tpu.memory_space<vmem>>, vector<4x128xf32>
    %349 = tpu.concatenate %340, %341, %342, %343, %344, %345, %346, %347, %348 in 0 : vector<4x128xf32>, vector<4x128xf32>, vector<4x128xf32>, vector<4x128xf32>, vector<4x128xf32>, vector<4x128xf32>, vector<4x128xf32>, vector<4x128xf32>, vector<4x128xf32> -> vector<36x128xf32>
    %cst_302 = arith.constant dense<0.000000e+00> : vector<8x128xf32>
    %350 = tpu.matmul %6, %349, %cst_302 {dimension_numbers = #tpu.dot_dimension_numbers<[1], [0], [0], [1], [0, 0, 1, 1], [], []>} : vector<8x36xf32>, vector<36x128xf32>, vector<8x128xf32> -> vector<8x128xf32>
    %351 = vector.broadcast %8 : vector<8x1xf32> to vector<8x128xf32>
    %352 = arith.addf %350, %351 : vector<8x128xf32>
    %cst_303 = arith.constant 0.000000e+00 : f32
    %353 = vector.broadcast %cst_303 : f32 to vector<8x128xf32>
    %354 = arith.maximumf %352, %353 : vector<8x128xf32>
    %c16_i32_304 = arith.constant 16 : i32
    %355 = arith.muli %arg1, %c16_i32_304 : i32
    %c11_i32 = arith.constant 11 : i32
    %356 = arith.addi %355, %c11_i32 : i32
    %c0_i32_305 = arith.constant 0 : i32
    %357 = arith.cmpi sge, %356, %c0_i32_305 : i32
    %c16_i32_306 = arith.constant 16 : i32
    %358 = arith.cmpi slt, %356, %c16_i32_306 : i32
    %359 = arith.andi %357, %358 : i1
    %360 = vector.broadcast %359 : i1 to vector<1x128xi1>
    %361 = arith.andi %15, %360 : vector<1x128xi1>
    %cst_307 = arith.constant 0.000000e+00 : f32
    %362 = vector.shape_cast %361 : vector<1x128xi1> to vector<1x128xi1>
    %363 = vector.broadcast %362 : vector<1x128xi1> to vector<8x128xi1>
    %364 = vector.broadcast %cst_307 : f32 to vector<8x128xf32>
    %365 = arith.select %363, %354, %364 : vector<8x128xi1>, vector<8x128xf32>
    %c0_308 = arith.constant 0 : index
    %c1536_309 = arith.constant 1536 : index
    %366 = vector.load %arg10[%c0_308, %c1536_309] : memref<8x2432xf32, #tpu.memory_space<vmem>>, vector<8x128xf32>
    tpu.vector_store %arg10[%c0_308, %c1536_309], %365 {strides = array<i32>} : memref<8x2432xf32, #tpu.memory_space<vmem>>, vector<8x128xf32>,
    %c0_310 = arith.constant 0 : index
    %c1664_311 = arith.constant 1664 : index
    %367 = vector.load %arg9[%c0_310, %c1664_311] : memref<4x4096xf32, #tpu.memory_space<vmem>>, vector<4x128xf32>
    %c0_312 = arith.constant 0 : index
    %c1665_313 = arith.constant 1665 : index
    %368 = vector.load %arg9[%c0_312, %c1665_313] : memref<4x4096xf32, #tpu.memory_space<vmem>>, vector<4x128xf32>
    %c0_314 = arith.constant 0 : index
    %c1666_315 = arith.constant 1666 : index
    %369 = vector.load %arg9[%c0_314, %c1666_315] : memref<4x4096xf32, #tpu.memory_space<vmem>>, vector<4x128xf32>
    %c0_316 = arith.constant 0 : index
    %c1792_317 = arith.constant 1792 : index
    %370 = vector.load %arg9[%c0_316, %c1792_317] : memref<4x4096xf32, #tpu.memory_space<vmem>>, vector<4x128xf32>
    %c0_318 = arith.constant 0 : index
    %c1793_319 = arith.constant 1793 : index
    %371 = vector.load %arg9[%c0_318, %c1793_319] : memref<4x4096xf32, #tpu.memory_space<vmem>>, vector<4x128xf32>
    %c0_320 = arith.constant 0 : index
    %c1794_321 = arith.constant 1794 : index
    %372 = vector.load %arg9[%c0_320, %c1794_321] : memref<4x4096xf32, #tpu.memory_space<vmem>>, vector<4x128xf32>
    %c0_322 = arith.constant 0 : index
    %c1920 = arith.constant 1920 : index
    %373 = vector.load %arg9[%c0_322, %c1920] : memref<4x4096xf32, #tpu.memory_space<vmem>>, vector<4x128xf32>
    %c0_323 = arith.constant 0 : index
    %c1921 = arith.constant 1921 : index
    %374 = vector.load %arg9[%c0_323, %c1921] : memref<4x4096xf32, #tpu.memory_space<vmem>>, vector<4x128xf32>
    %c0_324 = arith.constant 0 : index
    %c1922 = arith.constant 1922 : index
    %375 = vector.load %arg9[%c0_324, %c1922] : memref<4x4096xf32, #tpu.memory_space<vmem>>, vector<4x128xf32>
    %376 = tpu.concatenate %367, %368, %369, %370, %371, %372, %373, %374, %375 in 0 : vector<4x128xf32>, vector<4x128xf32>, vector<4x128xf32>, vector<4x128xf32>, vector<4x128xf32>, vector<4x128xf32>, vector<4x128xf32>, vector<4x128xf32>, vector<4x128xf32> -> vector<36x128xf32>
    %cst_325 = arith.constant dense<0.000000e+00> : vector<8x128xf32>
    %377 = tpu.matmul %6, %376, %cst_325 {dimension_numbers = #tpu.dot_dimension_numbers<[1], [0], [0], [1], [0, 0, 1, 1], [], []>} : vector<8x36xf32>, vector<36x128xf32>, vector<8x128xf32> -> vector<8x128xf32>
    %378 = vector.broadcast %8 : vector<8x1xf32> to vector<8x128xf32>
    %379 = arith.addf %377, %378 : vector<8x128xf32>
    %cst_326 = arith.constant 0.000000e+00 : f32
    %380 = vector.broadcast %cst_326 : f32 to vector<8x128xf32>
    %381 = arith.maximumf %379, %380 : vector<8x128xf32>
    %c16_i32_327 = arith.constant 16 : i32
    %382 = arith.muli %arg1, %c16_i32_327 : i32
    %c12_i32 = arith.constant 12 : i32
    %383 = arith.addi %382, %c12_i32 : i32
    %c0_i32_328 = arith.constant 0 : i32
    %384 = arith.cmpi sge, %383, %c0_i32_328 : i32
    %c16_i32_329 = arith.constant 16 : i32
    %385 = arith.cmpi slt, %383, %c16_i32_329 : i32
    %386 = arith.andi %384, %385 : i1
    %387 = vector.broadcast %386 : i1 to vector<1x128xi1>
    %388 = arith.andi %15, %387 : vector<1x128xi1>
    %cst_330 = arith.constant 0.000000e+00 : f32
    %389 = vector.shape_cast %388 : vector<1x128xi1> to vector<1x128xi1>
    %390 = vector.broadcast %389 : vector<1x128xi1> to vector<8x128xi1>
    %391 = vector.broadcast %cst_330 : f32 to vector<8x128xf32>
    %392 = arith.select %390, %381, %391 : vector<8x128xi1>, vector<8x128xf32>
    %c0_331 = arith.constant 0 : index
    %c1664_332 = arith.constant 1664 : index
    %393 = vector.load %arg10[%c0_331, %c1664_332] : memref<8x2432xf32, #tpu.memory_space<vmem>>, vector<8x128xf32>
    tpu.vector_store %arg10[%c0_331, %c1664_332], %392 {strides = array<i32>} : memref<8x2432xf32, #tpu.memory_space<vmem>>, vector<8x128xf32>,
    %c0_333 = arith.constant 0 : index
    %c1792_334 = arith.constant 1792 : index
    %394 = vector.load %arg9[%c0_333, %c1792_334] : memref<4x4096xf32, #tpu.memory_space<vmem>>, vector<4x128xf32>
    %c0_335 = arith.constant 0 : index
    %c1793_336 = arith.constant 1793 : index
    %395 = vector.load %arg9[%c0_335, %c1793_336] : memref<4x4096xf32, #tpu.memory_space<vmem>>, vector<4x128xf32>
    %c0_337 = arith.constant 0 : index
    %c1794_338 = arith.constant 1794 : index
    %396 = vector.load %arg9[%c0_337, %c1794_338] : memref<4x4096xf32, #tpu.memory_space<vmem>>, vector<4x128xf32>
    %c0_339 = arith.constant 0 : index
    %c1920_340 = arith.constant 1920 : index
    %397 = vector.load %arg9[%c0_339, %c1920_340] : memref<4x4096xf32, #tpu.memory_space<vmem>>, vector<4x128xf32>
    %c0_341 = arith.constant 0 : index
    %c1921_342 = arith.constant 1921 : index
    %398 = vector.load %arg9[%c0_341, %c1921_342] : memref<4x4096xf32, #tpu.memory_space<vmem>>, vector<4x128xf32>
    %c0_343 = arith.constant 0 : index
    %c1922_344 = arith.constant 1922 : index
    %399 = vector.load %arg9[%c0_343, %c1922_344] : memref<4x4096xf32, #tpu.memory_space<vmem>>, vector<4x128xf32>
    %c0_345 = arith.constant 0 : index
    %c2048_346 = arith.constant 2048 : index
    %400 = vector.load %arg9[%c0_345, %c2048_346] : memref<4x4096xf32, #tpu.memory_space<vmem>>, vector<4x128xf32>
    %c0_347 = arith.constant 0 : index
    %c2049 = arith.constant 2049 : index
    %401 = vector.load %arg9[%c0_347, %c2049] : memref<4x4096xf32, #tpu.memory_space<vmem>>, vector<4x128xf32>
    %c0_348 = arith.constant 0 : index
    %c2050 = arith.constant 2050 : index
    %402 = vector.load %arg9[%c0_348, %c2050] : memref<4x4096xf32, #tpu.memory_space<vmem>>, vector<4x128xf32>
    %403 = tpu.concatenate %394, %395, %396, %397, %398, %399, %400, %401, %402 in 0 : vector<4x128xf32>, vector<4x128xf32>, vector<4x128xf32>, vector<4x128xf32>, vector<4x128xf32>, vector<4x128xf32>, vector<4x128xf32>, vector<4x128xf32>, vector<4x128xf32> -> vector<36x128xf32>
    %cst_349 = arith.constant dense<0.000000e+00> : vector<8x128xf32>
    %404 = tpu.matmul %6, %403, %cst_349 {dimension_numbers = #tpu.dot_dimension_numbers<[1], [0], [0], [1], [0, 0, 1, 1], [], []>} : vector<8x36xf32>, vector<36x128xf32>, vector<8x128xf32> -> vector<8x128xf32>
    %405 = vector.broadcast %8 : vector<8x1xf32> to vector<8x128xf32>
    %406 = arith.addf %404, %405 : vector<8x128xf32>
    %cst_350 = arith.constant 0.000000e+00 : f32
    %407 = vector.broadcast %cst_350 : f32 to vector<8x128xf32>
    %408 = arith.maximumf %406, %407 : vector<8x128xf32>
    %c16_i32_351 = arith.constant 16 : i32
    %409 = arith.muli %arg1, %c16_i32_351 : i32
    %c13_i32 = arith.constant 13 : i32
    %410 = arith.addi %409, %c13_i32 : i32
    %c0_i32_352 = arith.constant 0 : i32
    %411 = arith.cmpi sge, %410, %c0_i32_352 : i32
    %c16_i32_353 = arith.constant 16 : i32
    %412 = arith.cmpi slt, %410, %c16_i32_353 : i32
    %413 = arith.andi %411, %412 : i1
    %414 = vector.broadcast %413 : i1 to vector<1x128xi1>
    %415 = arith.andi %15, %414 : vector<1x128xi1>
    %cst_354 = arith.constant 0.000000e+00 : f32
    %416 = vector.shape_cast %415 : vector<1x128xi1> to vector<1x128xi1>
    %417 = vector.broadcast %416 : vector<1x128xi1> to vector<8x128xi1>
    %418 = vector.broadcast %cst_354 : f32 to vector<8x128xf32>
    %419 = arith.select %417, %408, %418 : vector<8x128xi1>, vector<8x128xf32>
    %c0_355 = arith.constant 0 : index
    %c1792_356 = arith.constant 1792 : index
    %420 = vector.load %arg10[%c0_355, %c1792_356] : memref<8x2432xf32, #tpu.memory_space<vmem>>, vector<8x128xf32>
    tpu.vector_store %arg10[%c0_355, %c1792_356], %419 {strides = array<i32>} : memref<8x2432xf32, #tpu.memory_space<vmem>>, vector<8x128xf32>,
    %c0_357 = arith.constant 0 : index
    %c1920_358 = arith.constant 1920 : index
    %421 = vector.load %arg9[%c0_357, %c1920_358] : memref<4x4096xf32, #tpu.memory_space<vmem>>, vector<4x128xf32>
    %c0_359 = arith.constant 0 : index
    %c1921_360 = arith.constant 1921 : index
    %422 = vector.load %arg9[%c0_359, %c1921_360] : memref<4x4096xf32, #tpu.memory_space<vmem>>, vector<4x128xf32>
    %c0_361 = arith.constant 0 : index
    %c1922_362 = arith.constant 1922 : index
    %423 = vector.load %arg9[%c0_361, %c1922_362] : memref<4x4096xf32, #tpu.memory_space<vmem>>, vector<4x128xf32>
    %c0_363 = arith.constant 0 : index
    %c2048_364 = arith.constant 2048 : index
    %424 = vector.load %arg9[%c0_363, %c2048_364] : memref<4x4096xf32, #tpu.memory_space<vmem>>, vector<4x128xf32>
    %c0_365 = arith.constant 0 : index
    %c2049_366 = arith.constant 2049 : index
    %425 = vector.load %arg9[%c0_365, %c2049_366] : memref<4x4096xf32, #tpu.memory_space<vmem>>, vector<4x128xf32>
    %c0_367 = arith.constant 0 : index
    %c2050_368 = arith.constant 2050 : index
    %426 = vector.load %arg9[%c0_367, %c2050_368] : memref<4x4096xf32, #tpu.memory_space<vmem>>, vector<4x128xf32>
    %c0_369 = arith.constant 0 : index
    %c2176 = arith.constant 2176 : index
    %427 = vector.load %arg9[%c0_369, %c2176] : memref<4x4096xf32, #tpu.memory_space<vmem>>, vector<4x128xf32>
    %c0_370 = arith.constant 0 : index
    %c2177 = arith.constant 2177 : index
    %428 = vector.load %arg9[%c0_370, %c2177] : memref<4x4096xf32, #tpu.memory_space<vmem>>, vector<4x128xf32>
    %c0_371 = arith.constant 0 : index
    %c2178 = arith.constant 2178 : index
    %429 = vector.load %arg9[%c0_371, %c2178] : memref<4x4096xf32, #tpu.memory_space<vmem>>, vector<4x128xf32>
    %430 = tpu.concatenate %421, %422, %423, %424, %425, %426, %427, %428, %429 in 0 : vector<4x128xf32>, vector<4x128xf32>, vector<4x128xf32>, vector<4x128xf32>, vector<4x128xf32>, vector<4x128xf32>, vector<4x128xf32>, vector<4x128xf32>, vector<4x128xf32> -> vector<36x128xf32>
    %cst_372 = arith.constant dense<0.000000e+00> : vector<8x128xf32>
    %431 = tpu.matmul %6, %430, %cst_372 {dimension_numbers = #tpu.dot_dimension_numbers<[1], [0], [0], [1], [0, 0, 1, 1], [], []>} : vector<8x36xf32>, vector<36x128xf32>, vector<8x128xf32> -> vector<8x128xf32>
    %432 = vector.broadcast %8 : vector<8x1xf32> to vector<8x128xf32>
    %433 = arith.addf %431, %432 : vector<8x128xf32>
    %cst_373 = arith.constant 0.000000e+00 : f32
    %434 = vector.broadcast %cst_373 : f32 to vector<8x128xf32>
    %435 = arith.maximumf %433, %434 : vector<8x128xf32>
    %c16_i32_374 = arith.constant 16 : i32
    %436 = arith.muli %arg1, %c16_i32_374 : i32
    %c14_i32 = arith.constant 14 : i32
    %437 = arith.addi %436, %c14_i32 : i32
    %c0_i32_375 = arith.constant 0 : i32
    %438 = arith.cmpi sge, %437, %c0_i32_375 : i32
    %c16_i32_376 = arith.constant 16 : i32
    %439 = arith.cmpi slt, %437, %c16_i32_376 : i32
    %440 = arith.andi %438, %439 : i1
    %441 = vector.broadcast %440 : i1 to vector<1x128xi1>
    %442 = arith.andi %15, %441 : vector<1x128xi1>
    %cst_377 = arith.constant 0.000000e+00 : f32
    %443 = vector.shape_cast %442 : vector<1x128xi1> to vector<1x128xi1>
    %444 = vector.broadcast %443 : vector<1x128xi1> to vector<8x128xi1>
    %445 = vector.broadcast %cst_377 : f32 to vector<8x128xf32>
    %446 = arith.select %444, %435, %445 : vector<8x128xi1>, vector<8x128xf32>
    %c0_378 = arith.constant 0 : index
    %c1920_379 = arith.constant 1920 : index
    %447 = vector.load %arg10[%c0_378, %c1920_379] : memref<8x2432xf32, #tpu.memory_space<vmem>>, vector<8x128xf32>
    tpu.vector_store %arg10[%c0_378, %c1920_379], %446 {strides = array<i32>} : memref<8x2432xf32, #tpu.memory_space<vmem>>, vector<8x128xf32>,
    %c0_380 = arith.constant 0 : index
    %c2048_381 = arith.constant 2048 : index
    %448 = vector.load %arg9[%c0_380, %c2048_381] : memref<4x4096xf32, #tpu.memory_space<vmem>>, vector<4x128xf32>
    %c0_382 = arith.constant 0 : index
    %c2049_383 = arith.constant 2049 : index
    %449 = vector.load %arg9[%c0_382, %c2049_383] : memref<4x4096xf32, #tpu.memory_space<vmem>>, vector<4x128xf32>
    %c0_384 = arith.constant 0 : index
    %c2050_385 = arith.constant 2050 : index
    %450 = vector.load %arg9[%c0_384, %c2050_385] : memref<4x4096xf32, #tpu.memory_space<vmem>>, vector<4x128xf32>
    %c0_386 = arith.constant 0 : index
    %c2176_387 = arith.constant 2176 : index
    %451 = vector.load %arg9[%c0_386, %c2176_387] : memref<4x4096xf32, #tpu.memory_space<vmem>>, vector<4x128xf32>
    %c0_388 = arith.constant 0 : index
    %c2177_389 = arith.constant 2177 : index
    %452 = vector.load %arg9[%c0_388, %c2177_389] : memref<4x4096xf32, #tpu.memory_space<vmem>>, vector<4x128xf32>
    %c0_390 = arith.constant 0 : index
    %c2178_391 = arith.constant 2178 : index
    %453 = vector.load %arg9[%c0_390, %c2178_391] : memref<4x4096xf32, #tpu.memory_space<vmem>>, vector<4x128xf32>
    %c0_392 = arith.constant 0 : index
    %c2304 = arith.constant 2304 : index
    %454 = vector.load %arg9[%c0_392, %c2304] : memref<4x4096xf32, #tpu.memory_space<vmem>>, vector<4x128xf32>
    %c0_393 = arith.constant 0 : index
    %c2305 = arith.constant 2305 : index
    %455 = vector.load %arg9[%c0_393, %c2305] : memref<4x4096xf32, #tpu.memory_space<vmem>>, vector<4x128xf32>
    %c0_394 = arith.constant 0 : index
    %c2306 = arith.constant 2306 : index
    %456 = vector.load %arg9[%c0_394, %c2306] : memref<4x4096xf32, #tpu.memory_space<vmem>>, vector<4x128xf32>
    %457 = tpu.concatenate %448, %449, %450, %451, %452, %453, %454, %455, %456 in 0 : vector<4x128xf32>, vector<4x128xf32>, vector<4x128xf32>, vector<4x128xf32>, vector<4x128xf32>, vector<4x128xf32>, vector<4x128xf32>, vector<4x128xf32>, vector<4x128xf32> -> vector<36x128xf32>
    %cst_395 = arith.constant dense<0.000000e+00> : vector<8x128xf32>
    %458 = tpu.matmul %6, %457, %cst_395 {dimension_numbers = #tpu.dot_dimension_numbers<[1], [0], [0], [1], [0, 0, 1, 1], [], []>} : vector<8x36xf32>, vector<36x128xf32>, vector<8x128xf32> -> vector<8x128xf32>
    %459 = vector.broadcast %8 : vector<8x1xf32> to vector<8x128xf32>
    %460 = arith.addf %458, %459 : vector<8x128xf32>
    %cst_396 = arith.constant 0.000000e+00 : f32
    %461 = vector.broadcast %cst_396 : f32 to vector<8x128xf32>
    %462 = arith.maximumf %460, %461 : vector<8x128xf32>
    %c16_i32_397 = arith.constant 16 : i32
    %463 = arith.muli %arg1, %c16_i32_397 : i32
    %c15_i32 = arith.constant 15 : i32
    %464 = arith.addi %463, %c15_i32 : i32
    %c0_i32_398 = arith.constant 0 : i32
    %465 = arith.cmpi sge, %464, %c0_i32_398 : i32
    %c16_i32_399 = arith.constant 16 : i32
    %466 = arith.cmpi slt, %464, %c16_i32_399 : i32
    %467 = arith.andi %465, %466 : i1
    %468 = vector.broadcast %467 : i1 to vector<1x128xi1>
    %469 = arith.andi %15, %468 : vector<1x128xi1>
    %cst_400 = arith.constant 0.000000e+00 : f32
    %470 = vector.shape_cast %469 : vector<1x128xi1> to vector<1x128xi1>
    %471 = vector.broadcast %470 : vector<1x128xi1> to vector<8x128xi1>
    %472 = vector.broadcast %cst_400 : f32 to vector<8x128xf32>
    %473 = arith.select %471, %462, %472 : vector<8x128xi1>, vector<8x128xf32>
    %c0_401 = arith.constant 0 : index
    %c2048_402 = arith.constant 2048 : index
    %474 = vector.load %arg10[%c0_401, %c2048_402] : memref<8x2432xf32, #tpu.memory_space<vmem>>, vector<8x128xf32>
    tpu.vector_store %arg10[%c0_401, %c2048_402], %473 {strides = array<i32>} : memref<8x2432xf32, #tpu.memory_space<vmem>>, vector<8x128xf32>,
    %c0_403 = arith.constant 0 : index
    %c2176_404 = arith.constant 2176 : index
    %475 = vector.load %arg9[%c0_403, %c2176_404] : memref<4x4096xf32, #tpu.memory_space<vmem>>, vector<4x128xf32>
    %c0_405 = arith.constant 0 : index
    %c2177_406 = arith.constant 2177 : index
    %476 = vector.load %arg9[%c0_405, %c2177_406] : memref<4x4096xf32, #tpu.memory_space<vmem>>, vector<4x128xf32>
    %c0_407 = arith.constant 0 : index
    %c2178_408 = arith.constant 2178 : index
    %477 = vector.load %arg9[%c0_407, %c2178_408] : memref<4x4096xf32, #tpu.memory_space<vmem>>, vector<4x128xf32>
    %c0_409 = arith.constant 0 : index
    %c2304_410 = arith.constant 2304 : index
    %478 = vector.load %arg9[%c0_409, %c2304_410] : memref<4x4096xf32, #tpu.memory_space<vmem>>, vector<4x128xf32>
    %c0_411 = arith.constant 0 : index
    %c2305_412 = arith.constant 2305 : index
    %479 = vector.load %arg9[%c0_411, %c2305_412] : memref<4x4096xf32, #tpu.memory_space<vmem>>, vector<4x128xf32>
    %c0_413 = arith.constant 0 : index
    %c2306_414 = arith.constant 2306 : index
    %480 = vector.load %arg9[%c0_413, %c2306_414] : memref<4x4096xf32, #tpu.memory_space<vmem>>, vector<4x128xf32>
    %c0_415 = arith.constant 0 : index
    %c2432 = arith.constant 2432 : index
    %481 = vector.load %arg9[%c0_415, %c2432] : memref<4x4096xf32, #tpu.memory_space<vmem>>, vector<4x128xf32>
    %c0_416 = arith.constant 0 : index
    %c2433 = arith.constant 2433 : index
    %482 = vector.load %arg9[%c0_416, %c2433] : memref<4x4096xf32, #tpu.memory_space<vmem>>, vector<4x128xf32>
    %c0_417 = arith.constant 0 : index
    %c2434 = arith.constant 2434 : index
    %483 = vector.load %arg9[%c0_417, %c2434] : memref<4x4096xf32, #tpu.memory_space<vmem>>, vector<4x128xf32>
    %484 = tpu.concatenate %475, %476, %477, %478, %479, %480, %481, %482, %483 in 0 : vector<4x128xf32>, vector<4x128xf32>, vector<4x128xf32>, vector<4x128xf32>, vector<4x128xf32>, vector<4x128xf32>, vector<4x128xf32>, vector<4x128xf32>, vector<4x128xf32> -> vector<36x128xf32>
    %cst_418 = arith.constant dense<0.000000e+00> : vector<8x128xf32>
    %485 = tpu.matmul %6, %484, %cst_418 {dimension_numbers = #tpu.dot_dimension_numbers<[1], [0], [0], [1], [0, 0, 1, 1], [], []>} : vector<8x36xf32>, vector<36x128xf32>, vector<8x128xf32> -> vector<8x128xf32>
    %486 = vector.broadcast %8 : vector<8x1xf32> to vector<8x128xf32>
    %487 = arith.addf %485, %486 : vector<8x128xf32>
    %cst_419 = arith.constant 0.000000e+00 : f32
    %488 = vector.broadcast %cst_419 : f32 to vector<8x128xf32>
    %489 = arith.maximumf %487, %488 : vector<8x128xf32>
    %c16_i32_420 = arith.constant 16 : i32
    %490 = arith.muli %arg1, %c16_i32_420 : i32
    %c16_i32_421 = arith.constant 16 : i32
    %491 = arith.addi %490, %c16_i32_421 : i32
    %c0_i32_422 = arith.constant 0 : i32
    %492 = arith.cmpi sge, %491, %c0_i32_422 : i32
    %c16_i32_423 = arith.constant 16 : i32
    %493 = arith.cmpi slt, %491, %c16_i32_423 : i32
    %494 = arith.andi %492, %493 : i1
    %495 = vector.broadcast %494 : i1 to vector<1x128xi1>
    %496 = arith.andi %15, %495 : vector<1x128xi1>
    %cst_424 = arith.constant 0.000000e+00 : f32
    %497 = vector.shape_cast %496 : vector<1x128xi1> to vector<1x128xi1>
    %498 = vector.broadcast %497 : vector<1x128xi1> to vector<8x128xi1>
    %499 = vector.broadcast %cst_424 : f32 to vector<8x128xf32>
    %500 = arith.select %498, %489, %499 : vector<8x128xi1>, vector<8x128xf32>
    %c0_425 = arith.constant 0 : index
    %c2176_426 = arith.constant 2176 : index
    %501 = vector.load %arg10[%c0_425, %c2176_426] : memref<8x2432xf32, #tpu.memory_space<vmem>>, vector<8x128xf32>
    tpu.vector_store %arg10[%c0_425, %c2176_426], %500 {strides = array<i32>} : memref<8x2432xf32, #tpu.memory_space<vmem>>, vector<8x128xf32>,
    %c0_427 = arith.constant 0 : index
    %c2304_428 = arith.constant 2304 : index
    %502 = vector.load %arg9[%c0_427, %c2304_428] : memref<4x4096xf32, #tpu.memory_space<vmem>>, vector<4x128xf32>
    %c0_429 = arith.constant 0 : index
    %c2305_430 = arith.constant 2305 : index
    %503 = vector.load %arg9[%c0_429, %c2305_430] : memref<4x4096xf32, #tpu.memory_space<vmem>>, vector<4x128xf32>
    %c0_431 = arith.constant 0 : index
    %c2306_432 = arith.constant 2306 : index
    %504 = vector.load %arg9[%c0_431, %c2306_432] : memref<4x4096xf32, #tpu.memory_space<vmem>>, vector<4x128xf32>
    %c0_433 = arith.constant 0 : index
    %c2432_434 = arith.constant 2432 : index
    %505 = vector.load %arg9[%c0_433, %c2432_434] : memref<4x4096xf32, #tpu.memory_space<vmem>>, vector<4x128xf32>
    %c0_435 = arith.constant 0 : index
    %c2433_436 = arith.constant 2433 : index
    %506 = vector.load %arg9[%c0_435, %c2433_436] : memref<4x4096xf32, #tpu.memory_space<vmem>>, vector<4x128xf32>
    %c0_437 = arith.constant 0 : index
    %c2434_438 = arith.constant 2434 : index
    %507 = vector.load %arg9[%c0_437, %c2434_438] : memref<4x4096xf32, #tpu.memory_space<vmem>>, vector<4x128xf32>
    %c0_439 = arith.constant 0 : index
    %c2560 = arith.constant 2560 : index
    %508 = vector.load %arg9[%c0_439, %c2560] : memref<4x4096xf32, #tpu.memory_space<vmem>>, vector<4x128xf32>
    %c0_440 = arith.constant 0 : index
    %c2561 = arith.constant 2561 : index
    %509 = vector.load %arg9[%c0_440, %c2561] : memref<4x4096xf32, #tpu.memory_space<vmem>>, vector<4x128xf32>
    %c0_441 = arith.constant 0 : index
    %c2562 = arith.constant 2562 : index
    %510 = vector.load %arg9[%c0_441, %c2562] : memref<4x4096xf32, #tpu.memory_space<vmem>>, vector<4x128xf32>
    %511 = tpu.concatenate %502, %503, %504, %505, %506, %507, %508, %509, %510 in 0 : vector<4x128xf32>, vector<4x128xf32>, vector<4x128xf32>, vector<4x128xf32>, vector<4x128xf32>, vector<4x128xf32>, vector<4x128xf32>, vector<4x128xf32>, vector<4x128xf32> -> vector<36x128xf32>
    %cst_442 = arith.constant dense<0.000000e+00> : vector<8x128xf32>
    %512 = tpu.matmul %6, %511, %cst_442 {dimension_numbers = #tpu.dot_dimension_numbers<[1], [0], [0], [1], [0, 0, 1, 1], [], []>} : vector<8x36xf32>, vector<36x128xf32>, vector<8x128xf32> -> vector<8x128xf32>
    %513 = vector.broadcast %8 : vector<8x1xf32> to vector<8x128xf32>
    %514 = arith.addf %512, %513 : vector<8x128xf32>
    %cst_443 = arith.constant 0.000000e+00 : f32
    %515 = vector.broadcast %cst_443 : f32 to vector<8x128xf32>
    %516 = arith.maximumf %514, %515 : vector<8x128xf32>
    %c16_i32_444 = arith.constant 16 : i32
    %517 = arith.muli %arg1, %c16_i32_444 : i32
    %c17_i32 = arith.constant 17 : i32
    %518 = arith.addi %517, %c17_i32 : i32
    %c0_i32_445 = arith.constant 0 : i32
    %519 = arith.cmpi sge, %518, %c0_i32_445 : i32
    %c16_i32_446 = arith.constant 16 : i32
    %520 = arith.cmpi slt, %518, %c16_i32_446 : i32
    %521 = arith.andi %519, %520 : i1
    %522 = vector.broadcast %521 : i1 to vector<1x128xi1>
    %523 = arith.andi %15, %522 : vector<1x128xi1>
    %cst_447 = arith.constant 0.000000e+00 : f32
    %524 = vector.shape_cast %523 : vector<1x128xi1> to vector<1x128xi1>
    %525 = vector.broadcast %524 : vector<1x128xi1> to vector<8x128xi1>
    %526 = vector.broadcast %cst_447 : f32 to vector<8x128xf32>
    %527 = arith.select %525, %516, %526 : vector<8x128xi1>, vector<8x128xf32>
    %c0_448 = arith.constant 0 : index
    %c2304_449 = arith.constant 2304 : index
    %528 = vector.load %arg10[%c0_448, %c2304_449] : memref<8x2432xf32, #tpu.memory_space<vmem>>, vector<8x128xf32>
    tpu.vector_store %arg10[%c0_448, %c2304_449], %527 {strides = array<i32>} : memref<8x2432xf32, #tpu.memory_space<vmem>>, vector<8x128xf32>,
    %c0_450 = arith.constant 0 : index
    %c0_451 = arith.constant 0 : index
    %529 = vector.load %arg10[%c0_450, %c0_451] : memref<8x2432xf32, #tpu.memory_space<vmem>>, vector<8x128xf32>
    %c0_452 = arith.constant 0 : index
    %c1_453 = arith.constant 1 : index
    %530 = vector.load %arg10[%c0_452, %c1_453] : memref<8x2432xf32, #tpu.memory_space<vmem>>, vector<8x128xf32>
    %c0_454 = arith.constant 0 : index
    %c2_455 = arith.constant 2 : index
    %531 = vector.load %arg10[%c0_454, %c2_455] : memref<8x2432xf32, #tpu.memory_space<vmem>>, vector<8x128xf32>
    %c0_456 = arith.constant 0 : index
    %c128_457 = arith.constant 128 : index
    %532 = vector.load %arg10[%c0_456, %c128_457] : memref<8x2432xf32, #tpu.memory_space<vmem>>, vector<8x128xf32>
    %c0_458 = arith.constant 0 : index
    %c129_459 = arith.constant 129 : index
    %533 = vector.load %arg10[%c0_458, %c129_459] : memref<8x2432xf32, #tpu.memory_space<vmem>>, vector<8x128xf32>
    %c0_460 = arith.constant 0 : index
    %c130_461 = arith.constant 130 : index
    %534 = vector.load %arg10[%c0_460, %c130_461] : memref<8x2432xf32, #tpu.memory_space<vmem>>, vector<8x128xf32>
    %c0_462 = arith.constant 0 : index
    %c256_463 = arith.constant 256 : index
    %535 = vector.load %arg10[%c0_462, %c256_463] : memref<8x2432xf32, #tpu.memory_space<vmem>>, vector<8x128xf32>
    %c0_464 = arith.constant 0 : index
    %c257_465 = arith.constant 257 : index
    %536 = vector.load %arg10[%c0_464, %c257_465] : memref<8x2432xf32, #tpu.memory_space<vmem>>, vector<8x128xf32>
    %c0_466 = arith.constant 0 : index
    %c258_467 = arith.constant 258 : index
    %537 = vector.load %arg10[%c0_466, %c258_467] : memref<8x2432xf32, #tpu.memory_space<vmem>>, vector<8x128xf32>
    %538 = tpu.concatenate %529, %530, %531, %532, %533, %534, %535, %536, %537 in 0 : vector<8x128xf32>, vector<8x128xf32>, vector<8x128xf32>, vector<8x128xf32>, vector<8x128xf32>, vector<8x128xf32>, vector<8x128xf32>, vector<8x128xf32>, vector<8x128xf32> -> vector<72x128xf32>
    %cst_468 = arith.constant dense<0.000000e+00> : vector<8x128xf32>
    %539 = tpu.matmul %7, %538, %cst_468 {dimension_numbers = #tpu.dot_dimension_numbers<[1], [0], [0], [1], [0, 0, 1, 1], [], []>} : vector<8x72xf32>, vector<72x128xf32>, vector<8x128xf32> -> vector<8x128xf32>
    %540 = vector.broadcast %9 : vector<8x1xf32> to vector<8x128xf32>
    %541 = arith.addf %539, %540 : vector<8x128xf32>
    %cst_469 = arith.constant 0.000000e+00 : f32
    %542 = vector.broadcast %cst_469 : f32 to vector<8x128xf32>
    %543 = arith.maximumf %541, %542 : vector<8x128xf32>
    %c0_470 = arith.constant 0 : index
    %c0_471 = arith.constant 0 : index
    %c0_472 = arith.constant 0 : index
    %544 = vector.load %arg8[%c0_470, %c0_471, %c0_472] : memref<1x8x2048xf32, #tpu.memory_space<vmem>>, vector<1x8x128xf32>
    %545 = vector.shape_cast %544 : vector<1x8x128xf32> to vector<8x128xf32>
    %546 = vector.shape_cast %543 : vector<8x128xf32> to vector<1x8x128xf32>
    tpu.vector_store %arg8[%c0_470, %c0_471, %c0_472], %546 {strides = array<i32>} : memref<1x8x2048xf32, #tpu.memory_space<vmem>>, vector<1x8x128xf32>,
    %c0_473 = arith.constant 0 : index
    %c128_474 = arith.constant 128 : index
    %547 = vector.load %arg10[%c0_473, %c128_474] : memref<8x2432xf32, #tpu.memory_space<vmem>>, vector<8x128xf32>
    %c0_475 = arith.constant 0 : index
    %c129_476 = arith.constant 129 : index
    %548 = vector.load %arg10[%c0_475, %c129_476] : memref<8x2432xf32, #tpu.memory_space<vmem>>, vector<8x128xf32>
    %c0_477 = arith.constant 0 : index
    %c130_478 = arith.constant 130 : index
    %549 = vector.load %arg10[%c0_477, %c130_478] : memref<8x2432xf32, #tpu.memory_space<vmem>>, vector<8x128xf32>
    %c0_479 = arith.constant 0 : index
    %c256_480 = arith.constant 256 : index
    %550 = vector.load %arg10[%c0_479, %c256_480] : memref<8x2432xf32, #tpu.memory_space<vmem>>, vector<8x128xf32>
    %c0_481 = arith.constant 0 : index
    %c257_482 = arith.constant 257 : index
    %551 = vector.load %arg10[%c0_481, %c257_482] : memref<8x2432xf32, #tpu.memory_space<vmem>>, vector<8x128xf32>
    %c0_483 = arith.constant 0 : index
    %c258_484 = arith.constant 258 : index
    %552 = vector.load %arg10[%c0_483, %c258_484] : memref<8x2432xf32, #tpu.memory_space<vmem>>, vector<8x128xf32>
    %c0_485 = arith.constant 0 : index
    %c384_486 = arith.constant 384 : index
    %553 = vector.load %arg10[%c0_485, %c384_486] : memref<8x2432xf32, #tpu.memory_space<vmem>>, vector<8x128xf32>
    %c0_487 = arith.constant 0 : index
    %c385_488 = arith.constant 385 : index
    %554 = vector.load %arg10[%c0_487, %c385_488] : memref<8x2432xf32, #tpu.memory_space<vmem>>, vector<8x128xf32>
    %c0_489 = arith.constant 0 : index
    %c386_490 = arith.constant 386 : index
    %555 = vector.load %arg10[%c0_489, %c386_490] : memref<8x2432xf32, #tpu.memory_space<vmem>>, vector<8x128xf32>
    %556 = tpu.concatenate %547, %548, %549, %550, %551, %552, %553, %554, %555 in 0 : vector<8x128xf32>, vector<8x128xf32>, vector<8x128xf32>, vector<8x128xf32>, vector<8x128xf32>, vector<8x128xf32>, vector<8x128xf32>, vector<8x128xf32>, vector<8x128xf32> -> vector<72x128xf32>
    %cst_491 = arith.constant dense<0.000000e+00> : vector<8x128xf32>
    %557 = tpu.matmul %7, %556, %cst_491 {dimension_numbers = #tpu.dot_dimension_numbers<[1], [0], [0], [1], [0, 0, 1, 1], [], []>} : vector<8x72xf32>, vector<72x128xf32>, vector<8x128xf32> -> vector<8x128xf32>
    %558 = vector.broadcast %9 : vector<8x1xf32> to vector<8x128xf32>
    %559 = arith.addf %557, %558 : vector<8x128xf32>
    %cst_492 = arith.constant 0.000000e+00 : f32
    %560 = vector.broadcast %cst_492 : f32 to vector<8x128xf32>
    %561 = arith.maximumf %559, %560 : vector<8x128xf32>
    %c0_493 = arith.constant 0 : index
    %c0_494 = arith.constant 0 : index
    %c128_495 = arith.constant 128 : index
    %562 = vector.load %arg8[%c0_493, %c0_494, %c128_495] : memref<1x8x2048xf32, #tpu.memory_space<vmem>>, vector<1x8x128xf32>
    %563 = vector.shape_cast %562 : vector<1x8x128xf32> to vector<8x128xf32>
    %564 = vector.shape_cast %561 : vector<8x128xf32> to vector<1x8x128xf32>
    tpu.vector_store %arg8[%c0_493, %c0_494, %c128_495], %564 {strides = array<i32>} : memref<1x8x2048xf32, #tpu.memory_space<vmem>>, vector<1x8x128xf32>,
    %c0_496 = arith.constant 0 : index
    %c256_497 = arith.constant 256 : index
    %565 = vector.load %arg10[%c0_496, %c256_497] : memref<8x2432xf32, #tpu.memory_space<vmem>>, vector<8x128xf32>
    %c0_498 = arith.constant 0 : index
    %c257_499 = arith.constant 257 : index
    %566 = vector.load %arg10[%c0_498, %c257_499] : memref<8x2432xf32, #tpu.memory_space<vmem>>, vector<8x128xf32>
    %c0_500 = arith.constant 0 : index
    %c258_501 = arith.constant 258 : index
    %567 = vector.load %arg10[%c0_500, %c258_501] : memref<8x2432xf32, #tpu.memory_space<vmem>>, vector<8x128xf32>
    %c0_502 = arith.constant 0 : index
    %c384_503 = arith.constant 384 : index
    %568 = vector.load %arg10[%c0_502, %c384_503] : memref<8x2432xf32, #tpu.memory_space<vmem>>, vector<8x128xf32>
    %c0_504 = arith.constant 0 : index
    %c385_505 = arith.constant 385 : index
    %569 = vector.load %arg10[%c0_504, %c385_505] : memref<8x2432xf32, #tpu.memory_space<vmem>>, vector<8x128xf32>
    %c0_506 = arith.constant 0 : index
    %c386_507 = arith.constant 386 : index
    %570 = vector.load %arg10[%c0_506, %c386_507] : memref<8x2432xf32, #tpu.memory_space<vmem>>, vector<8x128xf32>
    %c0_508 = arith.constant 0 : index
    %c512_509 = arith.constant 512 : index
    %571 = vector.load %arg10[%c0_508, %c512_509] : memref<8x2432xf32, #tpu.memory_space<vmem>>, vector<8x128xf32>
    %c0_510 = arith.constant 0 : index
    %c513_511 = arith.constant 513 : index
    %572 = vector.load %arg10[%c0_510, %c513_511] : memref<8x2432xf32, #tpu.memory_space<vmem>>, vector<8x128xf32>
    %c0_512 = arith.constant 0 : index
    %c514_513 = arith.constant 514 : index
    %573 = vector.load %arg10[%c0_512, %c514_513] : memref<8x2432xf32, #tpu.memory_space<vmem>>, vector<8x128xf32>
    %574 = tpu.concatenate %565, %566, %567, %568, %569, %570, %571, %572, %573 in 0 : vector<8x128xf32>, vector<8x128xf32>, vector<8x128xf32>, vector<8x128xf32>, vector<8x128xf32>, vector<8x128xf32>, vector<8x128xf32>, vector<8x128xf32>, vector<8x128xf32> -> vector<72x128xf32>
    %cst_514 = arith.constant dense<0.000000e+00> : vector<8x128xf32>
    %575 = tpu.matmul %7, %574, %cst_514 {dimension_numbers = #tpu.dot_dimension_numbers<[1], [0], [0], [1], [0, 0, 1, 1], [], []>} : vector<8x72xf32>, vector<72x128xf32>, vector<8x128xf32> -> vector<8x128xf32>
    %576 = vector.broadcast %9 : vector<8x1xf32> to vector<8x128xf32>
    %577 = arith.addf %575, %576 : vector<8x128xf32>
    %cst_515 = arith.constant 0.000000e+00 : f32
    %578 = vector.broadcast %cst_515 : f32 to vector<8x128xf32>
    %579 = arith.maximumf %577, %578 : vector<8x128xf32>
    %c0_516 = arith.constant 0 : index
    %c0_517 = arith.constant 0 : index
    %c256_518 = arith.constant 256 : index
    %580 = vector.load %arg8[%c0_516, %c0_517, %c256_518] : memref<1x8x2048xf32, #tpu.memory_space<vmem>>, vector<1x8x128xf32>
    %581 = vector.shape_cast %580 : vector<1x8x128xf32> to vector<8x128xf32>
    %582 = vector.shape_cast %579 : vector<8x128xf32> to vector<1x8x128xf32>
    tpu.vector_store %arg8[%c0_516, %c0_517, %c256_518], %582 {strides = array<i32>} : memref<1x8x2048xf32, #tpu.memory_space<vmem>>, vector<1x8x128xf32>,
    %c0_519 = arith.constant 0 : index
    %c384_520 = arith.constant 384 : index
    %583 = vector.load %arg10[%c0_519, %c384_520] : memref<8x2432xf32, #tpu.memory_space<vmem>>, vector<8x128xf32>
    %c0_521 = arith.constant 0 : index
    %c385_522 = arith.constant 385 : index
    %584 = vector.load %arg10[%c0_521, %c385_522] : memref<8x2432xf32, #tpu.memory_space<vmem>>, vector<8x128xf32>
    %c0_523 = arith.constant 0 : index
    %c386_524 = arith.constant 386 : index
    %585 = vector.load %arg10[%c0_523, %c386_524] : memref<8x2432xf32, #tpu.memory_space<vmem>>, vector<8x128xf32>
    %c0_525 = arith.constant 0 : index
    %c512_526 = arith.constant 512 : index
    %586 = vector.load %arg10[%c0_525, %c512_526] : memref<8x2432xf32, #tpu.memory_space<vmem>>, vector<8x128xf32>
    %c0_527 = arith.constant 0 : index
    %c513_528 = arith.constant 513 : index
    %587 = vector.load %arg10[%c0_527, %c513_528] : memref<8x2432xf32, #tpu.memory_space<vmem>>, vector<8x128xf32>
    %c0_529 = arith.constant 0 : index
    %c514_530 = arith.constant 514 : index
    %588 = vector.load %arg10[%c0_529, %c514_530] : memref<8x2432xf32, #tpu.memory_space<vmem>>, vector<8x128xf32>
    %c0_531 = arith.constant 0 : index
    %c640_532 = arith.constant 640 : index
    %589 = vector.load %arg10[%c0_531, %c640_532] : memref<8x2432xf32, #tpu.memory_space<vmem>>, vector<8x128xf32>
    %c0_533 = arith.constant 0 : index
    %c641_534 = arith.constant 641 : index
    %590 = vector.load %arg10[%c0_533, %c641_534] : memref<8x2432xf32, #tpu.memory_space<vmem>>, vector<8x128xf32>
    %c0_535 = arith.constant 0 : index
    %c642_536 = arith.constant 642 : index
    %591 = vector.load %arg10[%c0_535, %c642_536] : memref<8x2432xf32, #tpu.memory_space<vmem>>, vector<8x128xf32>
    %592 = tpu.concatenate %583, %584, %585, %586, %587, %588, %589, %590, %591 in 0 : vector<8x128xf32>, vector<8x128xf32>, vector<8x128xf32>, vector<8x128xf32>, vector<8x128xf32>, vector<8x128xf32>, vector<8x128xf32>, vector<8x128xf32>, vector<8x128xf32> -> vector<72x128xf32>
    %cst_537 = arith.constant dense<0.000000e+00> : vector<8x128xf32>
    %593 = tpu.matmul %7, %592, %cst_537 {dimension_numbers = #tpu.dot_dimension_numbers<[1], [0], [0], [1], [0, 0, 1, 1], [], []>} : vector<8x72xf32>, vector<72x128xf32>, vector<8x128xf32> -> vector<8x128xf32>
    %594 = vector.broadcast %9 : vector<8x1xf32> to vector<8x128xf32>
    %595 = arith.addf %593, %594 : vector<8x128xf32>
    %cst_538 = arith.constant 0.000000e+00 : f32
    %596 = vector.broadcast %cst_538 : f32 to vector<8x128xf32>
    %597 = arith.maximumf %595, %596 : vector<8x128xf32>
    %c0_539 = arith.constant 0 : index
    %c0_540 = arith.constant 0 : index
    %c384_541 = arith.constant 384 : index
    %598 = vector.load %arg8[%c0_539, %c0_540, %c384_541] : memref<1x8x2048xf32, #tpu.memory_space<vmem>>, vector<1x8x128xf32>
    %599 = vector.shape_cast %598 : vector<1x8x128xf32> to vector<8x128xf32>
    %600 = vector.shape_cast %597 : vector<8x128xf32> to vector<1x8x128xf32>
    tpu.vector_store %arg8[%c0_539, %c0_540, %c384_541], %600 {strides = array<i32>} : memref<1x8x2048xf32, #tpu.memory_space<vmem>>, vector<1x8x128xf32>,
    %c0_542 = arith.constant 0 : index
    %c512_543 = arith.constant 512 : index
    %601 = vector.load %arg10[%c0_542, %c512_543] : memref<8x2432xf32, #tpu.memory_space<vmem>>, vector<8x128xf32>
    %c0_544 = arith.constant 0 : index
    %c513_545 = arith.constant 513 : index
    %602 = vector.load %arg10[%c0_544, %c513_545] : memref<8x2432xf32, #tpu.memory_space<vmem>>, vector<8x128xf32>
    %c0_546 = arith.constant 0 : index
    %c514_547 = arith.constant 514 : index
    %603 = vector.load %arg10[%c0_546, %c514_547] : memref<8x2432xf32, #tpu.memory_space<vmem>>, vector<8x128xf32>
    %c0_548 = arith.constant 0 : index
    %c640_549 = arith.constant 640 : index
    %604 = vector.load %arg10[%c0_548, %c640_549] : memref<8x2432xf32, #tpu.memory_space<vmem>>, vector<8x128xf32>
    %c0_550 = arith.constant 0 : index
    %c641_551 = arith.constant 641 : index
    %605 = vector.load %arg10[%c0_550, %c641_551] : memref<8x2432xf32, #tpu.memory_space<vmem>>, vector<8x128xf32>
    %c0_552 = arith.constant 0 : index
    %c642_553 = arith.constant 642 : index
    %606 = vector.load %arg10[%c0_552, %c642_553] : memref<8x2432xf32, #tpu.memory_space<vmem>>, vector<8x128xf32>
    %c0_554 = arith.constant 0 : index
    %c768_555 = arith.constant 768 : index
    %607 = vector.load %arg10[%c0_554, %c768_555] : memref<8x2432xf32, #tpu.memory_space<vmem>>, vector<8x128xf32>
    %c0_556 = arith.constant 0 : index
    %c769_557 = arith.constant 769 : index
    %608 = vector.load %arg10[%c0_556, %c769_557] : memref<8x2432xf32, #tpu.memory_space<vmem>>, vector<8x128xf32>
    %c0_558 = arith.constant 0 : index
    %c770_559 = arith.constant 770 : index
    %609 = vector.load %arg10[%c0_558, %c770_559] : memref<8x2432xf32, #tpu.memory_space<vmem>>, vector<8x128xf32>
    %610 = tpu.concatenate %601, %602, %603, %604, %605, %606, %607, %608, %609 in 0 : vector<8x128xf32>, vector<8x128xf32>, vector<8x128xf32>, vector<8x128xf32>, vector<8x128xf32>, vector<8x128xf32>, vector<8x128xf32>, vector<8x128xf32>, vector<8x128xf32> -> vector<72x128xf32>
    %cst_560 = arith.constant dense<0.000000e+00> : vector<8x128xf32>
    %611 = tpu.matmul %7, %610, %cst_560 {dimension_numbers = #tpu.dot_dimension_numbers<[1], [0], [0], [1], [0, 0, 1, 1], [], []>} : vector<8x72xf32>, vector<72x128xf32>, vector<8x128xf32> -> vector<8x128xf32>
    %612 = vector.broadcast %9 : vector<8x1xf32> to vector<8x128xf32>
    %613 = arith.addf %611, %612 : vector<8x128xf32>
    %cst_561 = arith.constant 0.000000e+00 : f32
    %614 = vector.broadcast %cst_561 : f32 to vector<8x128xf32>
    %615 = arith.maximumf %613, %614 : vector<8x128xf32>
    %c0_562 = arith.constant 0 : index
    %c0_563 = arith.constant 0 : index
    %c512_564 = arith.constant 512 : index
    %616 = vector.load %arg8[%c0_562, %c0_563, %c512_564] : memref<1x8x2048xf32, #tpu.memory_space<vmem>>, vector<1x8x128xf32>
    %617 = vector.shape_cast %616 : vector<1x8x128xf32> to vector<8x128xf32>
    %618 = vector.shape_cast %615 : vector<8x128xf32> to vector<1x8x128xf32>
    tpu.vector_store %arg8[%c0_562, %c0_563, %c512_564], %618 {strides = array<i32>} : memref<1x8x2048xf32, #tpu.memory_space<vmem>>, vector<1x8x128xf32>,
    %c0_565 = arith.constant 0 : index
    %c640_566 = arith.constant 640 : index
    %619 = vector.load %arg10[%c0_565, %c640_566] : memref<8x2432xf32, #tpu.memory_space<vmem>>, vector<8x128xf32>
    %c0_567 = arith.constant 0 : index
    %c641_568 = arith.constant 641 : index
    %620 = vector.load %arg10[%c0_567, %c641_568] : memref<8x2432xf32, #tpu.memory_space<vmem>>, vector<8x128xf32>
    %c0_569 = arith.constant 0 : index
    %c642_570 = arith.constant 642 : index
    %621 = vector.load %arg10[%c0_569, %c642_570] : memref<8x2432xf32, #tpu.memory_space<vmem>>, vector<8x128xf32>
    %c0_571 = arith.constant 0 : index
    %c768_572 = arith.constant 768 : index
    %622 = vector.load %arg10[%c0_571, %c768_572] : memref<8x2432xf32, #tpu.memory_space<vmem>>, vector<8x128xf32>
    %c0_573 = arith.constant 0 : index
    %c769_574 = arith.constant 769 : index
    %623 = vector.load %arg10[%c0_573, %c769_574] : memref<8x2432xf32, #tpu.memory_space<vmem>>, vector<8x128xf32>
    %c0_575 = arith.constant 0 : index
    %c770_576 = arith.constant 770 : index
    %624 = vector.load %arg10[%c0_575, %c770_576] : memref<8x2432xf32, #tpu.memory_space<vmem>>, vector<8x128xf32>
    %c0_577 = arith.constant 0 : index
    %c896_578 = arith.constant 896 : index
    %625 = vector.load %arg10[%c0_577, %c896_578] : memref<8x2432xf32, #tpu.memory_space<vmem>>, vector<8x128xf32>
    %c0_579 = arith.constant 0 : index
    %c897_580 = arith.constant 897 : index
    %626 = vector.load %arg10[%c0_579, %c897_580] : memref<8x2432xf32, #tpu.memory_space<vmem>>, vector<8x128xf32>
    %c0_581 = arith.constant 0 : index
    %c898_582 = arith.constant 898 : index
    %627 = vector.load %arg10[%c0_581, %c898_582] : memref<8x2432xf32, #tpu.memory_space<vmem>>, vector<8x128xf32>
    %628 = tpu.concatenate %619, %620, %621, %622, %623, %624, %625, %626, %627 in 0 : vector<8x128xf32>, vector<8x128xf32>, vector<8x128xf32>, vector<8x128xf32>, vector<8x128xf32>, vector<8x128xf32>, vector<8x128xf32>, vector<8x128xf32>, vector<8x128xf32> -> vector<72x128xf32>
    %cst_583 = arith.constant dense<0.000000e+00> : vector<8x128xf32>
    %629 = tpu.matmul %7, %628, %cst_583 {dimension_numbers = #tpu.dot_dimension_numbers<[1], [0], [0], [1], [0, 0, 1, 1], [], []>} : vector<8x72xf32>, vector<72x128xf32>, vector<8x128xf32> -> vector<8x128xf32>
    %630 = vector.broadcast %9 : vector<8x1xf32> to vector<8x128xf32>
    %631 = arith.addf %629, %630 : vector<8x128xf32>
    %cst_584 = arith.constant 0.000000e+00 : f32
    %632 = vector.broadcast %cst_584 : f32 to vector<8x128xf32>
    %633 = arith.maximumf %631, %632 : vector<8x128xf32>
    %c0_585 = arith.constant 0 : index
    %c0_586 = arith.constant 0 : index
    %c640_587 = arith.constant 640 : index
    %634 = vector.load %arg8[%c0_585, %c0_586, %c640_587] : memref<1x8x2048xf32, #tpu.memory_space<vmem>>, vector<1x8x128xf32>
    %635 = vector.shape_cast %634 : vector<1x8x128xf32> to vector<8x128xf32>
    %636 = vector.shape_cast %633 : vector<8x128xf32> to vector<1x8x128xf32>
    tpu.vector_store %arg8[%c0_585, %c0_586, %c640_587], %636 {strides = array<i32>} : memref<1x8x2048xf32, #tpu.memory_space<vmem>>, vector<1x8x128xf32>,
    %c0_588 = arith.constant 0 : index
    %c768_589 = arith.constant 768 : index
    %637 = vector.load %arg10[%c0_588, %c768_589] : memref<8x2432xf32, #tpu.memory_space<vmem>>, vector<8x128xf32>
    %c0_590 = arith.constant 0 : index
    %c769_591 = arith.constant 769 : index
    %638 = vector.load %arg10[%c0_590, %c769_591] : memref<8x2432xf32, #tpu.memory_space<vmem>>, vector<8x128xf32>
    %c0_592 = arith.constant 0 : index
    %c770_593 = arith.constant 770 : index
    %639 = vector.load %arg10[%c0_592, %c770_593] : memref<8x2432xf32, #tpu.memory_space<vmem>>, vector<8x128xf32>
    %c0_594 = arith.constant 0 : index
    %c896_595 = arith.constant 896 : index
    %640 = vector.load %arg10[%c0_594, %c896_595] : memref<8x2432xf32, #tpu.memory_space<vmem>>, vector<8x128xf32>
    %c0_596 = arith.constant 0 : index
    %c897_597 = arith.constant 897 : index
    %641 = vector.load %arg10[%c0_596, %c897_597] : memref<8x2432xf32, #tpu.memory_space<vmem>>, vector<8x128xf32>
    %c0_598 = arith.constant 0 : index
    %c898_599 = arith.constant 898 : index
    %642 = vector.load %arg10[%c0_598, %c898_599] : memref<8x2432xf32, #tpu.memory_space<vmem>>, vector<8x128xf32>
    %c0_600 = arith.constant 0 : index
    %c1024_601 = arith.constant 1024 : index
    %643 = vector.load %arg10[%c0_600, %c1024_601] : memref<8x2432xf32, #tpu.memory_space<vmem>>, vector<8x128xf32>
    %c0_602 = arith.constant 0 : index
    %c1025_603 = arith.constant 1025 : index
    %644 = vector.load %arg10[%c0_602, %c1025_603] : memref<8x2432xf32, #tpu.memory_space<vmem>>, vector<8x128xf32>
    %c0_604 = arith.constant 0 : index
    %c1026_605 = arith.constant 1026 : index
    %645 = vector.load %arg10[%c0_604, %c1026_605] : memref<8x2432xf32, #tpu.memory_space<vmem>>, vector<8x128xf32>
    %646 = tpu.concatenate %637, %638, %639, %640, %641, %642, %643, %644, %645 in 0 : vector<8x128xf32>, vector<8x128xf32>, vector<8x128xf32>, vector<8x128xf32>, vector<8x128xf32>, vector<8x128xf32>, vector<8x128xf32>, vector<8x128xf32>, vector<8x128xf32> -> vector<72x128xf32>
    %cst_606 = arith.constant dense<0.000000e+00> : vector<8x128xf32>
    %647 = tpu.matmul %7, %646, %cst_606 {dimension_numbers = #tpu.dot_dimension_numbers<[1], [0], [0], [1], [0, 0, 1, 1], [], []>} : vector<8x72xf32>, vector<72x128xf32>, vector<8x128xf32> -> vector<8x128xf32>
    %648 = vector.broadcast %9 : vector<8x1xf32> to vector<8x128xf32>
    %649 = arith.addf %647, %648 : vector<8x128xf32>
    %cst_607 = arith.constant 0.000000e+00 : f32
    %650 = vector.broadcast %cst_607 : f32 to vector<8x128xf32>
    %651 = arith.maximumf %649, %650 : vector<8x128xf32>
    %c0_608 = arith.constant 0 : index
    %c0_609 = arith.constant 0 : index
    %c768_610 = arith.constant 768 : index
    %652 = vector.load %arg8[%c0_608, %c0_609, %c768_610] : memref<1x8x2048xf32, #tpu.memory_space<vmem>>, vector<1x8x128xf32>
    %653 = vector.shape_cast %652 : vector<1x8x128xf32> to vector<8x128xf32>
    %654 = vector.shape_cast %651 : vector<8x128xf32> to vector<1x8x128xf32>
    tpu.vector_store %arg8[%c0_608, %c0_609, %c768_610], %654 {strides = array<i32>} : memref<1x8x2048xf32, #tpu.memory_space<vmem>>, vector<1x8x128xf32>,
    %c0_611 = arith.constant 0 : index
    %c896_612 = arith.constant 896 : index
    %655 = vector.load %arg10[%c0_611, %c896_612] : memref<8x2432xf32, #tpu.memory_space<vmem>>, vector<8x128xf32>
    %c0_613 = arith.constant 0 : index
    %c897_614 = arith.constant 897 : index
    %656 = vector.load %arg10[%c0_613, %c897_614] : memref<8x2432xf32, #tpu.memory_space<vmem>>, vector<8x128xf32>
    %c0_615 = arith.constant 0 : index
    %c898_616 = arith.constant 898 : index
    %657 = vector.load %arg10[%c0_615, %c898_616] : memref<8x2432xf32, #tpu.memory_space<vmem>>, vector<8x128xf32>
    %c0_617 = arith.constant 0 : index
    %c1024_618 = arith.constant 1024 : index
    %658 = vector.load %arg10[%c0_617, %c1024_618] : memref<8x2432xf32, #tpu.memory_space<vmem>>, vector<8x128xf32>
    %c0_619 = arith.constant 0 : index
    %c1025_620 = arith.constant 1025 : index
    %659 = vector.load %arg10[%c0_619, %c1025_620] : memref<8x2432xf32, #tpu.memory_space<vmem>>, vector<8x128xf32>
    %c0_621 = arith.constant 0 : index
    %c1026_622 = arith.constant 1026 : index
    %660 = vector.load %arg10[%c0_621, %c1026_622] : memref<8x2432xf32, #tpu.memory_space<vmem>>, vector<8x128xf32>
    %c0_623 = arith.constant 0 : index
    %c1152_624 = arith.constant 1152 : index
    %661 = vector.load %arg10[%c0_623, %c1152_624] : memref<8x2432xf32, #tpu.memory_space<vmem>>, vector<8x128xf32>
    %c0_625 = arith.constant 0 : index
    %c1153_626 = arith.constant 1153 : index
    %662 = vector.load %arg10[%c0_625, %c1153_626] : memref<8x2432xf32, #tpu.memory_space<vmem>>, vector<8x128xf32>
    %c0_627 = arith.constant 0 : index
    %c1154_628 = arith.constant 1154 : index
    %663 = vector.load %arg10[%c0_627, %c1154_628] : memref<8x2432xf32, #tpu.memory_space<vmem>>, vector<8x128xf32>
    %664 = tpu.concatenate %655, %656, %657, %658, %659, %660, %661, %662, %663 in 0 : vector<8x128xf32>, vector<8x128xf32>, vector<8x128xf32>, vector<8x128xf32>, vector<8x128xf32>, vector<8x128xf32>, vector<8x128xf32>, vector<8x128xf32>, vector<8x128xf32> -> vector<72x128xf32>
    %cst_629 = arith.constant dense<0.000000e+00> : vector<8x128xf32>
    %665 = tpu.matmul %7, %664, %cst_629 {dimension_numbers = #tpu.dot_dimension_numbers<[1], [0], [0], [1], [0, 0, 1, 1], [], []>} : vector<8x72xf32>, vector<72x128xf32>, vector<8x128xf32> -> vector<8x128xf32>
    %666 = vector.broadcast %9 : vector<8x1xf32> to vector<8x128xf32>
    %667 = arith.addf %665, %666 : vector<8x128xf32>
    %cst_630 = arith.constant 0.000000e+00 : f32
    %668 = vector.broadcast %cst_630 : f32 to vector<8x128xf32>
    %669 = arith.maximumf %667, %668 : vector<8x128xf32>
    %c0_631 = arith.constant 0 : index
    %c0_632 = arith.constant 0 : index
    %c896_633 = arith.constant 896 : index
    %670 = vector.load %arg8[%c0_631, %c0_632, %c896_633] : memref<1x8x2048xf32, #tpu.memory_space<vmem>>, vector<1x8x128xf32>
    %671 = vector.shape_cast %670 : vector<1x8x128xf32> to vector<8x128xf32>
    %672 = vector.shape_cast %669 : vector<8x128xf32> to vector<1x8x128xf32>
    tpu.vector_store %arg8[%c0_631, %c0_632, %c896_633], %672 {strides = array<i32>} : memref<1x8x2048xf32, #tpu.memory_space<vmem>>, vector<1x8x128xf32>,
    %c0_634 = arith.constant 0 : index
    %c1024_635 = arith.constant 1024 : index
    %673 = vector.load %arg10[%c0_634, %c1024_635] : memref<8x2432xf32, #tpu.memory_space<vmem>>, vector<8x128xf32>
    %c0_636 = arith.constant 0 : index
    %c1025_637 = arith.constant 1025 : index
    %674 = vector.load %arg10[%c0_636, %c1025_637] : memref<8x2432xf32, #tpu.memory_space<vmem>>, vector<8x128xf32>
    %c0_638 = arith.constant 0 : index
    %c1026_639 = arith.constant 1026 : index
    %675 = vector.load %arg10[%c0_638, %c1026_639] : memref<8x2432xf32, #tpu.memory_space<vmem>>, vector<8x128xf32>
    %c0_640 = arith.constant 0 : index
    %c1152_641 = arith.constant 1152 : index
    %676 = vector.load %arg10[%c0_640, %c1152_641] : memref<8x2432xf32, #tpu.memory_space<vmem>>, vector<8x128xf32>
    %c0_642 = arith.constant 0 : index
    %c1153_643 = arith.constant 1153 : index
    %677 = vector.load %arg10[%c0_642, %c1153_643] : memref<8x2432xf32, #tpu.memory_space<vmem>>, vector<8x128xf32>
    %c0_644 = arith.constant 0 : index
    %c1154_645 = arith.constant 1154 : index
    %678 = vector.load %arg10[%c0_644, %c1154_645] : memref<8x2432xf32, #tpu.memory_space<vmem>>, vector<8x128xf32>
    %c0_646 = arith.constant 0 : index
    %c1280_647 = arith.constant 1280 : index
    %679 = vector.load %arg10[%c0_646, %c1280_647] : memref<8x2432xf32, #tpu.memory_space<vmem>>, vector<8x128xf32>
    %c0_648 = arith.constant 0 : index
    %c1281_649 = arith.constant 1281 : index
    %680 = vector.load %arg10[%c0_648, %c1281_649] : memref<8x2432xf32, #tpu.memory_space<vmem>>, vector<8x128xf32>
    %c0_650 = arith.constant 0 : index
    %c1282_651 = arith.constant 1282 : index
    %681 = vector.load %arg10[%c0_650, %c1282_651] : memref<8x2432xf32, #tpu.memory_space<vmem>>, vector<8x128xf32>
    %682 = tpu.concatenate %673, %674, %675, %676, %677, %678, %679, %680, %681 in 0 : vector<8x128xf32>, vector<8x128xf32>, vector<8x128xf32>, vector<8x128xf32>, vector<8x128xf32>, vector<8x128xf32>, vector<8x128xf32>, vector<8x128xf32>, vector<8x128xf32> -> vector<72x128xf32>
    %cst_652 = arith.constant dense<0.000000e+00> : vector<8x128xf32>
    %683 = tpu.matmul %7, %682, %cst_652 {dimension_numbers = #tpu.dot_dimension_numbers<[1], [0], [0], [1], [0, 0, 1, 1], [], []>} : vector<8x72xf32>, vector<72x128xf32>, vector<8x128xf32> -> vector<8x128xf32>
    %684 = vector.broadcast %9 : vector<8x1xf32> to vector<8x128xf32>
    %685 = arith.addf %683, %684 : vector<8x128xf32>
    %cst_653 = arith.constant 0.000000e+00 : f32
    %686 = vector.broadcast %cst_653 : f32 to vector<8x128xf32>
    %687 = arith.maximumf %685, %686 : vector<8x128xf32>
    %c0_654 = arith.constant 0 : index
    %c0_655 = arith.constant 0 : index
    %c1024_656 = arith.constant 1024 : index
    %688 = vector.load %arg8[%c0_654, %c0_655, %c1024_656] : memref<1x8x2048xf32, #tpu.memory_space<vmem>>, vector<1x8x128xf32>
    %689 = vector.shape_cast %688 : vector<1x8x128xf32> to vector<8x128xf32>
    %690 = vector.shape_cast %687 : vector<8x128xf32> to vector<1x8x128xf32>
    tpu.vector_store %arg8[%c0_654, %c0_655, %c1024_656], %690 {strides = array<i32>} : memref<1x8x2048xf32, #tpu.memory_space<vmem>>, vector<1x8x128xf32>,
    %c0_657 = arith.constant 0 : index
    %c1152_658 = arith.constant 1152 : index
    %691 = vector.load %arg10[%c0_657, %c1152_658] : memref<8x2432xf32, #tpu.memory_space<vmem>>, vector<8x128xf32>
    %c0_659 = arith.constant 0 : index
    %c1153_660 = arith.constant 1153 : index
    %692 = vector.load %arg10[%c0_659, %c1153_660] : memref<8x2432xf32, #tpu.memory_space<vmem>>, vector<8x128xf32>
    %c0_661 = arith.constant 0 : index
    %c1154_662 = arith.constant 1154 : index
    %693 = vector.load %arg10[%c0_661, %c1154_662] : memref<8x2432xf32, #tpu.memory_space<vmem>>, vector<8x128xf32>
    %c0_663 = arith.constant 0 : index
    %c1280_664 = arith.constant 1280 : index
    %694 = vector.load %arg10[%c0_663, %c1280_664] : memref<8x2432xf32, #tpu.memory_space<vmem>>, vector<8x128xf32>
    %c0_665 = arith.constant 0 : index
    %c1281_666 = arith.constant 1281 : index
    %695 = vector.load %arg10[%c0_665, %c1281_666] : memref<8x2432xf32, #tpu.memory_space<vmem>>, vector<8x128xf32>
    %c0_667 = arith.constant 0 : index
    %c1282_668 = arith.constant 1282 : index
    %696 = vector.load %arg10[%c0_667, %c1282_668] : memref<8x2432xf32, #tpu.memory_space<vmem>>, vector<8x128xf32>
    %c0_669 = arith.constant 0 : index
    %c1408_670 = arith.constant 1408 : index
    %697 = vector.load %arg10[%c0_669, %c1408_670] : memref<8x2432xf32, #tpu.memory_space<vmem>>, vector<8x128xf32>
    %c0_671 = arith.constant 0 : index
    %c1409_672 = arith.constant 1409 : index
    %698 = vector.load %arg10[%c0_671, %c1409_672] : memref<8x2432xf32, #tpu.memory_space<vmem>>, vector<8x128xf32>
    %c0_673 = arith.constant 0 : index
    %c1410_674 = arith.constant 1410 : index
    %699 = vector.load %arg10[%c0_673, %c1410_674] : memref<8x2432xf32, #tpu.memory_space<vmem>>, vector<8x128xf32>
    %700 = tpu.concatenate %691, %692, %693, %694, %695, %696, %697, %698, %699 in 0 : vector<8x128xf32>, vector<8x128xf32>, vector<8x128xf32>, vector<8x128xf32>, vector<8x128xf32>, vector<8x128xf32>, vector<8x128xf32>, vector<8x128xf32>, vector<8x128xf32> -> vector<72x128xf32>
    %cst_675 = arith.constant dense<0.000000e+00> : vector<8x128xf32>
    %701 = tpu.matmul %7, %700, %cst_675 {dimension_numbers = #tpu.dot_dimension_numbers<[1], [0], [0], [1], [0, 0, 1, 1], [], []>} : vector<8x72xf32>, vector<72x128xf32>, vector<8x128xf32> -> vector<8x128xf32>
    %702 = vector.broadcast %9 : vector<8x1xf32> to vector<8x128xf32>
    %703 = arith.addf %701, %702 : vector<8x128xf32>
    %cst_676 = arith.constant 0.000000e+00 : f32
    %704 = vector.broadcast %cst_676 : f32 to vector<8x128xf32>
    %705 = arith.maximumf %703, %704 : vector<8x128xf32>
    %c0_677 = arith.constant 0 : index
    %c0_678 = arith.constant 0 : index
    %c1152_679 = arith.constant 1152 : index
    %706 = vector.load %arg8[%c0_677, %c0_678, %c1152_679] : memref<1x8x2048xf32, #tpu.memory_space<vmem>>, vector<1x8x128xf32>
    %707 = vector.shape_cast %706 : vector<1x8x128xf32> to vector<8x128xf32>
    %708 = vector.shape_cast %705 : vector<8x128xf32> to vector<1x8x128xf32>
    tpu.vector_store %arg8[%c0_677, %c0_678, %c1152_679], %708 {strides = array<i32>} : memref<1x8x2048xf32, #tpu.memory_space<vmem>>, vector<1x8x128xf32>,
    %c0_680 = arith.constant 0 : index
    %c1280_681 = arith.constant 1280 : index
    %709 = vector.load %arg10[%c0_680, %c1280_681] : memref<8x2432xf32, #tpu.memory_space<vmem>>, vector<8x128xf32>
    %c0_682 = arith.constant 0 : index
    %c1281_683 = arith.constant 1281 : index
    %710 = vector.load %arg10[%c0_682, %c1281_683] : memref<8x2432xf32, #tpu.memory_space<vmem>>, vector<8x128xf32>
    %c0_684 = arith.constant 0 : index
    %c1282_685 = arith.constant 1282 : index
    %711 = vector.load %arg10[%c0_684, %c1282_685] : memref<8x2432xf32, #tpu.memory_space<vmem>>, vector<8x128xf32>
    %c0_686 = arith.constant 0 : index
    %c1408_687 = arith.constant 1408 : index
    %712 = vector.load %arg10[%c0_686, %c1408_687] : memref<8x2432xf32, #tpu.memory_space<vmem>>, vector<8x128xf32>
    %c0_688 = arith.constant 0 : index
    %c1409_689 = arith.constant 1409 : index
    %713 = vector.load %arg10[%c0_688, %c1409_689] : memref<8x2432xf32, #tpu.memory_space<vmem>>, vector<8x128xf32>
    %c0_690 = arith.constant 0 : index
    %c1410_691 = arith.constant 1410 : index
    %714 = vector.load %arg10[%c0_690, %c1410_691] : memref<8x2432xf32, #tpu.memory_space<vmem>>, vector<8x128xf32>
    %c0_692 = arith.constant 0 : index
    %c1536_693 = arith.constant 1536 : index
    %715 = vector.load %arg10[%c0_692, %c1536_693] : memref<8x2432xf32, #tpu.memory_space<vmem>>, vector<8x128xf32>
    %c0_694 = arith.constant 0 : index
    %c1537_695 = arith.constant 1537 : index
    %716 = vector.load %arg10[%c0_694, %c1537_695] : memref<8x2432xf32, #tpu.memory_space<vmem>>, vector<8x128xf32>
    %c0_696 = arith.constant 0 : index
    %c1538_697 = arith.constant 1538 : index
    %717 = vector.load %arg10[%c0_696, %c1538_697] : memref<8x2432xf32, #tpu.memory_space<vmem>>, vector<8x128xf32>
    %718 = tpu.concatenate %709, %710, %711, %712, %713, %714, %715, %716, %717 in 0 : vector<8x128xf32>, vector<8x128xf32>, vector<8x128xf32>, vector<8x128xf32>, vector<8x128xf32>, vector<8x128xf32>, vector<8x128xf32>, vector<8x128xf32>, vector<8x128xf32> -> vector<72x128xf32>
    %cst_698 = arith.constant dense<0.000000e+00> : vector<8x128xf32>
    %719 = tpu.matmul %7, %718, %cst_698 {dimension_numbers = #tpu.dot_dimension_numbers<[1], [0], [0], [1], [0, 0, 1, 1], [], []>} : vector<8x72xf32>, vector<72x128xf32>, vector<8x128xf32> -> vector<8x128xf32>
    %720 = vector.broadcast %9 : vector<8x1xf32> to vector<8x128xf32>
    %721 = arith.addf %719, %720 : vector<8x128xf32>
    %cst_699 = arith.constant 0.000000e+00 : f32
    %722 = vector.broadcast %cst_699 : f32 to vector<8x128xf32>
    %723 = arith.maximumf %721, %722 : vector<8x128xf32>
    %c0_700 = arith.constant 0 : index
    %c0_701 = arith.constant 0 : index
    %c1280_702 = arith.constant 1280 : index
    %724 = vector.load %arg8[%c0_700, %c0_701, %c1280_702] : memref<1x8x2048xf32, #tpu.memory_space<vmem>>, vector<1x8x128xf32>
    %725 = vector.shape_cast %724 : vector<1x8x128xf32> to vector<8x128xf32>
    %726 = vector.shape_cast %723 : vector<8x128xf32> to vector<1x8x128xf32>
    tpu.vector_store %arg8[%c0_700, %c0_701, %c1280_702], %726 {strides = array<i32>} : memref<1x8x2048xf32, #tpu.memory_space<vmem>>, vector<1x8x128xf32>,
    %c0_703 = arith.constant 0 : index
    %c1408_704 = arith.constant 1408 : index
    %727 = vector.load %arg10[%c0_703, %c1408_704] : memref<8x2432xf32, #tpu.memory_space<vmem>>, vector<8x128xf32>
    %c0_705 = arith.constant 0 : index
    %c1409_706 = arith.constant 1409 : index
    %728 = vector.load %arg10[%c0_705, %c1409_706] : memref<8x2432xf32, #tpu.memory_space<vmem>>, vector<8x128xf32>
    %c0_707 = arith.constant 0 : index
    %c1410_708 = arith.constant 1410 : index
    %729 = vector.load %arg10[%c0_707, %c1410_708] : memref<8x2432xf32, #tpu.memory_space<vmem>>, vector<8x128xf32>
    %c0_709 = arith.constant 0 : index
    %c1536_710 = arith.constant 1536 : index
    %730 = vector.load %arg10[%c0_709, %c1536_710] : memref<8x2432xf32, #tpu.memory_space<vmem>>, vector<8x128xf32>
    %c0_711 = arith.constant 0 : index
    %c1537_712 = arith.constant 1537 : index
    %731 = vector.load %arg10[%c0_711, %c1537_712] : memref<8x2432xf32, #tpu.memory_space<vmem>>, vector<8x128xf32>
    %c0_713 = arith.constant 0 : index
    %c1538_714 = arith.constant 1538 : index
    %732 = vector.load %arg10[%c0_713, %c1538_714] : memref<8x2432xf32, #tpu.memory_space<vmem>>, vector<8x128xf32>
    %c0_715 = arith.constant 0 : index
    %c1664_716 = arith.constant 1664 : index
    %733 = vector.load %arg10[%c0_715, %c1664_716] : memref<8x2432xf32, #tpu.memory_space<vmem>>, vector<8x128xf32>
    %c0_717 = arith.constant 0 : index
    %c1665_718 = arith.constant 1665 : index
    %734 = vector.load %arg10[%c0_717, %c1665_718] : memref<8x2432xf32, #tpu.memory_space<vmem>>, vector<8x128xf32>
    %c0_719 = arith.constant 0 : index
    %c1666_720 = arith.constant 1666 : index
    %735 = vector.load %arg10[%c0_719, %c1666_720] : memref<8x2432xf32, #tpu.memory_space<vmem>>, vector<8x128xf32>
    %736 = tpu.concatenate %727, %728, %729, %730, %731, %732, %733, %734, %735 in 0 : vector<8x128xf32>, vector<8x128xf32>, vector<8x128xf32>, vector<8x128xf32>, vector<8x128xf32>, vector<8x128xf32>, vector<8x128xf32>, vector<8x128xf32>, vector<8x128xf32> -> vector<72x128xf32>
    %cst_721 = arith.constant dense<0.000000e+00> : vector<8x128xf32>
    %737 = tpu.matmul %7, %736, %cst_721 {dimension_numbers = #tpu.dot_dimension_numbers<[1], [0], [0], [1], [0, 0, 1, 1], [], []>} : vector<8x72xf32>, vector<72x128xf32>, vector<8x128xf32> -> vector<8x128xf32>
    %738 = vector.broadcast %9 : vector<8x1xf32> to vector<8x128xf32>
    %739 = arith.addf %737, %738 : vector<8x128xf32>
    %cst_722 = arith.constant 0.000000e+00 : f32
    %740 = vector.broadcast %cst_722 : f32 to vector<8x128xf32>
    %741 = arith.maximumf %739, %740 : vector<8x128xf32>
    %c0_723 = arith.constant 0 : index
    %c0_724 = arith.constant 0 : index
    %c1408_725 = arith.constant 1408 : index
    %742 = vector.load %arg8[%c0_723, %c0_724, %c1408_725] : memref<1x8x2048xf32, #tpu.memory_space<vmem>>, vector<1x8x128xf32>
    %743 = vector.shape_cast %742 : vector<1x8x128xf32> to vector<8x128xf32>
    %744 = vector.shape_cast %741 : vector<8x128xf32> to vector<1x8x128xf32>
    tpu.vector_store %arg8[%c0_723, %c0_724, %c1408_725], %744 {strides = array<i32>} : memref<1x8x2048xf32, #tpu.memory_space<vmem>>, vector<1x8x128xf32>,
    %c0_726 = arith.constant 0 : index
    %c1536_727 = arith.constant 1536 : index
    %745 = vector.load %arg10[%c0_726, %c1536_727] : memref<8x2432xf32, #tpu.memory_space<vmem>>, vector<8x128xf32>
    %c0_728 = arith.constant 0 : index
    %c1537_729 = arith.constant 1537 : index
    %746 = vector.load %arg10[%c0_728, %c1537_729] : memref<8x2432xf32, #tpu.memory_space<vmem>>, vector<8x128xf32>
    %c0_730 = arith.constant 0 : index
    %c1538_731 = arith.constant 1538 : index
    %747 = vector.load %arg10[%c0_730, %c1538_731] : memref<8x2432xf32, #tpu.memory_space<vmem>>, vector<8x128xf32>
    %c0_732 = arith.constant 0 : index
    %c1664_733 = arith.constant 1664 : index
    %748 = vector.load %arg10[%c0_732, %c1664_733] : memref<8x2432xf32, #tpu.memory_space<vmem>>, vector<8x128xf32>
    %c0_734 = arith.constant 0 : index
    %c1665_735 = arith.constant 1665 : index
    %749 = vector.load %arg10[%c0_734, %c1665_735] : memref<8x2432xf32, #tpu.memory_space<vmem>>, vector<8x128xf32>
    %c0_736 = arith.constant 0 : index
    %c1666_737 = arith.constant 1666 : index
    %750 = vector.load %arg10[%c0_736, %c1666_737] : memref<8x2432xf32, #tpu.memory_space<vmem>>, vector<8x128xf32>
    %c0_738 = arith.constant 0 : index
    %c1792_739 = arith.constant 1792 : index
    %751 = vector.load %arg10[%c0_738, %c1792_739] : memref<8x2432xf32, #tpu.memory_space<vmem>>, vector<8x128xf32>
    %c0_740 = arith.constant 0 : index
    %c1793_741 = arith.constant 1793 : index
    %752 = vector.load %arg10[%c0_740, %c1793_741] : memref<8x2432xf32, #tpu.memory_space<vmem>>, vector<8x128xf32>
    %c0_742 = arith.constant 0 : index
    %c1794_743 = arith.constant 1794 : index
    %753 = vector.load %arg10[%c0_742, %c1794_743] : memref<8x2432xf32, #tpu.memory_space<vmem>>, vector<8x128xf32>
    %754 = tpu.concatenate %745, %746, %747, %748, %749, %750, %751, %752, %753 in 0 : vector<8x128xf32>, vector<8x128xf32>, vector<8x128xf32>, vector<8x128xf32>, vector<8x128xf32>, vector<8x128xf32>, vector<8x128xf32>, vector<8x128xf32>, vector<8x128xf32> -> vector<72x128xf32>
    %cst_744 = arith.constant dense<0.000000e+00> : vector<8x128xf32>
    %755 = tpu.matmul %7, %754, %cst_744 {dimension_numbers = #tpu.dot_dimension_numbers<[1], [0], [0], [1], [0, 0, 1, 1], [], []>} : vector<8x72xf32>, vector<72x128xf32>, vector<8x128xf32> -> vector<8x128xf32>
    %756 = vector.broadcast %9 : vector<8x1xf32> to vector<8x128xf32>
    %757 = arith.addf %755, %756 : vector<8x128xf32>
    %cst_745 = arith.constant 0.000000e+00 : f32
    %758 = vector.broadcast %cst_745 : f32 to vector<8x128xf32>
    %759 = arith.maximumf %757, %758 : vector<8x128xf32>
    %c0_746 = arith.constant 0 : index
    %c0_747 = arith.constant 0 : index
    %c1536_748 = arith.constant 1536 : index
    %760 = vector.load %arg8[%c0_746, %c0_747, %c1536_748] : memref<1x8x2048xf32, #tpu.memory_space<vmem>>, vector<1x8x128xf32>
    %761 = vector.shape_cast %760 : vector<1x8x128xf32> to vector<8x128xf32>
    %762 = vector.shape_cast %759 : vector<8x128xf32> to vector<1x8x128xf32>
    tpu.vector_store %arg8[%c0_746, %c0_747, %c1536_748], %762 {strides = array<i32>} : memref<1x8x2048xf32, #tpu.memory_space<vmem>>, vector<1x8x128xf32>,
    %c0_749 = arith.constant 0 : index
    %c1664_750 = arith.constant 1664 : index
    %763 = vector.load %arg10[%c0_749, %c1664_750] : memref<8x2432xf32, #tpu.memory_space<vmem>>, vector<8x128xf32>
    %c0_751 = arith.constant 0 : index
    %c1665_752 = arith.constant 1665 : index
    %764 = vector.load %arg10[%c0_751, %c1665_752] : memref<8x2432xf32, #tpu.memory_space<vmem>>, vector<8x128xf32>
    %c0_753 = arith.constant 0 : index
    %c1666_754 = arith.constant 1666 : index
    %765 = vector.load %arg10[%c0_753, %c1666_754] : memref<8x2432xf32, #tpu.memory_space<vmem>>, vector<8x128xf32>
    %c0_755 = arith.constant 0 : index
    %c1792_756 = arith.constant 1792 : index
    %766 = vector.load %arg10[%c0_755, %c1792_756] : memref<8x2432xf32, #tpu.memory_space<vmem>>, vector<8x128xf32>
    %c0_757 = arith.constant 0 : index
    %c1793_758 = arith.constant 1793 : index
    %767 = vector.load %arg10[%c0_757, %c1793_758] : memref<8x2432xf32, #tpu.memory_space<vmem>>, vector<8x128xf32>
    %c0_759 = arith.constant 0 : index
    %c1794_760 = arith.constant 1794 : index
    %768 = vector.load %arg10[%c0_759, %c1794_760] : memref<8x2432xf32, #tpu.memory_space<vmem>>, vector<8x128xf32>
    %c0_761 = arith.constant 0 : index
    %c1920_762 = arith.constant 1920 : index
    %769 = vector.load %arg10[%c0_761, %c1920_762] : memref<8x2432xf32, #tpu.memory_space<vmem>>, vector<8x128xf32>
    %c0_763 = arith.constant 0 : index
    %c1921_764 = arith.constant 1921 : index
    %770 = vector.load %arg10[%c0_763, %c1921_764] : memref<8x2432xf32, #tpu.memory_space<vmem>>, vector<8x128xf32>
    %c0_765 = arith.constant 0 : index
    %c1922_766 = arith.constant 1922 : index
    %771 = vector.load %arg10[%c0_765, %c1922_766] : memref<8x2432xf32, #tpu.memory_space<vmem>>, vector<8x128xf32>
    %772 = tpu.concatenate %763, %764, %765, %766, %767, %768, %769, %770, %771 in 0 : vector<8x128xf32>, vector<8x128xf32>, vector<8x128xf32>, vector<8x128xf32>, vector<8x128xf32>, vector<8x128xf32>, vector<8x128xf32>, vector<8x128xf32>, vector<8x128xf32> -> vector<72x128xf32>
    %cst_767 = arith.constant dense<0.000000e+00> : vector<8x128xf32>
    %773 = tpu.matmul %7, %772, %cst_767 {dimension_numbers = #tpu.dot_dimension_numbers<[1], [0], [0], [1], [0, 0, 1, 1], [], []>} : vector<8x72xf32>, vector<72x128xf32>, vector<8x128xf32> -> vector<8x128xf32>
    %774 = vector.broadcast %9 : vector<8x1xf32> to vector<8x128xf32>
    %775 = arith.addf %773, %774 : vector<8x128xf32>
    %cst_768 = arith.constant 0.000000e+00 : f32
    %776 = vector.broadcast %cst_768 : f32 to vector<8x128xf32>
    %777 = arith.maximumf %775, %776 : vector<8x128xf32>
    %c0_769 = arith.constant 0 : index
    %c0_770 = arith.constant 0 : index
    %c1664_771 = arith.constant 1664 : index
    %778 = vector.load %arg8[%c0_769, %c0_770, %c1664_771] : memref<1x8x2048xf32, #tpu.memory_space<vmem>>, vector<1x8x128xf32>
    %779 = vector.shape_cast %778 : vector<1x8x128xf32> to vector<8x128xf32>
    %780 = vector.shape_cast %777 : vector<8x128xf32> to vector<1x8x128xf32>
    tpu.vector_store %arg8[%c0_769, %c0_770, %c1664_771], %780 {strides = array<i32>} : memref<1x8x2048xf32, #tpu.memory_space<vmem>>, vector<1x8x128xf32>,
    %c0_772 = arith.constant 0 : index
    %c1792_773 = arith.constant 1792 : index
    %781 = vector.load %arg10[%c0_772, %c1792_773] : memref<8x2432xf32, #tpu.memory_space<vmem>>, vector<8x128xf32>
    %c0_774 = arith.constant 0 : index
    %c1793_775 = arith.constant 1793 : index
    %782 = vector.load %arg10[%c0_774, %c1793_775] : memref<8x2432xf32, #tpu.memory_space<vmem>>, vector<8x128xf32>
    %c0_776 = arith.constant 0 : index
    %c1794_777 = arith.constant 1794 : index
    %783 = vector.load %arg10[%c0_776, %c1794_777] : memref<8x2432xf32, #tpu.memory_space<vmem>>, vector<8x128xf32>
    %c0_778 = arith.constant 0 : index
    %c1920_779 = arith.constant 1920 : index
    %784 = vector.load %arg10[%c0_778, %c1920_779] : memref<8x2432xf32, #tpu.memory_space<vmem>>, vector<8x128xf32>
    %c0_780 = arith.constant 0 : index
    %c1921_781 = arith.constant 1921 : index
    %785 = vector.load %arg10[%c0_780, %c1921_781] : memref<8x2432xf32, #tpu.memory_space<vmem>>, vector<8x128xf32>
    %c0_782 = arith.constant 0 : index
    %c1922_783 = arith.constant 1922 : index
    %786 = vector.load %arg10[%c0_782, %c1922_783] : memref<8x2432xf32, #tpu.memory_space<vmem>>, vector<8x128xf32>
    %c0_784 = arith.constant 0 : index
    %c2048_785 = arith.constant 2048 : index
    %787 = vector.load %arg10[%c0_784, %c2048_785] : memref<8x2432xf32, #tpu.memory_space<vmem>>, vector<8x128xf32>
    %c0_786 = arith.constant 0 : index
    %c2049_787 = arith.constant 2049 : index
    %788 = vector.load %arg10[%c0_786, %c2049_787] : memref<8x2432xf32, #tpu.memory_space<vmem>>, vector<8x128xf32>
    %c0_788 = arith.constant 0 : index
    %c2050_789 = arith.constant 2050 : index
    %789 = vector.load %arg10[%c0_788, %c2050_789] : memref<8x2432xf32, #tpu.memory_space<vmem>>, vector<8x128xf32>
    %790 = tpu.concatenate %781, %782, %783, %784, %785, %786, %787, %788, %789 in 0 : vector<8x128xf32>, vector<8x128xf32>, vector<8x128xf32>, vector<8x128xf32>, vector<8x128xf32>, vector<8x128xf32>, vector<8x128xf32>, vector<8x128xf32>, vector<8x128xf32> -> vector<72x128xf32>
    %cst_790 = arith.constant dense<0.000000e+00> : vector<8x128xf32>
    %791 = tpu.matmul %7, %790, %cst_790 {dimension_numbers = #tpu.dot_dimension_numbers<[1], [0], [0], [1], [0, 0, 1, 1], [], []>} : vector<8x72xf32>, vector<72x128xf32>, vector<8x128xf32> -> vector<8x128xf32>
    %792 = vector.broadcast %9 : vector<8x1xf32> to vector<8x128xf32>
    %793 = arith.addf %791, %792 : vector<8x128xf32>
    %cst_791 = arith.constant 0.000000e+00 : f32
    %794 = vector.broadcast %cst_791 : f32 to vector<8x128xf32>
    %795 = arith.maximumf %793, %794 : vector<8x128xf32>
    %c0_792 = arith.constant 0 : index
    %c0_793 = arith.constant 0 : index
    %c1792_794 = arith.constant 1792 : index
    %796 = vector.load %arg8[%c0_792, %c0_793, %c1792_794] : memref<1x8x2048xf32, #tpu.memory_space<vmem>>, vector<1x8x128xf32>
    %797 = vector.shape_cast %796 : vector<1x8x128xf32> to vector<8x128xf32>
    %798 = vector.shape_cast %795 : vector<8x128xf32> to vector<1x8x128xf32>
    tpu.vector_store %arg8[%c0_792, %c0_793, %c1792_794], %798 {strides = array<i32>} : memref<1x8x2048xf32, #tpu.memory_space<vmem>>, vector<1x8x128xf32>,
    %c0_795 = arith.constant 0 : index
    %c1920_796 = arith.constant 1920 : index
    %799 = vector.load %arg10[%c0_795, %c1920_796] : memref<8x2432xf32, #tpu.memory_space<vmem>>, vector<8x128xf32>
    %c0_797 = arith.constant 0 : index
    %c1921_798 = arith.constant 1921 : index
    %800 = vector.load %arg10[%c0_797, %c1921_798] : memref<8x2432xf32, #tpu.memory_space<vmem>>, vector<8x128xf32>
    %c0_799 = arith.constant 0 : index
    %c1922_800 = arith.constant 1922 : index
    %801 = vector.load %arg10[%c0_799, %c1922_800] : memref<8x2432xf32, #tpu.memory_space<vmem>>, vector<8x128xf32>
    %c0_801 = arith.constant 0 : index
    %c2048_802 = arith.constant 2048 : index
    %802 = vector.load %arg10[%c0_801, %c2048_802] : memref<8x2432xf32, #tpu.memory_space<vmem>>, vector<8x128xf32>
    %c0_803 = arith.constant 0 : index
    %c2049_804 = arith.constant 2049 : index
    %803 = vector.load %arg10[%c0_803, %c2049_804] : memref<8x2432xf32, #tpu.memory_space<vmem>>, vector<8x128xf32>
    %c0_805 = arith.constant 0 : index
    %c2050_806 = arith.constant 2050 : index
    %804 = vector.load %arg10[%c0_805, %c2050_806] : memref<8x2432xf32, #tpu.memory_space<vmem>>, vector<8x128xf32>
    %c0_807 = arith.constant 0 : index
    %c2176_808 = arith.constant 2176 : index
    %805 = vector.load %arg10[%c0_807, %c2176_808] : memref<8x2432xf32, #tpu.memory_space<vmem>>, vector<8x128xf32>
    %c0_809 = arith.constant 0 : index
    %c2177_810 = arith.constant 2177 : index
    %806 = vector.load %arg10[%c0_809, %c2177_810] : memref<8x2432xf32, #tpu.memory_space<vmem>>, vector<8x128xf32>
    %c0_811 = arith.constant 0 : index
    %c2178_812 = arith.constant 2178 : index
    %807 = vector.load %arg10[%c0_811, %c2178_812] : memref<8x2432xf32, #tpu.memory_space<vmem>>, vector<8x128xf32>
    %808 = tpu.concatenate %799, %800, %801, %802, %803, %804, %805, %806, %807 in 0 : vector<8x128xf32>, vector<8x128xf32>, vector<8x128xf32>, vector<8x128xf32>, vector<8x128xf32>, vector<8x128xf32>, vector<8x128xf32>, vector<8x128xf32>, vector<8x128xf32> -> vector<72x128xf32>
    %cst_813 = arith.constant dense<0.000000e+00> : vector<8x128xf32>
    %809 = tpu.matmul %7, %808, %cst_813 {dimension_numbers = #tpu.dot_dimension_numbers<[1], [0], [0], [1], [0, 0, 1, 1], [], []>} : vector<8x72xf32>, vector<72x128xf32>, vector<8x128xf32> -> vector<8x128xf32>
    %810 = vector.broadcast %9 : vector<8x1xf32> to vector<8x128xf32>
    %811 = arith.addf %809, %810 : vector<8x128xf32>
    %cst_814 = arith.constant 0.000000e+00 : f32
    %812 = vector.broadcast %cst_814 : f32 to vector<8x128xf32>
    %813 = arith.maximumf %811, %812 : vector<8x128xf32>
    %c0_815 = arith.constant 0 : index
    %c0_816 = arith.constant 0 : index
    %c1920_817 = arith.constant 1920 : index
    %814 = vector.load %arg8[%c0_815, %c0_816, %c1920_817] : memref<1x8x2048xf32, #tpu.memory_space<vmem>>, vector<1x8x128xf32>
    %815 = vector.shape_cast %814 : vector<1x8x128xf32> to vector<8x128xf32>
    %816 = vector.shape_cast %813 : vector<8x128xf32> to vector<1x8x128xf32>
    tpu.vector_store %arg8[%c0_815, %c0_816, %c1920_817], %816 {strides = array<i32>} : memref<1x8x2048xf32, #tpu.memory_space<vmem>>, vector<1x8x128xf32>,
    return
  }
  func.func @transform_0(%arg0: i32, %arg1: i32) -> (i32, i32, i32) {
    %c0_i32 = arith.constant 0 : i32
    %0 = arith.addi %arg1, %c0_i32 : i32
    %c0_i32_0 = arith.constant 0 : i32
    %c0_i32_1 = arith.constant 0 : i32
    return %arg0, %c0_i32_0, %0 : i32, i32, i32
  }
  func.func @transform_1(%arg0: i32, %arg1: i32) -> (i32, i32, i32) {
    %c1_i32 = arith.constant 1 : i32
    %0 = arith.addi %arg1, %c1_i32 : i32
    %c0_i32 = arith.constant 0 : i32
    %c0_i32_0 = arith.constant 0 : i32
    return %arg0, %c0_i32, %0 : i32, i32, i32
  }
  func.func @transform_2(%arg0: i32, %arg1: i32) -> (i32, i32) {
    %c0_i32 = arith.constant 0 : i32
    %c0_i32_0 = arith.constant 0 : i32
    %c0_i32_1 = arith.constant 0 : i32
    return %c0_i32, %c0_i32_0 : i32, i32
  }
  func.func @transform_3(%arg0: i32, %arg1: i32) -> (i32, i32) {
    %c0_i32 = arith.constant 0 : i32
    %c0_i32_0 = arith.constant 0 : i32
    %c0_i32_1 = arith.constant 0 : i32
    return %c0_i32, %c0_i32_0 : i32, i32
  }
  func.func @transform_4(%arg0: i32, %arg1: i32) -> (i32, i32) {
    %c0_i32 = arith.constant 0 : i32
    %c0_i32_0 = arith.constant 0 : i32
    %c0_i32_1 = arith.constant 0 : i32
    return %c0_i32, %c0_i32_0 : i32, i32
  }
  func.func @transform_5(%arg0: i32, %arg1: i32) -> (i32, i32) {
    %c0_i32 = arith.constant 0 : i32
    %c0_i32_0 = arith.constant 0 : i32
    %c0_i32_1 = arith.constant 0 : i32
    return %c0_i32, %c0_i32_0 : i32, i32
  }
  func.func @transform_6(%arg0: i32, %arg1: i32) -> (i32, i32, i32) {
    %c0_i32 = arith.constant 0 : i32
    %c0_i32_0 = arith.constant 0 : i32
    return %arg0, %c0_i32, %arg1 : i32, i32, i32
  }
}

</mosaic_0001>

<bundles_post_ra>
// kernel: tpu_custom_call.1
= control target key start
LH: loop header
LB: loop body
LE: loop exit
PB: predicated region body
PF: predicated region fallthrough
CT: control target
= control target key end

     0   :  { %s8948_s0 = inlined_call_operand.hbm [shape: f32[2,4,4096], index: 0, kind: input, shape index: {}]   ;;  %s8949_s1 = inlined_call_operand.hbm [shape: f32[2,4,4096], index: 1, kind: input, shape index: {}]   ;;  %s8950_s2 = inlined_call_operand.vmem [shape: f32[8,36], index: 2, kind: input, shape index: {}]   ;;  %s8951_s3 = inlined_call_operand.vmem [shape: f32[8,1], index: 3, kind: input, shape index: {}]   ;;  %s8952_s4 = inlined_call_operand.vmem [shape: f32[8,72], index: 4, kind: input, shape index: {}]   ;;  %s8953_s5 = inlined_call_operand.vmem [shape: f32[8,1], index: 5, kind: input, shape index: {}]   ;;  %s8954_s6 = inlined_call_operand.hbm [shape: f32[2,8,2048], index: 6, kind: output, shape index: {}]  }
   0x1   :  { %8959 = sst [smem:[#allocation14_spill]] %s8948_s0 }
   0x2   :  { %11 = vsyncpa [#allocation5], 0 }
   0x3   :  { %13 = vsyncpa [#allocation5 + $0x1], 0 }
   0x4   :  { %14 = vsyncpa [#allocation8], 0 }
   0x5   :  { %16 = vsyncpa [#allocation8 + $0x1], 0 }
   0x6   :  { %17 = vsyncpa [#allocation6], 0 }
   0x7   :  { %19 = vsyncpa [#allocation6 + $0x1], 0  ;;  %s7360_s21 = smov 0   ;;  %s7362_s22 = smov 0  }
   0x8   :  { %s7364_s23 = smov 0   ;;  %s7366_s24 = smov 0  }
   0x9   :  { %s7368_s25 = smov 0   ;;  %s7370_s26 = smov 0  }
   0xa LB: > { %s4976_s27 = sadd.s32 4294967295, %s7313_s26   ;;  %s4977_s28 = sadd.s32 4294967294, %s7313_s26   ;;  %s7313_s26 = sphi %s7370_s26, %s25_s26   ;;  %s7309_s25 = sphi %s7368_s25, %s8987_s25   ;;  %s7305_s24 = sphi %s7366_s24, %s8986_s24   ;;  %s7301_s23 = sphi %s7364_s23, %s8985_s23   ;;  %s7297_s22 = sphi %s7362_s22, %s8984_s22   ;;  %s7293_s21 = sphi %s7360_s21, %s8983_s21  }
   0xb   : > { %s37_s29 = sadd.s32 1, %s7309_s25  ;;  %s46_s30 = sadd.s32 1, %s7301_s23 }
   0xc   : > { %p39_p0 = scmp.ge.s32.totalorder %s37_s29, 2  ;;  %p53_p1 = scmp.ne.s32.totalorder %s7301_s23, %s7297_s22 }
   0xd   : > { %p54_p2 = scmp.eq.s32.totalorder %s7313_s26, 0  ;;  %p59_p3 = scmp.ne.s32.totalorder %s7297_s22, %s7293_s21 }
   0xe   : > { %s8989_s29 = smov (%p39_p0, %s37_s29), 0  ;;  %p60_p5 = scmp.eq.s32.totalorder %s4976_s27, 0 }
   0xf   : > { %8960 = sst [smem:[#allocation13_spill]] %s8989_s29  ;;  %p7401_p4 = por %p54_p2, %p53_p1 }
  0x10   : > { %s41_s8 = ssub.s32 %s7309_s25, %s8989_s29  ;;  %p199_p6 = scmp.eq.s32.totalorder %s4976_s27, 1 }
  0x11   : > { %p44_p7 = scmp.eq.s32.totalorder %s41_s8, 0  ;;  %p7407_p8 = por %p60_p5, %p59_p3 }
  0x12   : > { %p7411_p9 = por %p199_p6, %p53_p1  ;;  %p205_p10 = scmp.eq.s32.totalorder %s4977_s28, 1 }
  0x13   : > { %s8962_s9 = scalar_select %p7407_p8, 1, 0 }
  0x14   : > { %s8963_s10 = scalar_select %p7411_p9, 1, 0 }
  0x15   : > { %s7416_s11 = scalar_select %p44_p7, %s7301_s23, %s46_s30  }
  0x16   : > { %p7418_p11 = por %p205_p10, %p59_p3  ;;  %p6324_p13 = scmp.lt.s32.totalorder %s7313_s26, 2 }
  0x17   : > { %s7425_s13 = sand.u32 1, %s7301_s23   ;;  %s5049_s15 = sshll.u32 %s7309_s25, 11 }
  0x18   : > { %s8964_s12 = scalar_select %p7418_p11, 1, 0 }
  0x19   : > { %s8955_s14 = sshll.u32 %s7425_s13, 6  ;;  %s8965_s0 = sld [smem:[#allocation14_spill]] }
  0x1a   : > { %s241_s19 = scalar_lea.vmem [#allocation4], %s8955_s14  ;;  %p7442_p0 = pnand %p6324_p13, %p7401_p4 }
  0x1b   : > { %s251_s20 = sshll.u32 %s241_s19, 4  ;;  %s238_s28 = scalar_lea.sflag [#allocation5], %s7425_s13  ;;  %s7438_s20 = int_to_ptr.vmem [resolvable:$true] %s251_s20 }
  0x1c   : > { %p7168_p5 = pneg %p7442_p0 }
  0x1f   : > { %s7434_s18 = scalar_lea.hbm %s8965_s0, %s5049_s15  ;;  %s7171_s7 = scalar_lea.hbm %s8965_s0, 4096 }
  0x20   : > { %s7166_s30 = scalar_lea.hbm %s7434_s18, 1024  ;;  %p7172_p4 = scmp.lt.u32.totalorder %s7434_s18, %s8965_s0 }
  0x21   : > { %p7167_p3 = scmp.ne.s32.totalorder %s7434_s18, %s7166_s30  ;;  %p7173_p10 = scmp.lt.u32.totalorder %s7171_s7, %s7166_s30 }
  0x22   : > { %p7175_p12 = scmp.lt.u32.totalorder %s7166_s30, %s7434_s18 }
  0x23   : > { %p7169_p6 = pnand %p7168_p5, %p7167_p3  ;;  %p7174_p13 = por %p7173_p10, %p7172_p4 }
  0x25   : > { %p7170_p7 = pneg %p7169_p6  ;;  %p7176_p1 = por %p7175_p12, %p7174_p13 }
  0x27   : > { %p7177_p2 = pnand %p7176_p1, %p7170_p7 }
  0x29   : > { %7180 = shalt.err (!%p7177_p2)
}
  0x2a   : > { %s7181_s14 = scalar_lea.vmem %s7438_s20, 1024  ;;  %s7315_s8 = smov [#allocation4]  }
  0x2b   : > { %p7182_p3 = scmp.ne.s32.totalorder %s7438_s20, %s7181_s14  ;;  %s7186_s16 = sshll.u32 %s7315_s8, 4  ;;  %s7187_s16 = int_to_ptr.vmem [resolvable:$false] %s7186_s16 }
  0x2c   : > { %s7188_s17 = scalar_lea.vmem %s7187_s16, 2048  ;;  %p7189_p9 = scmp.lt.s32.totalorder %s7438_s20, %s7187_s16 }
  0x2d   : > { %p7184_p6 = pnand %p7182_p3, %p7168_p5  ;;  %p7190_p4 = scmp.lt.s32.totalorder %s7188_s17, %s7181_s14 }
  0x2f   : > { %p7185_p11 = pneg %p7184_p6  ;;  %p7191_p10 = por %p7190_p4, %p7189_p9 }
  0x31   : > { %p7192_p12 = pnand %p7191_p10, %p7185_p11 }
  0x33   : > { %7195 = shalt.err (!%p7192_p12)
}
  0x34   : > { %6316 = dma.hbm_to_vmem [thread:$0]  (!%p7442_p0), %s7434_s18, 1024, %s7438_s20, %s238_s28  }
  0x35   : > { %p8967_p1 = scmp.lt.s32.totalorder %s7313_s26, 3  ;;  %p8968_p2 = scmp.ge.s32.totalorder %s7313_s26, 1 }
  0x36   : > { %s4907_s19 = scalar_lea.hbm %s8949_s1, %s5049_s15  ;;  %s8970_s8 = sshll.u32 %s7425_s13, 6 }
  0x37   : > { %p7478_p7 = pnand %p8968_p2, %p8967_p1  ;;  %s262_s16 = scalar_lea.vmem [#allocation7], %s8970_s8 }
  0x38   : > { %s273_s17 = sshll.u32 %s262_s16, 4  ;;  %s7489_s0 = scalar_lea.hbm %s4907_s19, 1024  ;;  %s274_s17 = int_to_ptr.vmem [resolvable:$true] %s273_s17 }
  0x39   : > { %s8969_s30 = scalar_select %p7478_p7, 1, 0 }
  0x3a   : > { %s259_s18 = scalar_lea.sflag [#allocation8], %s7425_s13  ;;  %s7226_s20 = scalar_lea.hbm %s4907_s19, 2048 }
  0x3b   : > { %p7197_p9 = scmp.ne.s32.totalorder %s7489_s0, %s7226_s20  ;;  %s7201_s15 = scalar_lea.hbm %s8949_s1, 4096 }
  0x3c   : > { %p7202_p3 = scmp.lt.u32.totalorder %s7489_s0, %s8949_s1  ;;  %p7203_p6 = scmp.lt.u32.totalorder %s7201_s15, %s7226_s20 }
  0x3d   : > { %p7199_p11 = pnand %p7197_p9, %p7168_p5  ;;  %p7205_p10 = scmp.lt.u32.totalorder %s7226_s20, %s7489_s0 }
  0x3e   : > { %p7204_p4 = por %p7203_p6, %p7202_p3 }
  0x3f   : > { %p7200_p13 = pneg %p7199_p11 }
  0x40   : > { %p7206_p12 = por %p7205_p10, %p7204_p4 }
  0x42   : > { %p7207_p1 = pnand %p7206_p12, %p7200_p13 }
  0x44   : > { %7210 = shalt.err (!%p7207_p1)
}
  0x45   : > { %s7211_s13 = scalar_lea.vmem %s274_s17, 1024  ;;  %s7316_s19 = smov [#allocation7]  }
  0x46   : > { %p7212_p2 = scmp.ne.s32.totalorder %s274_s17, %s7211_s13  ;;  %s7216_s29 = sshll.u32 %s7316_s19, 4  ;;  %s7217_s29 = int_to_ptr.vmem [resolvable:$false] %s7216_s29 }
  0x47   : > { %s7218_s8 = scalar_lea.vmem %s7217_s29, 2048  ;;  %p7219_p8 = scmp.lt.s32.totalorder %s274_s17, %s7217_s29 }
  0x48   : > { %p7214_p9 = pnand %p7212_p2, %p7168_p5  ;;  %p7220_p7 = scmp.lt.s32.totalorder %s7218_s8, %s7211_s13 }
  0x4a   : > { %p7215_p11 = pneg %p7214_p9  ;;  %p7221_p3 = por %p7220_p7, %p7219_p8 }
  0x4c   : > { %p7222_p6 = pnand %p7221_p3, %p7215_p11 }
  0x4e   : > { %7225 = shalt.err (!%p7222_p6)
}
  0x4f   : > { %6319 = dma.hbm_to_vmem [thread:$0]  (!%p7442_p0), %s7489_s0, 1024, %s274_s17, %s259_s18  }
  0x50   : > { %p8971_p13 = scmp.ne.s32.totalorder %s8969_s30, 0 }
  0x51   : > { %s7513_s16 = sand.u32 (!%p8971_p13), 1, %s7297_s22   ;;  %p8972_p8 = scmp.ne.s32.totalorder (!%p8971_p13), %s8962_s9, 0 }
  0x52   : > { %282 = sbr.rel (%p8971_p13) target bundleno = 1050 (0x41a), region = 44  ;;  %s4987_s20 = sshll.u32 (!%p8971_p13), %s7513_s16, 6 }
  0x53   : > { %s285_s28 = scalar_lea.sflag (!%p8971_p13), [#allocation5], %s7513_s16  ;;  %s7517_s15 = scalar_lea.vmem (!%p8971_p13), [#allocation4], %s4987_s20 }
  0x59   : > { %7280 = dma.done.wait (%p8972_p8), %s285_s28, 1024  }
  0x5a   : > { %7282 = vsyncadd (%p8972_p8), %s285_s28, 4294966272  ;;  %s294_s0 = scalar_lea.sflag [#allocation8], %s7513_s16  ;;  %s7524_s27 = scalar_lea.vmem [#allocation7], %s4987_s20 }
  0x5b   : > { %7284 = dma.done.wait (%p8972_p8), %s294_s0, 1024  }
  0x5c   : > { %7286 = vsyncadd (%p8972_p8), %s294_s0, 4294966272  ;;  %v336_v0 = vld [vmem:[%s7517_s15 + $0x8] sm:$0xff]  ;;  %s7317_s30 = smov 126   ;;  %v335_v1 = vld [vmem:[%s7517_s15] sm:$0xff]  ;;  %v7318_v8 = vmov 0.0|0.0   ;;  %s7319_s9 = smov 127  }
  0x5d   : > { %344 = vst [vmem:[#allocation2 + $0x8] sm:$0xff] %v336_v0  ;;  %426 = vrot.lane.b32.xlu1 %v336_v0, %s7317_s30  ;;  %v7534_v2 = vld [vmem:[%s7517_s15 + $0x10] sm:$0xff]  ;;  %v7537_v3 = vld [vmem:[%s7517_s15 + $0x18] sm:$0xff]  ;;  %343 = vst [vmem:[#allocation2] sm:$0xff] %v335_v1  ;;  %v383_v4 = vcombine.low %v335_v1, %v335_v1  ;;  %v391_v5 = vcombine.high %v335_v1, %v335_v1  ;;  %5955 = vmatprep.subr.bf16.mxu0 %v7318_v8  ;;  %vm7320_vm0 = vmmov 0   ;;  %v7321_v21 = vmov 0.0  }
  0x5e   : > { %345 = vst [vmem:[#allocation2 + $0x10] sm:$0xff] %v7534_v2  ;;  %346 = vst [vmem:[#allocation2 + $0x18] sm:$0xff] %v7537_v3  ;;  %v7542_v6 = vld [vmem:[%s7517_s15 + $0x20] sm:$0xff]  ;;  %v7545_v7 = vld [vmem:[%s7517_s15 + $0x28] sm:$0xff]  ;;  %5961 = vmatprep.subr.bf16.mxu1 %v7318_v8  ;;  %v418_v12 = vcombine.low %v336_v0, %v336_v0  ;;  %v688_v19 = vcombine.high %v336_v0, %v336_v0  ;;  %5382 = vmatprep.mubr.msk.f32.mxu0 %vm7320_vm0, %v7321_v21  ;;  %v7322_v60 = vmov 0   ;;  %vm388_vm1 = vcmask 1039360  }
  0x5f   : > { %v7549_v9 = vld [vmem:[%s7517_s15 + $0x30] sm:$0xff]  ;;  %347 = vst [vmem:[#allocation2 + $0x20] sm:$0xff] %v7542_v6  ;;  %348 = vst [vmem:[#allocation2 + $0x28] sm:$0xff] %v7545_v7  ;;  %v6381_v10 = vpack.i.bf16 %v335_v1, %v383_v4  ;;  %v6386_v11 = vpack.i.bf16 %v391_v5, %v335_v1  ;;  %5395 = vmatprep.mubr.msk.f32.mxu1 %vm7320_vm0, %v7321_v21  ;;  %v714_v27 = vcombine.low %v7534_v2, %v7534_v2  ;;  %v7574_v28 = vld [vmem:[%s7517_s15 + $0x38] sm:$0xff]  ;;  %vm396_vm2 = vcmask 1031168   ;;  %p8979_p5 = scmp.ne.s32.totalorder %s8963_s10, 0 }
  0x60   : > { %349 = vst [vmem:[#allocation2 + $0x30] sm:$0xff] %v7549_v9  ;;  %v6401_v16 = vpack.i.bf16 %v336_v0, %v418_v12  ;;  %v6421_v20 = vpack.i.bf16 %v688_v19, %v336_v0  ;;  %350 = vst [vmem:[#allocation2 + $0x38] sm:$0xff] %v7574_v28  ;;  %v842_v30 = vcombine.high %v7534_v2, %v7534_v2  ;;  %v7599_v38 = vld [vmem:[%s7524_s27] sm:$0xff]  ;;  %v7624_v48 = vld [vmem:[%s7524_s27 + $0x8] sm:$0xff]  ;;  %6806 = vset.pattern.permute.xlu1 %v7322_v60  ;;  %vm431_vm3 = vcmask 1043456   ;;  %s7324_s19 = smov [#allocation9]  }
  0x61   : > { %6382 = vrot.lane.b32.xlu0 %v6381_v10, %s7319_s9  ;;  %v6451_v29 = vpack.i.bf16 %v7534_v2, %v714_v27  ;;  %v1000_v37 = vcombine.low %v7537_v3, %v7537_v3  ;;  %359 = vst [vmem:[#allocation2 + $0x40] sm:$0xff] %v7599_v38  ;;  %v1007_v40 = vcombine.high %v7537_v3, %v7537_v3  ;;  %360 = vst [vmem:[#allocation2 + $0x48] sm:$0xff] %v7624_v48  ;;  %vm441_vm4 = vcmask 293888   ;;  %s7231_s29 = sshll.u32 %s7324_s19, 4  ;;  %s7232_s29 = int_to_ptr.vmem [resolvable:$false] %s7231_s29 }
  0x62   : > { %v6466_v32 = vpack.i.bf16 %v842_v30, %v7534_v2  ;;  %v1286_v47 = vcombine.low %v7542_v6, %v7542_v6  ;;  %v1293_v50 = vcombine.high %v7542_v6, %v7542_v6  ;;  %v1572_v57 = vcombine.low %v7545_v7, %v7545_v7  ;;  %7102 = vset.pattern.permute.xlu0 %v7322_v60  ;;  %s7233_s8 = scalar_lea.vmem %s7232_s29, 4096 }
  0x63   : > { %v6501_v39 = vpack.i.bf16 %v7537_v3, %v1000_v37  ;;  %v6516_v42 = vpack.i.bf16 %v1007_v40, %v7537_v3  ;;  %v1579_v4 = vcombine.high %v7545_v7, %v7545_v7  ;;  %vm7323_vm8 = vmmov 1  }
  0x64   : > { %v379_v13 = vld [vmem:[#allocation2 + $0x4] sm:$0xff]  ;;  %v6551_v49 = vpack.i.bf16 %v7542_v6, %v1286_v47  ;;  %v6566_v52 = vpack.i.bf16 %v1293_v50, %v7542_v6  ;;  %v7651_v58 = vpack.i.bf16 %v7545_v7, %v1572_v57  ;;  %v376_v5 = vld [vmem:[#allocation2] sm:$0xf]  ;;  %vm3146_vm11 = vcmask 588800  }
  0x65   : > { %v403_v14 = vcombine.high %v379_v13, %v379_v13  ;;  %6387 = vrot.lane.b32.xlu0 %v6386_v11, %s7317_s30  ;;  %v410_v15 = vcombine.low %v379_v13, %v379_v13  ;;  %v537_v22 = vld [vmem:[#allocation2 + $0xc] sm:$0xff]  ;;  %v822_v31 = vld [vmem:[#allocation2 + $0x14] sm:$0xff]  ;;  %v7125_v1 = vld [vmem:[#allocation2 + $0x4] ss:$0 sps:$4 sm:$0xff]  }
  0x66   : > { %v572_v23 = vcombine.low %v537_v22, %v537_v22  ;;  %v699_v24 = vcombine.high %v537_v22, %v537_v22  ;;  %v857_v33 = vcombine.low %v822_v31, %v822_v31  ;;  %v985_v35 = vcombine.high %v822_v31, %v822_v31  ;;  %v1108_v41 = vld [vmem:[#allocation2 + $0x1c] sm:$0xff]  ;;  %v1394_v51 = vld [vmem:[#allocation2 + $0x24] sm:$0xff] }
  0x67   : > { %v6391_v17 = vpack.i.bf16 %v403_v14, %v379_v13  ;;  %v6396_v18 = vpack.i.bf16 %v379_v13, %v410_v15  ;;  %v1143_v43 = vcombine.low %v1108_v41, %v1108_v41  ;;  %v1271_v45 = vcombine.high %v1108_v41, %v1108_v41 }
  0x68   : > { %v6436_v25 = vpack.i.bf16 %v537_v22, %v572_v23  ;;  %v6441_v26 = vpack.i.bf16 %v699_v24, %v537_v22  ;;  %v6476_v34 = vpack.i.bf16 %v822_v31, %v857_v33  ;;  %v6491_v36 = vpack.i.bf16 %v985_v35, %v822_v31 }
  0x69   : > { %6392 = vrot.lane.b32.xlu1 %v6391_v17, %s7319_s9  ;;  %6402 = vrot.lane.b32.xlu0 %v6401_v16, %s7319_s9  ;;  %v6526_v44 = vpack.i.bf16 %v1108_v41, %v1143_v43  ;;  %v6541_v46 = vpack.i.bf16 %v1271_v45, %v1108_v41  ;;  %v1429_v53 = vcombine.low %v1394_v51, %v1394_v51 }
  0x6a   : > { %v1557_v55 = vcombine.high %v1394_v51, %v1394_v51 }
  0x6b   : > { %v6576_v54 = vpack.i.bf16 %v1394_v51, %v1429_v53 }
  0x6c   : > { %v6591_v56 = vpack.i.bf16 %v1557_v55, %v1394_v51 }
  0x6d   : > { %6397 = vrot.lane.b32.xlu1 %v6396_v18, %s7317_s30  ;;  %6412 = vrot.lane.b32.xlu0 %v6391_v17, %s7317_s30 }
  0x71   : > { %6407 = vrot.lane.b32.xlu1 %v6396_v18, %s7319_s9  ;;  %6422 = vrot.lane.b32.xlu0 %v6421_v20, %s7317_s30 }
  0x75   : > { %6417 = vrot.lane.b32.xlu1 %v6401_v16, %s7319_s9  ;;  %428 = vrot.lane.b32.xlu0 %v688_v19, %s7317_s30 }
  0x79   : > { %6427 = vrot.lane.b32.xlu1 %v6421_v20, %s7319_s9  ;;  %6432 = vrot.lane.b32.xlu0 %v6401_v16, %s7317_s30  ;;  %v7669_v20 = vld [vmem:[#allocation2 + $0x2c] sm:$0xff] }
  0x7d   : > { %6437 = vrot.lane.b32.xlu1 %v6436_v25, %s7319_s9  ;;  %6442 = vrot.lane.b32.xlu0 %v6441_v26, %s7319_s9 }
  0x81   : > { %6447 = vrot.lane.b32.xlu1 %v6436_v25, %s7317_s30  ;;  %6452 = vrot.lane.b32.xlu0 %v6451_v29, %s7319_s9 }
  0x85   : > { %6457 = vrot.lane.b32.xlu1 %v6436_v25, %s7319_s9  ;;  %6462 = vrot.lane.b32.xlu0 %v6441_v26, %s7317_s30 }
  0x89   : > { %580 = vrot.lane.b32.xlu1 %v537_v22, %s7317_s30  ;;  %582 = vrot.lane.b32.xlu0 %v699_v24, %s7317_s30 }
  0x8d   : > { %722 = vrot.lane.b32.xlu1 %v7534_v2, %s7317_s30  ;;  %724 = vrot.lane.b32.xlu0 %v842_v30, %s7317_s30  ;;  %v380_v30 = vld [vmem:[#allocation2 + $0x8] sm:$0xf] }
  0x91   : > { %6467 = vrot.lane.b32.xlu1 %v6466_v32, %s7319_s9  ;;  %6472 = vrot.lane.b32.xlu0 %v6451_v29, %s7317_s30 }
  0x95   : > { %6477 = vrot.lane.b32.xlu1 %v6476_v34, %s7319_s9  ;;  %6482 = vrot.lane.b32.xlu0 %v6451_v29, %s7319_s9 }
  0x99   : > { %6487 = vrot.lane.b32.xlu1 %v6466_v32, %s7317_s30  ;;  %6492 = vrot.lane.b32.xlu0 %v6491_v36, %s7319_s9  ;;  %v1715_v32 = vcombine.low %v7669_v20, %v7669_v20 }
  0x9b   : > { %v7685_v47 = vpack.i.bf16 %v7669_v20, %v1715_v32 }
  0x9d   : > { %6497 = vrot.lane.b32.xlu1 %v6476_v34, %s7317_s30  ;;  %6502 = vrot.lane.b32.xlu0 %v6501_v39, %s7319_s9 }
  0xa1   : > { %865 = vrot.lane.b32.xlu1 %v822_v31, %s7317_s30  ;;  %867 = vrot.lane.b32.xlu0 %v985_v35, %s7317_s30  ;;  %v6616_v31 = vpack.i.bf16 %v1579_v4, %v7545_v7 }
  0xa5   : > { %1008 = vrot.lane.b32.xlu1 %v7537_v3, %s7317_s30  ;;  %1010 = vrot.lane.b32.xlu0 %v1007_v40, %s7317_s30 }
  0xa9   : > { %6507 = vrot.lane.b32.xlu1 %v6476_v34, %s7319_s9  ;;  %6512 = vrot.lane.b32.xlu0 %v6491_v36, %s7317_s30 }
  0xad   : > { %6517 = vrot.lane.b32.xlu1 %v6516_v42, %s7319_s9  ;;  %6522 = vrot.lane.b32.xlu0 %v6501_v39, %s7317_s30 }
  0xb1   : > { %6527 = vrot.lane.b32.xlu1 %v6526_v44, %s7319_s9  ;;  %6532 = vrot.lane.b32.xlu0 %v6501_v39, %s7319_s9 }
  0xb5   : > { %6537 = vrot.lane.b32.xlu1 %v6516_v42, %s7317_s30  ;;  %6542 = vrot.lane.b32.xlu0 %v6541_v46, %s7319_s9 }
  0xb9   : > { %6547 = vrot.lane.b32.xlu1 %v6526_v44, %s7317_s30  ;;  %6552 = vrot.lane.b32.xlu0 %v6551_v49, %s7319_s9 }
  0xbd   : > { %1151 = vrot.lane.b32.xlu1 %v1108_v41, %s7317_s30  ;;  %1153 = vrot.lane.b32.xlu0 %v1271_v45, %s7317_s30  ;;  %v7127_v41 = vld [vmem:[#allocation2 + $0x8] ss:$0 sps:$4 sm:$0xff]   ;;  %v532_v45 = vld [vmem:[#allocation2 + $0x4] sm:$0xf] }
  0xc1   : > { %1294 = vrot.lane.b32.xlu1 %v7542_v6, %s7317_s30  ;;  %1296 = vrot.lane.b32.xlu0 %v1293_v50, %s7317_s30 }
  0xc5   : > { %6557 = vrot.lane.b32.xlu1 %v6526_v44, %s7319_s9  ;;  %6562 = vrot.lane.b32.xlu0 %v6541_v46, %s7317_s30 }
  0xc9   : > { %6567 = vrot.lane.b32.xlu1 %v6566_v52, %s7319_s9  ;;  %6572 = vrot.lane.b32.xlu0 %v6551_v49, %s7317_s30 }
  0xcd   : > { %6577 = vrot.lane.b32.xlu1 %v6576_v54, %s7319_s9  ;;  %6582 = vrot.lane.b32.xlu0 %v6551_v49, %s7319_s9  ;;  %v7691_v49 = vcombine.high %v7669_v20, %v7669_v20 }
  0xcf   : > { %v7654_v61 = vpop.permute.xlu1 %426 }
  0xd1   : > { %6587 = vrot.lane.b32.xlu1 %v6566_v52, %s7317_s30  ;;  %6592 = vrot.lane.b32.xlu0 %v6591_v56, %s7319_s9 }
  0xd3   : > { %v6383_v59 = vpop.permute.xlu0 %6382 }
  0xd4   : > { %v6385_v62 = vunpack.i.h.bf16 %v6383_v59  ;;  %v6384_v63 = vunpack.i.l.bf16 %v6383_v59 }
  0xd5   : > { %6597 = vrot.lane.b32.xlu1 %v6576_v54, %s7317_s30  ;;  %6602 = vrot.lane.b32.xlu0 %v7651_v58, %s7319_s9 }
  0xd6   : > { %v389_v6 = vsel %vm388_vm1, %v6384_v63, %v6385_v62  ;;  %v7703_v63 = vld [vmem:[%s8950_s2] sm:$0xff] }
  0xd7   : > { %v6388_v0 = vpop.permute.xlu0 %6387  ;;  %v432_v16 = vsel %vm431_vm3, %v376_v5, %v389_v6 }
  0xd8   : > { %v6390_v2 = vunpack.i.h.bf16 %v6388_v0  ;;  %v6389_v3 = vunpack.i.l.bf16 %v6388_v0  ;;  %v674_v0 = vld [vmem:[#allocation2 + $0x8] sm:$0xf] }
  0xd9   : > { %1437 = vrot.lane.b32.xlu1 %v1394_v51, %s7317_s30  ;;  %1439 = vrot.lane.b32.xlu0 %v1557_v55, %s7317_s30 }
  0xda   : > { %v397_v10 = vsel %vm396_vm2, %v6389_v3, %v6390_v2  ;;  %v1858_v2 = vcombine.low %v7549_v9, %v7549_v9 }
  0xdb   : > { %v6393_v11 = vpop.permute.xlu1 %6392  ;;  %v6403_v12 = vpop.permute.xlu0 %6402  ;;  %v433_v13 = vsel %vm431_vm3, %v397_v10, %v7125_v1  ;;  %v7711_v1 = vpack.i.bf16 %v7691_v49, %v7669_v20 }
  0xdc   : > { %v6405_v14 = vunpack.i.h.bf16 %v6403_v12  ;;  %v6404_v15 = vunpack.i.l.bf16 %v6403_v12  ;;  %v5956_v17 = vpack.c.bf16 %v433_v13, %v432_v16  ;;  %v6395_v18 = vunpack.i.h.bf16 %v6393_v11 }
  0xdd   : > { %1580 = vrot.lane.b32.xlu1 %v7545_v7, %s7317_s30  ;;  %1582 = vrot.lane.b32.xlu0 %v1579_v4, %s7317_s30  ;;  %v6394_v19 = vunpack.i.l.bf16 %v6393_v11 }
  0xde   : > { %5957 = vmatpush3.bf16.msra.mxu0 %v5956_v17  ;;  %v423_v24 = vsel %vm388_vm1, %v6404_v15, %v6405_v14  ;;  %v7729_v14 = vpack.i.bf16 %v7549_v9, %v1858_v2 }
  0xdf   : > { %v6398_v22 = vpop.permute.xlu1 %6397  ;;  %v6413_v23 = vpop.permute.xlu0 %6412  ;;  %5958 = vmatprep.subr.bf16.mxu0 %v7318_v8  ;;  %v408_v33 = vsel %vm388_vm1, %v6394_v19, %v6395_v18  ;;  %v435_v37 = vsel %vm431_vm3, %v380_v30, %v423_v24  ;;  %v536_v19 = vld [vmem:[#allocation2 + $0xc] sm:$0xf] }
  0xe0   : > { %v6400_v25 = vunpack.i.h.bf16 %v6398_v22  ;;  %v6399_v26 = vunpack.i.l.bf16 %v6398_v22  ;;  %v6415_v27 = vunpack.i.h.bf16 %v6413_v23  ;;  %v6414_v29 = vunpack.i.l.bf16 %v6413_v23 }
  0xe1   : > { %6607 = vrot.lane.b32.xlu1 %v6576_v54, %s7319_s9  ;;  %6612 = vrot.lane.b32.xlu0 %v6591_v56, %s7317_s30  ;;  %v7128_v56 = vld [vmem:[#allocation2 + $0xc] ss:$0 sps:$4 sm:$0xff]  }
  0xe2   : > { %v415_v34 = vsel %vm396_vm2, %v6399_v26, %v6400_v25  ;;  %v551_v40 = vsel %vm396_vm2, %v6414_v29, %v6415_v27 }
  0xe3   : > { %v6408_v35 = vpop.permute.xlu1 %6407  ;;  %v434_v36 = vsel %vm431_vm3, %v408_v33, %v415_v34  ;;  %v6423_v39 = vpop.permute.xlu0 %6422  ;;  %v586_v54 = vsel %vm431_vm3, %v551_v40, %v7127_v41  ;;  %v678_v41 = vld [vmem:[#allocation2 + $0x10] sm:$0xf] }
  0xe4   : > { %v6410_v42 = vunpack.i.h.bf16 %v6408_v35  ;;  %v6409_v7 = vunpack.i.l.bf16 %v6408_v35  ;;  %v5959_v43 = vpack.c.bf16 %v435_v37, %v434_v36  ;;  %v6425_v44 = vunpack.i.h.bf16 %v6423_v39 }
  0xe5   : > { %6617 = vrot.lane.b32.xlu1 %v6616_v31, %s7319_s9  ;;  %v6424_v46 = vunpack.i.l.bf16 %v6423_v39  ;;  %6622 = vrot.lane.b32.xlu0 %v7651_v58, %s7317_s30  ;;  %v1865_v37 = vcombine.high %v7549_v9, %v7549_v9 }
  0xe6   : > { %5960 = vmatpush3.bf16.msra.mxu0 %v5959_v43  ;;  %v544_v50 = vsel %vm388_vm1, %v6409_v7, %v6410_v42 }
  0xe7   : > { %v6418_v51 = vpop.permute.xlu1 %6417  ;;  %v693_v52 = vsel %vm396_vm2, %v6424_v46, %v6425_v44  ;;  %v585_v53 = vsel %vm431_vm3, %v532_v45, %v544_v50  ;;  %v429_v55 = vpop.permute.xlu0 %428  ;;  %5380 = vmatprep.subr.mxu0 %v7321_v21 }
  0xe8   : > { %v6420_v57 = vunpack.i.h.bf16 %v6418_v51  ;;  %v6419_v59 = vunpack.i.l.bf16 %v6418_v51  ;;  %v5962_v60 = vpack.c.bf16 %v586_v54, %v585_v53  ;;  %v430_v62 = vsel %vm396_vm2, %v7654_v61, %v429_v55  ;;  %v817_v51 = vld [vmem:[#allocation2 + $0xc] sm:$0xf] }
  0xe9   : > { %6627 = vrot.lane.b32.xlu1 %v7685_v47, %s7319_s9  ;;  %6632 = vrot.lane.b32.xlu0 %v7651_v58, %s7319_s9  ;;  %v728_v5 = vsel %vm431_vm3, %v693_v52, %v7128_v56  ;;  %v7758_v56 = vld [vmem:[#allocation2 + $0x34] sm:$0xff] }
  0xea   : > { %v686_v61 = vsel %vm388_vm1, %v6419_v59, %v6420_v57  ;;  %5963 = vmatpush3.bf16.msra.mxu1 %v5962_v60  ;;  %5381 = vmatpush3.msk.msra.mxu0 %vm431_vm3, %v430_v62 }
  0xeb   : > { %v6428_v3 = vpop.permute.xlu1 %6427  ;;  %5967 = vmatprep.subr.bf16.mxu0 %v7318_v8  ;;  %v6433_v4 = vpop.permute.xlu0 %6432  ;;  %5383 = vmatmul.mubr.msk.f32.vlgmr.msra.gmra.mrb[0].mxu0 %vm441_vm4, %v7703_v63  ;;  %v727_v58 = vsel %vm431_vm3, %v674_v0, %v686_v61  ;;  %v6666_v61 = vpack.i.bf16 %v1865_v37, %v7549_v9 }
  0xec   : > { %v6430_v6 = vunpack.i.h.bf16 %v6428_v3  ;;  %v6429_v10 = vunpack.i.l.bf16 %v6428_v3  ;;  %v6435_v11 = vunpack.i.h.bf16 %v6433_v4  ;;  %v6434_v12 = vunpack.i.l.bf16 %v6433_v4  ;;  %5964 = vmatprep.subr.bf16.mxu1 %v7318_v8  ;;  %5408 = vmatprep.mubr.msk.f32.mxu0 %vm7320_vm0, %v7321_v21 }
  0xed   : > { %6637 = vrot.lane.b32.xlu1 %v6616_v31, %s7317_s30  ;;  %v5968_v13 = vpack.c.bf16 %v728_v5, %v727_v58  ;;  %6642 = vrot.lane.b32.xlu0 %v7711_v1, %s7319_s9  ;;  %v2001_v3 = vcombine.low %v7758_v56, %v7758_v56 }
  0xee   : > { %v562_v22 = vsel %vm388_vm1, %v6429_v10, %v6430_v6  ;;  %v569_v23 = vsel %vm396_vm2, %v6434_v12, %v6435_v11 }
  0xef   : > { %v6438_v15 = vpop.permute.xlu1 %6437  ;;  %5969 = vmatpush3.bf16.msra.mxu0 %v5968_v13  ;;  %v6443_v16 = vpop.permute.xlu0 %6442  ;;  %v587_v29 = vsel %vm431_vm3, %v562_v22, %v569_v23 }
  0xf0   : > { %v6440_v17 = vunpack.i.h.bf16 %v6438_v15  ;;  %v6439_v18 = vunpack.i.l.bf16 %v6438_v15  ;;  %5970 = vmatprep.subr.bf16.mxu0 %v7318_v8  ;;  %v6445_v24 = vunpack.i.h.bf16 %v6443_v16  ;;  %v6444_v25 = vunpack.i.l.bf16 %v6443_v16 }
  0xf1   : > { %6647 = vrot.lane.b32.xlu1 %v7685_v47, %s7317_s30  ;;  %6652 = vrot.lane.b32.xlu0 %v7729_v14, %s7319_s9  ;;  %v2144_v16 = vcombine.low %v7574_v28, %v7574_v28 }
  0xf2   : > { %v577_v26 = vsel %vm388_vm1, %v6439_v18, %v6440_v17  ;;  %v704_v40 = vsel %vm388_vm1, %v6444_v25, %v6445_v24 }
  0xf3   : > { %v6448_v27 = vpop.permute.xlu1 %6447  ;;  %v588_v30 = vsel %vm431_vm3, %v536_v19, %v577_v26  ;;  %v6453_v31 = vpop.permute.xlu0 %6452 }
  0xf4   : > { %v6450_v32 = vunpack.i.h.bf16 %v6448_v27  ;;  %v6449_v33 = vunpack.i.l.bf16 %v6448_v27  ;;  %v5965_v34 = vpack.c.bf16 %v588_v30, %v587_v29  ;;  %v6455_v35 = vunpack.i.h.bf16 %v6453_v31  ;;  %v821_v27 = vld [vmem:[#allocation2 + $0x14] sm:$0xf] }
  0xf5   : > { %1723 = vrot.lane.b32.xlu1 %v7669_v20, %s7317_s30  ;;  %v6454_v36 = vunpack.i.l.bf16 %v6453_v31  ;;  %1725 = vrot.lane.b32.xlu0 %v7691_v49, %s7317_s30  ;;  %v7132_v20 = vld [vmem:[#allocation2 + $0x10] ss:$0 sps:$4 sm:$0xff]  }
  0xf6   : > { %v711_v39 = vsel %vm396_vm2, %v6449_v33, %v6450_v32  ;;  %5966 = vmatpush3.bf16.msra.mxu1 %v5965_v34  ;;  %v7136_v34 = vld [vmem:[#allocation2 + $0x14] ss:$0 sps:$4 sm:$0xff]  }
  0xf7   : > { %v6458_v42 = vpop.permute.xlu1 %6457  ;;  %v719_v7 = vsel %vm388_vm1, %v6454_v36, %v6455_v35  ;;  %v6463_v43 = vpop.permute.xlu0 %6462  ;;  %v729_v44 = vsel %vm431_vm3, %v704_v40, %v711_v39  ;;  %5393 = vmatprep.subr.mxu1 %v7321_v21  ;;  %v960_v40 = vld [vmem:[#allocation2 + $0x10] sm:$0xf] }
  0xf8   : > { %v6460_v45 = vunpack.i.h.bf16 %v6458_v42  ;;  %v6459_v46 = vunpack.i.l.bf16 %v6458_v42  ;;  %v6465_v49 = vunpack.i.h.bf16 %v6463_v43  ;;  %v6464_v50 = vunpack.i.l.bf16 %v6463_v43 }
  0xf9   : > { %1866 = vrot.lane.b32.xlu1 %v7549_v9, %s7317_s30  ;;  %1868 = vrot.lane.b32.xlu0 %v1865_v37, %s7317_s30  ;;  %v730_v52 = vsel %vm431_vm3, %v678_v41, %v719_v7  ;;  %v7780_v9 = vpack.i.bf16 %v7758_v56, %v2001_v3  ;;  %v7838_v3 = vld [vmem:[#allocation2 + $0x3c] sm:$0xff] }
  0xfa   : > { %v829_v53 = vsel %vm388_vm1, %v6459_v46, %v6460_v45  ;;  %v836_v54 = vsel %vm396_vm2, %v6464_v50, %v6465_v49  ;;  %v5971_v55 = vpack.c.bf16 %v730_v52, %v729_v44 }
  0xfb   : > { %v581_v57 = vpop.permute.xlu1 %580  ;;  %v583_v59 = vpop.permute.xlu0 %582  ;;  %v870_v60 = vsel %vm431_vm3, %v817_v51, %v829_v53  ;;  %v871_v62 = vsel %vm431_vm3, %v836_v54, %v7132_v20  ;;  %v2151_v53 = vcombine.high %v7574_v28, %v7574_v28  ;;  %v964_v54 = vld [vmem:[#allocation2 + $0x18] sm:$0xf] }
  0xfc   : > { %5972 = vmatpush3.bf16.msra.mxu0 %v5971_v55  ;;  %v584_v0 = vsel %vm396_vm2, %v581_v57, %v583_v59  ;;  %v5974_v2 = vpack.c.bf16 %v871_v62, %v870_v60 }
  0xfd   : > { %6657 = vrot.lane.b32.xlu1 %v7685_v47, %s7319_s9  ;;  %6662 = vrot.lane.b32.xlu0 %v7711_v1, %s7317_s30  ;;  %v2129_v1 = vcombine.high %v7758_v56, %v7758_v56 }
  0xfe   : > { %5394 = vmatpush3.msk.msra.mxu1 %vm431_vm3, %v584_v0  ;;  %5406 = vmatprep.subr.mxu0 %v7321_v21 }
  0xff   : > { %v723_v4 = vpop.permute.xlu1 %722  ;;  %5396 = vmatmul.mubr.msk.f32.vlgmr.msra.gmra.mrb[0].mxu1 %vm441_vm4, %v7703_v63  ;;  %5973 = vmatprep.subr.bf16.mxu1 %v7318_v8  ;;  %v725_v58 = vpop.permute.xlu0 %724  ;;  %v7798_v15 = vpack.i.bf16 %v2129_v1, %v7758_v56 }
 0x100   : > { %v726_v47 = vsel %vm396_vm2, %v723_v4, %v725_v58  ;;  %5975 = vmatpush3.bf16.msra.mxu1 %v5974_v2  ;;  %5421 = vmatprep.mubr.msk.f32.mxu1 %vm7320_vm0, %v7321_v21 }
 0x101   : > { %6667 = vrot.lane.b32.xlu1 %v6666_v61, %s7319_s9  ;;  %6672 = vrot.lane.b32.xlu0 %v7729_v14, %s7317_s30 }
 0x102   : > { %5407 = vmatpush3.msk.msra.mxu0 %vm431_vm3, %v726_v47  ;;  %5976 = vmatprep.subr.bf16.mxu1 %v7318_v8 }
 0x103   : > { %v6468_v5 = vpop.permute.xlu1 %6467  ;;  %5409 = vmatmul.mubr.msk.f32.vlgmr.msra.gmra.mrb[2].mxu0 %vm441_vm4, %v7703_v63  ;;  %v6473_v6 = vpop.permute.xlu0 %6472  ;;  %5979 = vmatprep.subr.bf16.mxu0 %v7318_v8 }
 0x104   : > { %v6470_v10 = vunpack.i.h.bf16 %v6468_v5  ;;  %v6469_v11 = vunpack.i.l.bf16 %v6468_v5  ;;  %v6475_v12 = vunpack.i.h.bf16 %v6473_v6  ;;  %v6474_v13 = vunpack.i.l.bf16 %v6473_v6  ;;  %5434 = vmatprep.mubr.msk.f32.mxu0 %vm7320_vm0, %v7321_v21 }
 0x105   : > { %6677 = vrot.lane.b32.xlu1 %v7780_v9, %s7319_s9  ;;  %6682 = vrot.lane.b32.xlu0 %v7729_v14, %s7319_s9  ;;  %v7808_v14 = vpack.i.bf16 %v7574_v28, %v2144_v16  ;;  %v2287_v5 = vcombine.low %v7838_v3, %v7838_v3 }
 0x106   : > { %v847_v17 = vsel %vm388_vm1, %v6469_v11, %v6470_v10  ;;  %v854_v19 = vsel %vm396_vm2, %v6474_v13, %v6475_v12  ;;  %v7139_v11 = vld [vmem:[#allocation2 + $0x18] ss:$0 sps:$4 sm:$0xff]  }
 0x107   : > { %v6478_v18 = vpop.permute.xlu1 %6477  ;;  %v6483_v22 = vpop.permute.xlu0 %6482  ;;  %v872_v31 = vsel %vm431_vm3, %v847_v17, %v854_v19  ;;  %v2415_v17 = vcombine.high %v7838_v3, %v7838_v3 }
 0x108   : > { %v6480_v23 = vunpack.i.h.bf16 %v6478_v18  ;;  %v6479_v24 = vunpack.i.l.bf16 %v6478_v18  ;;  %v6485_v25 = vunpack.i.h.bf16 %v6483_v22  ;;  %v6484_v26 = vunpack.i.l.bf16 %v6483_v22 }
 0x109   : > { %6687 = vrot.lane.b32.xlu1 %v6666_v61, %s7317_s30  ;;  %6692 = vrot.lane.b32.xlu0 %v7798_v15, %s7319_s9 }
 0x10a   : > { %v862_v29 = vsel %vm388_vm1, %v6479_v24, %v6480_v23  ;;  %v972_v37 = vsel %vm388_vm1, %v6484_v26, %v6485_v25 }
 0x10b   : > { %v6488_v30 = vpop.permute.xlu1 %6487  ;;  %v873_v32 = vsel %vm431_vm3, %v821_v27, %v862_v29  ;;  %v6493_v33 = vpop.permute.xlu0 %6492  ;;  %v1013_v44 = vsel %vm431_vm3, %v960_v40, %v972_v37 }
 0x10c   : > { %v6490_v35 = vunpack.i.h.bf16 %v6488_v30  ;;  %v6489_v36 = vunpack.i.l.bf16 %v6488_v30  ;;  %v5977_v39 = vpack.c.bf16 %v873_v32, %v872_v31  ;;  %v6495_v42 = vunpack.i.h.bf16 %v6493_v33 }
 0x10d   : > { %6697 = vrot.lane.b32.xlu1 %v7780_v9, %s7317_s30  ;;  %6702 = vrot.lane.b32.xlu0 %v7808_v14, %s7319_s9  ;;  %v6494_v7 = vunpack.i.l.bf16 %v6493_v33  ;;  %v7877_v32 = vpack.i.bf16 %v2415_v17, %v7838_v3  ;;  %v2430_v33 = vcombine.low %v7599_v38, %v7599_v38 }
 0x10e   : > { %v979_v41 = vsel %vm396_vm2, %v6489_v36, %v6490_v35  ;;  %5978 = vmatpush3.bf16.msra.mxu1 %v5977_v39 }
 0x10f   : > { %v6498_v43 = vpop.permute.xlu1 %6497  ;;  %v1014_v20 = vsel %vm431_vm3, %v979_v41, %v7136_v34  ;;  %v6503_v45 = vpop.permute.xlu0 %6502  ;;  %5419 = vmatprep.subr.mxu1 %v7321_v21  ;;  %v990_v57 = vsel %vm388_vm1, %v6494_v7, %v6495_v42  ;;  %v7888_v7 = vpack.i.bf16 %v7599_v38, %v2430_v33 }
 0x110   : > { %v6500_v46 = vunpack.i.h.bf16 %v6498_v43  ;;  %v6499_v49 = vunpack.i.l.bf16 %v6498_v43  ;;  %v5980_v50 = vpack.c.bf16 %v1014_v20, %v1013_v44  ;;  %v6505_v51 = vunpack.i.h.bf16 %v6503_v45 }
 0x111   : > { %2009 = vrot.lane.b32.xlu1 %v7758_v56, %s7317_s30  ;;  %v6504_v52 = vunpack.i.l.bf16 %v6503_v45  ;;  %2011 = vrot.lane.b32.xlu0 %v2129_v1, %s7317_s30  ;;  %v6716_v1 = vpack.i.bf16 %v2151_v53, %v7574_v28 }
 0x112   : > { %v997_v55 = vsel %vm396_vm2, %v6499_v49, %v6500_v46  ;;  %5981 = vmatpush3.bf16.msra.mxu0 %v5980_v50  ;;  %v7142_v49 = vld [vmem:[#allocation2 + $0x1c] ss:$0 sps:$4 sm:$0xff]  }
 0x113   : > { %v866_v59 = vpop.permute.xlu1 %865  ;;  %v1005_v60 = vsel %vm388_vm1, %v6504_v52, %v6505_v51  ;;  %v868_v62 = vpop.permute.xlu0 %867  ;;  %5982 = vmatprep.subr.bf16.mxu0 %v7318_v8  ;;  %v1015_v56 = vsel %vm431_vm3, %v990_v57, %v997_v55 }
 0x114   : > { %v869_v0 = vsel %vm396_vm2, %v866_v59, %v868_v62  ;;  %v1016_v2 = vsel %vm431_vm3, %v964_v54, %v1005_v60  ;;  %v1246_v54 = vld [vmem:[#allocation2 + $0x18] sm:$0xf] }
 0x115   : > { %2152 = vrot.lane.b32.xlu1 %v7574_v28, %s7317_s30  ;;  %2154 = vrot.lane.b32.xlu0 %v2151_v53, %s7317_s30  ;;  %v5983_v61 = vpack.c.bf16 %v1016_v2, %v1015_v56  ;;  %v1103_v28 = vld [vmem:[#allocation2 + $0x14] sm:$0xf] }
 0x116   : > { %5420 = vmatpush3.msk.msra.mxu1 %vm431_vm3, %v869_v0 }
 0x117   : > { %v1009_v4 = vpop.permute.xlu1 %1008  ;;  %5422 = vmatmul.mubr.msk.f32.vlgmr.msra.gmra.mrb[2].mxu1 %vm441_vm4, %v7703_v63  ;;  %5984 = vmatpush3.bf16.msra.mxu0 %v5983_v61  ;;  %v1011_v58 = vpop.permute.xlu0 %1010 }
 0x118   : > { %v1012_v47 = vsel %vm396_vm2, %v1009_v4, %v1011_v58  ;;  %5432 = vmatprep.subr.mxu0 %v7321_v21  ;;  %5985 = vmatprep.subr.bf16.mxu1 %v7318_v8 }
 0x119   : > { %6707 = vrot.lane.b32.xlu1 %v7780_v9, %s7319_s9  ;;  %6712 = vrot.lane.b32.xlu0 %v7798_v15, %s7317_s30  ;;  %v7860_v15 = vpack.i.bf16 %v7838_v3, %v2287_v5  ;;  %v1250_v5 = vld [vmem:[#allocation2 + $0x20] sm:$0xf] }
 0x11a   : > { %5447 = vmatprep.mubr.msk.f32.mxu1 %vm7320_vm0, %v7321_v21 }
 0x11b   : > { %v6508_v6 = vpop.permute.xlu1 %6507  ;;  %5433 = vmatpush3.msk.msra.mxu0 %vm431_vm3, %v1012_v47  ;;  %v6513_v10 = vpop.permute.xlu0 %6512 }
 0x11c   : > { %v6510_v12 = vunpack.i.h.bf16 %v6508_v6  ;;  %v6509_v13 = vunpack.i.l.bf16 %v6508_v6  ;;  %v6515_v16 = vunpack.i.h.bf16 %v6513_v10  ;;  %v6514_v9 = vunpack.i.l.bf16 %v6513_v10  ;;  %5435 = vmatmul.mubr.msk.f32.vlgmr.msra.gmra.mrb[4].mxu0 %vm441_vm4, %v7703_v63  ;;  %5991 = vmatprep.subr.bf16.mxu0 %v7318_v8 }
 0x11d   : > { %6717 = vrot.lane.b32.xlu1 %v6716_v1, %s7319_s9  ;;  %6722 = vrot.lane.b32.xlu0 %v7808_v14, %s7317_s30 }
 0x11e   : > { %v1115_v18 = vsel %vm388_vm1, %v6509_v13, %v6510_v12  ;;  %v1122_v19 = vsel %vm396_vm2, %v6514_v9, %v6515_v16  ;;  %5460 = vmatprep.mubr.msk.f32.mxu0 %vm7320_vm0, %v7321_v21 }
 0x11f   : > { %v6518_v22 = vpop.permute.xlu1 %6517  ;;  %v6523_v23 = vpop.permute.xlu0 %6522  ;;  %v1156_v24 = vsel %vm431_vm3, %v1103_v28, %v1115_v18  ;;  %v1157_v25 = vsel %vm431_vm3, %v1122_v19, %v7139_v11 }
 0x120   : > { %v6520_v26 = vunpack.i.h.bf16 %v6518_v22  ;;  %v6519_v27 = vunpack.i.l.bf16 %v6518_v22  ;;  %v6525_v29 = vunpack.i.h.bf16 %v6523_v23  ;;  %v6524_v30 = vunpack.i.l.bf16 %v6523_v23 }
 0x121   : > { %6727 = vrot.lane.b32.xlu1 %v7860_v15, %s7319_s9  ;;  %6732 = vrot.lane.b32.xlu0 %v7808_v14, %s7319_s9  ;;  %v5986_v31 = vpack.c.bf16 %v1157_v25, %v1156_v24  ;;  %v1107_v14 = vld [vmem:[#allocation2 + $0x1c] sm:$0xf] }
 0x122   : > { %v1133_v34 = vsel %vm388_vm1, %v6519_v27, %v6520_v26  ;;  %v1140_v36 = vsel %vm396_vm2, %v6524_v30, %v6525_v29  ;;  %v7145_v27 = vld [vmem:[#allocation2 + $0x20] ss:$0 sps:$4 sm:$0xff]  }
 0x123   : > { %v6528_v35 = vpop.permute.xlu1 %6527  ;;  %5987 = vmatpush3.bf16.msra.mxu1 %v5986_v31  ;;  %v6533_v37 = vpop.permute.xlu0 %6532  ;;  %v1158_v20 = vsel %vm431_vm3, %v1133_v34, %v1140_v36 }
 0x124   : > { %v6530_v39 = vunpack.i.h.bf16 %v6528_v35  ;;  %v6529_v40 = vunpack.i.l.bf16 %v6528_v35  ;;  %v6535_v41 = vunpack.i.h.bf16 %v6533_v37  ;;  %v6534_v42 = vunpack.i.l.bf16 %v6533_v37  ;;  %5988 = vmatprep.subr.bf16.mxu1 %v7318_v8 }
 0x125   : > { %6737 = vrot.lane.b32.xlu1 %v6716_v1, %s7317_s30  ;;  %6742 = vrot.lane.b32.xlu0 %v7877_v32, %s7319_s9  ;;  %v2437_v1 = vcombine.high %v7599_v38, %v7599_v38 }
 0x126   : > { %v1148_v43 = vsel %vm388_vm1, %v6529_v40, %v6530_v39  ;;  %v1258_v52 = vsel %vm388_vm1, %v6534_v42, %v6535_v41 }
 0x127   : > { %v6538_v44 = vpop.permute.xlu1 %6537  ;;  %v1159_v45 = vsel %vm431_vm3, %v1107_v14, %v1148_v43  ;;  %v6543_v46 = vpop.permute.xlu0 %6542  ;;  %v1299_v62 = vsel %vm431_vm3, %v1246_v54, %v1258_v52  ;;  %v6766_v23 = vpack.i.bf16 %v2437_v1, %v7599_v38 }
 0x128   : > { %v6540_v50 = vunpack.i.h.bf16 %v6538_v44  ;;  %v6539_v51 = vunpack.i.l.bf16 %v6538_v44  ;;  %v5989_v53 = vpack.c.bf16 %v1159_v45, %v1158_v20  ;;  %v6545_v57 = vunpack.i.h.bf16 %v6543_v46 }
 0x129   : > { %6747 = vrot.lane.b32.xlu1 %v7860_v15, %s7317_s30  ;;  %6752 = vrot.lane.b32.xlu0 %v7888_v7, %s7319_s9  ;;  %v6544_v59 = vunpack.i.l.bf16 %v6543_v46  ;;  %v2716_v45 = vcombine.low %v7624_v48, %v7624_v48  ;;  %v7962_v46 = vld [vmem:[%s7524_s27 + $0x10] sm:$0xff]  ;;  %s4989_s27 = sshll.u32 %s7513_s16, 7 }
 0x12a   : > { %v1265_v55 = vsel %vm396_vm2, %v6539_v51, %v6540_v50  ;;  %5990 = vmatpush3.bf16.msra.mxu1 %v5989_v53  ;;  %361 = vst [vmem:[#allocation2 + $0x50] sm:$0xff] %v7962_v46 }
 0x12b   : > { %v6548_v60 = vpop.permute.xlu1 %6547  ;;  %v1300_v56 = vsel %vm431_vm3, %v1265_v55, %v7142_v49  ;;  %v6553_v0 = vpop.permute.xlu0 %6552  ;;  %5445 = vmatprep.subr.mxu1 %v7321_v21  ;;  %v1276_v10 = vsel %vm388_vm1, %v6544_v59, %v6545_v57  ;;  %v1393_v57 = vld [vmem:[#allocation2 + $0x24] sm:$0xf]  ;;  %v7972_v59 = vpack.i.bf16 %v7624_v48, %v2716_v45 }
 0x12c   : > { %v6550_v2 = vunpack.i.h.bf16 %v6548_v60  ;;  %v6549_v61 = vunpack.i.l.bf16 %v6548_v60  ;;  %v5992_v4 = vpack.c.bf16 %v1300_v56, %v1299_v62  ;;  %v6555_v58 = vunpack.i.h.bf16 %v6553_v0  ;;  %v1675_v45 = vld [vmem:[#allocation2 + $0x24] sm:$0xf] }
 0x12d   : > { %2295 = vrot.lane.b32.xlu1 %v7838_v3, %s7317_s30  ;;  %v6554_v47 = vunpack.i.l.bf16 %v6553_v0  ;;  %2297 = vrot.lane.b32.xlu0 %v2415_v17, %s7317_s30  ;;  %v7918_v17 = vld [vmem:[#allocation2 + $0x44] sm:$0xff] }
 0x12e   : > { %v1283_v6 = vsel %vm396_vm2, %v6549_v61, %v6550_v2  ;;  %5993 = vmatpush3.bf16.msra.mxu0 %v5992_v4  ;;  %v2573_v24 = vcombine.low %v7918_v17, %v7918_v17  ;;  %v2701_v33 = vcombine.high %v7918_v17, %v7918_v17  ;;  %v7148_v61 = vld [vmem:[#allocation2 + $0x24] ss:$0 sps:$4 sm:$0xff]  }
 0x12f   : > { %v1152_v11 = vpop.permute.xlu1 %1151  ;;  %v1291_v12 = vsel %vm388_vm1, %v6554_v47, %v6555_v58  ;;  %v1154_v13 = vpop.permute.xlu0 %1153  ;;  %5994 = vmatprep.subr.bf16.mxu0 %v7318_v8  ;;  %v1301_v3 = vsel %vm431_vm3, %v1276_v10, %v1283_v6 }
 0x130   : > { %v1155_v16 = vsel %vm396_vm2, %v1152_v11, %v1154_v13  ;;  %v1302_v9 = vsel %vm431_vm3, %v1250_v5, %v1291_v12  ;;  %v7957_v20 = vpack.i.bf16 %v2701_v33, %v7918_v17  ;;  %v1532_v5 = vld [vmem:[#allocation2 + $0x20] sm:$0xf] }
 0x131   : > { %2438 = vrot.lane.b32.xlu1 %v7599_v38, %s7317_s30  ;;  %2440 = vrot.lane.b32.xlu0 %v2437_v1, %s7317_s30  ;;  %v5995_v28 = vpack.c.bf16 %v1302_v9, %v1301_v3  ;;  %v1389_v38 = vld [vmem:[#allocation2 + $0x1c] sm:$0xf] }
 0x132   : > { %5446 = vmatpush3.msk.msra.mxu1 %vm431_vm3, %v1155_v16 }
 0x133   : > { %v1295_v18 = vpop.permute.xlu1 %1294  ;;  %5448 = vmatmul.mubr.msk.f32.vlgmr.msra.gmra.mrb[4].mxu1 %vm441_vm4, %v7703_v63  ;;  %5996 = vmatpush3.bf16.msra.mxu0 %v5995_v28  ;;  %v1297_v19 = vpop.permute.xlu0 %1296 }
 0x134   : > { %v1298_v22 = vsel %vm396_vm2, %v1295_v18, %v1297_v19  ;;  %5458 = vmatprep.subr.mxu0 %v7321_v21  ;;  %5997 = vmatprep.subr.bf16.mxu1 %v7318_v8 }
 0x135   : > { %6757 = vrot.lane.b32.xlu1 %v7860_v15, %s7319_s9  ;;  %6762 = vrot.lane.b32.xlu0 %v7877_v32, %s7317_s30  ;;  %v7940_v32 = vpack.i.bf16 %v7918_v17, %v2573_v24 }
 0x136   : > { %5473 = vmatprep.mubr.msk.f32.mxu1 %vm7320_vm0, %v7321_v21 }
 0x137   : > { %v6558_v25 = vpop.permute.xlu1 %6557  ;;  %5459 = vmatpush3.msk.msra.mxu0 %vm431_vm3, %v1298_v22  ;;  %v6563_v26 = vpop.permute.xlu0 %6562 }
 0x138   : > { %v6560_v29 = vunpack.i.h.bf16 %v6558_v25  ;;  %v6559_v30 = vunpack.i.l.bf16 %v6558_v25  ;;  %v6565_v31 = vunpack.i.h.bf16 %v6563_v26  ;;  %v6564_v15 = vunpack.i.l.bf16 %v6563_v26  ;;  %5461 = vmatmul.mubr.msk.f32.vlgmr.msra.gmra.mrb[6].mxu0 %vm441_vm4, %v7703_v63  ;;  %6003 = vmatprep.subr.bf16.mxu0 %v7318_v8 }
 0x139   : > { %6767 = vrot.lane.b32.xlu1 %v6766_v23, %s7319_s9  ;;  %6772 = vrot.lane.b32.xlu0 %v7888_v7, %s7317_s30  ;;  %v2723_v26 = vcombine.high %v7624_v48, %v7624_v48 }
 0x13a   : > { %v1401_v34 = vsel %vm388_vm1, %v6559_v30, %v6560_v29  ;;  %v1408_v35 = vsel %vm396_vm2, %v6564_v15, %v6565_v31  ;;  %5486 = vmatprep.mubr.msk.f32.mxu0 %vm7320_vm0, %v7321_v21 }
 0x13b   : > { %v6568_v36 = vpop.permute.xlu1 %6567  ;;  %v6573_v37 = vpop.permute.xlu0 %6572  ;;  %v1442_v39 = vsel %vm431_vm3, %v1389_v38, %v1401_v34  ;;  %v1443_v40 = vsel %vm431_vm3, %v1408_v35, %v7145_v27 }
 0x13c   : > { %v6570_v41 = vunpack.i.h.bf16 %v6568_v36  ;;  %v6569_v42 = vunpack.i.l.bf16 %v6568_v36  ;;  %v6575_v14 = vunpack.i.h.bf16 %v6573_v37  ;;  %v6574_v43 = vunpack.i.l.bf16 %v6573_v37 }
 0x13d   : > { %6777 = vrot.lane.b32.xlu1 %v7940_v32, %s7319_s9  ;;  %6782 = vrot.lane.b32.xlu0 %v7888_v7, %s7319_s9  ;;  %v5998_v44 = vpack.c.bf16 %v1443_v40, %v1442_v39  ;;  %v7150_v40 = vld [vmem:[#allocation2 + $0x28] ss:$0 sps:$4 sm:$0xff]  }
 0x13e   : > { %v1419_v49 = vsel %vm388_vm1, %v6569_v42, %v6570_v41  ;;  %v1426_v51 = vsel %vm396_vm2, %v6574_v43, %v6575_v14  ;;  %v8015_v41 = vld [vmem:[#allocation2 + $0x4c] sm:$0xff] }
 0x13f   : > { %v6578_v50 = vpop.permute.xlu1 %6577  ;;  %5999 = vmatpush3.bf16.msra.mxu1 %v5998_v44  ;;  %v6583_v52 = vpop.permute.xlu0 %6582  ;;  %v1444_v56 = vsel %vm431_vm3, %v1419_v49, %v1426_v51  ;;  %v2859_v51 = vcombine.low %v8015_v41, %v8015_v41 }
 0x140   : > { %v6580_v53 = vunpack.i.h.bf16 %v6578_v50  ;;  %v6579_v7 = vunpack.i.l.bf16 %v6578_v50  ;;  %v6585_v54 = vunpack.i.h.bf16 %v6583_v52  ;;  %v6584_v55 = vunpack.i.l.bf16 %v6583_v52  ;;  %6000 = vmatprep.subr.bf16.mxu1 %v7318_v8 }
 0x141   : > { %6787 = vrot.lane.b32.xlu1 %v6766_v23, %s7317_s30  ;;  %6792 = vrot.lane.b32.xlu0 %v7957_v20, %s7319_s9  ;;  %v1536_v23 = vld [vmem:[#allocation2 + $0x28] sm:$0xf] }
 0x142   : > { %v1434_v60 = vsel %vm388_vm1, %v6579_v7, %v6580_v53  ;;  %v1544_v47 = vsel %vm388_vm1, %v6584_v55, %v6585_v54 }
 0x143   : > { %v6588_v62 = vpop.permute.xlu1 %6587  ;;  %v1445_v0 = vsel %vm431_vm3, %v1393_v57, %v1434_v60  ;;  %v6593_v2 = vpop.permute.xlu0 %6592  ;;  %v1585_v13 = vsel %vm431_vm3, %v1532_v5, %v1544_v47 }
 0x144   : > { %v6590_v4 = vunpack.i.h.bf16 %v6588_v62  ;;  %v6589_v58 = vunpack.i.l.bf16 %v6588_v62  ;;  %v6001_v1 = vpack.c.bf16 %v1445_v0, %v1444_v56  ;;  %v6595_v10 = vunpack.i.h.bf16 %v6593_v2 }
 0x145   : > { %6797 = vrot.lane.b32.xlu1 %v7940_v32, %s7317_s30  ;;  %6802 = vrot.lane.b32.xlu0 %v7972_v59, %s7319_s9  ;;  %v6594_v11 = vunpack.i.l.bf16 %v6593_v2  ;;  %v2987_v62 = vcombine.high %v8015_v41, %v8015_v41  ;;  %v6837_v56 = vpack.i.bf16 %v8015_v41, %v2859_v51 }
 0x146   : > { %v1551_v6 = vsel %vm396_vm2, %v6589_v58, %v6590_v4  ;;  %6002 = vmatpush3.bf16.msra.mxu1 %v6001_v1 }
 0x147   : > { %v6598_v12 = vpop.permute.xlu1 %6597  ;;  %v1586_v3 = vsel %vm431_vm3, %v1551_v6, %v7148_v61  ;;  %v6603_v16 = vpop.permute.xlu0 %6602  ;;  %5471 = vmatprep.subr.mxu1 %v7321_v21  ;;  %v1562_v25 = vsel %vm388_vm1, %v6594_v11, %v6595_v10  ;;  %v1679_v6 = vld [vmem:[#allocation2 + $0x2c] sm:$0xf]  ;;  %v6842_v10 = vpack.i.bf16 %v2987_v62, %v8015_v41  ;;  %v3002_v11 = vcombine.low %v7962_v46, %v7962_v46 }
 0x148   : > { %v6600_v9 = vunpack.i.h.bf16 %v6598_v12  ;;  %v6599_v28 = vunpack.i.l.bf16 %v6598_v12  ;;  %v6004_v18 = vpack.c.bf16 %v1586_v3, %v1585_v13  ;;  %v6605_v19 = vunpack.i.h.bf16 %v6603_v16 }
 0x149   : > { %v6604_v22 = vunpack.i.l.bf16 %v6603_v16  ;;  %2581 = vrot.lane.b32.xlu1 %v7918_v17, %s7317_s30  ;;  %2583 = vrot.lane.b32.xlu0 %v2701_v33, %s7317_s30  ;;  %v369_v33 = vld [vmem:[%s8951_s3] sm:$0xff] }
 0x14a   : > { %v1569_v24 = vsel %vm396_vm2, %v6599_v28, %v6600_v9  ;;  %6005 = vmatpush3.bf16.msra.mxu0 %v6004_v18  ;;  %v7151_v28 = vld [vmem:[#allocation2 + $0x2c] ss:$0 sps:$4 sm:$0xff]  }
 0x14b   : > { %v1438_v27 = vpop.permute.xlu1 %1437  ;;  %v1577_v29 = vsel %vm388_vm1, %v6604_v22, %v6605_v19  ;;  %v1440_v30 = vpop.permute.xlu0 %1439  ;;  %6006 = vmatprep.subr.bf16.mxu0 %v7318_v8  ;;  %v1587_v31 = vsel %vm431_vm3, %v1562_v25, %v1569_v24  ;;  %v6852_v24 = vpack.i.bf16 %v7962_v46, %v3002_v11 }
 0x14c   : > { %v1441_v17 = vsel %vm396_vm2, %v1438_v27, %v1440_v30  ;;  %v1588_v15 = vsel %vm431_vm3, %v1536_v23, %v1577_v29  ;;  %v1818_v23 = vld [vmem:[#allocation2 + $0x28] sm:$0xf] }
 0x14d   : > { %5472 = vmatpush3.msk.msra.mxu1 %vm431_vm3, %v1441_v17  ;;  %2724 = vrot.lane.b32.xlu1 %v7624_v48, %s7317_s30  ;;  %v6007_v38 = vpack.c.bf16 %v1588_v15, %v1587_v31 }
 0x14e   : > { %2726 = vrot.lane.b32.xlu0 %v2723_v26, %s7317_s30  ;;  %5474 = vmatmul.mubr.msk.f32.vlgmr.msra.gmra.mrb[6].mxu1 %vm441_vm4, %v7703_v63 }
 0x14f   : > { %v1581_v34 = vpop.permute.xlu1 %1580  ;;  %6008 = vmatpush3.bf16.msra.mxu0 %v6007_v38  ;;  %v1583_v35 = vpop.permute.xlu0 %1582  ;;  %6009 = vmatprep.subr.bf16.mxu1 %v7318_v8 }
 0x150   : > { %v1584_v36 = vsel %vm396_vm2, %v1581_v34, %v1583_v35  ;;  %5484 = vmatprep.subr.mxu0 %v7321_v21  ;;  %5499 = vmatprep.mubr.msk.f32.mxu1 %vm7320_vm0, %v7321_v21 }
 0x151   : > { %438 = vperm.xlu1 %6806, %v369_v33  }
 0x152   : > { %6808 = vrot.lane.b32.xlu0 %v7940_v32, %s7319_s9  ;;  %v6822_v32 = vpack.i.bf16 %v2723_v26, %v7624_v48 }
 0x153   : > { %v6608_v37 = vpop.permute.xlu1 %6607  ;;  %5485 = vmatpush3.msk.msra.mxu0 %vm431_vm3, %v1584_v36  ;;  %v6613_v39 = vpop.permute.xlu0 %6612  ;;  %v1822_v36 = vld [vmem:[#allocation2 + $0x30] sm:$0xf] }
 0x154   : > { %v6610_v42 = vunpack.i.h.bf16 %v6608_v37  ;;  %v6609_v14 = vunpack.i.l.bf16 %v6608_v37  ;;  %v6615_v43 = vunpack.i.h.bf16 %v6613_v39  ;;  %v6614_v44 = vunpack.i.l.bf16 %v6613_v39  ;;  %5487 = vmatmul.mubr.msk.f32.vlgmr.msra.gmra.mrb[8].mxu0 %vm441_vm4, %v7703_v63  ;;  %6015 = vmatprep.subr.bf16.mxu0 %v7318_v8 }
 0x155   : > { %5512 = vmatprep.mubr.msk.f32.mxu0 %vm7320_vm0, %v7321_v21  ;;  %6813 = vrot.lane.b32.xlu1 %v7957_v20, %s7317_s30 }
 0x156   : > { %v1687_v49 = vsel %vm388_vm1, %v6609_v14, %v6610_v42  ;;  %v1694_v50 = vsel %vm396_vm2, %v6614_v44, %v6615_v43  ;;  %6818 = vrot.lane.b32.xlu0 %v7972_v59, %s7319_s9 }
 0x157   : > { %v6618_v52 = vpop.permute.xlu1 %6617  ;;  %v6623_v53 = vpop.permute.xlu0 %6622  ;;  %v1728_v7 = vsel %vm431_vm3, %v1675_v45, %v1687_v49  ;;  %v1729_v54 = vsel %vm431_vm3, %v1694_v50, %v7150_v40 }
 0x158   : > { %v6620_v55 = vunpack.i.h.bf16 %v6618_v52  ;;  %v6619_v20 = vunpack.i.l.bf16 %v6618_v52  ;;  %v6625_v57 = vunpack.i.h.bf16 %v6623_v53  ;;  %v6624_v48 = vunpack.i.l.bf16 %v6623_v53 }
 0x159   : > { %v6010_v60 = vpack.c.bf16 %v1729_v54, %v1728_v7  ;;  %6823 = vrot.lane.b32.xlu1 %v6822_v32, %s7317_s30  ;;  %v7152_v7 = vld [vmem:[#allocation2 + $0x30] ss:$0 sps:$4 sm:$0xff]  }
 0x15a   : > { %6828 = vrot.lane.b32.xlu0 %v6822_v32, %s7319_s9  ;;  %v1705_v0 = vsel %vm388_vm1, %v6619_v20, %v6620_v55  ;;  %v1712_v61 = vsel %vm396_vm2, %v6624_v48, %v6625_v57  ;;  %v1961_v48 = vld [vmem:[#allocation2 + $0x2c] sm:$0xf] }
 0x15b   : > { %v6628_v2 = vpop.permute.xlu1 %6627  ;;  %6011 = vmatpush3.bf16.msra.mxu1 %v6010_v60  ;;  %v6633_v4 = vpop.permute.xlu0 %6632  ;;  %v1730_v3 = vsel %vm431_vm3, %v1705_v0, %v1712_v61 }
 0x15c   : > { %v6630_v58 = vunpack.i.h.bf16 %v6628_v2  ;;  %v6629_v47 = vunpack.i.l.bf16 %v6628_v2  ;;  %v6635_v1 = vunpack.i.h.bf16 %v6633_v4  ;;  %v6634_v5 = vunpack.i.l.bf16 %v6633_v4  ;;  %6012 = vmatprep.subr.bf16.mxu1 %v7318_v8 }
 0x15d   : > { %6833 = vrot.lane.b32.xlu1 %v7972_v59, %s7317_s30 }
 0x15e   : > { %v1720_v12 = vsel %vm388_vm1, %v6629_v47, %v6630_v58  ;;  %6838 = vrot.lane.b32.xlu0 %v6837_v56, %s7319_s9  ;;  %v1830_v59 = vsel %vm388_vm1, %v6634_v5, %v6635_v1 }
 0x15f   : > { %v6638_v13 = vpop.permute.xlu1 %6637  ;;  %v1731_v16 = vsel %vm431_vm3, %v1679_v6, %v1720_v12  ;;  %v6643_v9 = vpop.permute.xlu0 %6642  ;;  %v1871_v30 = vsel %vm431_vm3, %v1818_v23, %v1830_v59 }
 0x160   : > { %v6640_v18 = vunpack.i.h.bf16 %v6638_v13  ;;  %v6639_v19 = vunpack.i.l.bf16 %v6638_v13  ;;  %v6013_v22 = vpack.c.bf16 %v1731_v16, %v1730_v3  ;;  %v6645_v26 = vunpack.i.h.bf16 %v6643_v9  ;;  %v1965_v16 = vld [vmem:[#allocation2 + $0x34] sm:$0xf] }
 0x161   : > { %6843 = vrot.lane.b32.xlu1 %v6842_v10, %s7319_s9  ;;  %v6644_v27 = vunpack.i.l.bf16 %v6643_v9 }
 0x162   : > { %v1837_v25 = vsel %vm396_vm2, %v6639_v19, %v6640_v18  ;;  %6014 = vmatpush3.bf16.msra.mxu1 %v6013_v22  ;;  %6848 = vrot.lane.b32.xlu0 %v6837_v56, %s7317_s30  ;;  %v7153_v22 = vld [vmem:[#allocation2 + $0x34] ss:$0 sps:$4 sm:$0xff]  }
 0x163   : > { %v6648_v29 = vpop.permute.xlu1 %6647  ;;  %v1872_v31 = vsel %vm431_vm3, %v1837_v25, %v7151_v28  ;;  %v6653_v17 = vpop.permute.xlu0 %6652  ;;  %5497 = vmatprep.subr.mxu1 %v7321_v21  ;;  %v1848_v39 = vsel %vm388_vm1, %v6644_v27, %v6645_v26  ;;  %v2104_v27 = vld [vmem:[#allocation2 + $0x30] sm:$0xf] }
 0x164   : > { %v6650_v15 = vunpack.i.h.bf16 %v6648_v29  ;;  %v6649_v38 = vunpack.i.l.bf16 %v6648_v29  ;;  %v6016_v33 = vpack.c.bf16 %v1872_v31, %v1871_v30  ;;  %v6655_v34 = vunpack.i.h.bf16 %v6653_v17 }
 0x165   : > { %v6654_v35 = vunpack.i.l.bf16 %v6653_v17  ;;  %6853 = vrot.lane.b32.xlu1 %v6852_v24, %s7319_s9 }
 0x166   : > { %v1855_v37 = vsel %vm396_vm2, %v6649_v38, %v6650_v15  ;;  %6017 = vmatpush3.bf16.msra.mxu0 %v6016_v33  ;;  %2867 = vrot.lane.b32.xlu0 %v8015_v41, %s7317_s30  ;;  %v3009_v41 = vcombine.high %v7962_v46, %v7962_v46 }
 0x167   : > { %v1724_v40 = vpop.permute.xlu1 %1723  ;;  %v1863_v42 = vsel %vm388_vm1, %v6654_v35, %v6655_v34  ;;  %v1726_v14 = vpop.permute.xlu0 %1725  ;;  %6018 = vmatprep.subr.bf16.mxu0 %v7318_v8  ;;  %v1873_v43 = vsel %vm431_vm3, %v1848_v39, %v1855_v37 }
 0x168   : > { %v1727_v44 = vsel %vm396_vm2, %v1724_v40, %v1726_v14  ;;  %v1874_v45 = vsel %vm431_vm3, %v1822_v36, %v1863_v42  ;;  %v2108_v40 = vld [vmem:[#allocation2 + $0x38] sm:$0xf] }
 0x169   : > { %5498 = vmatpush3.msk.msra.mxu1 %vm431_vm3, %v1727_v44  ;;  %v6019_v32 = vpack.c.bf16 %v1874_v45, %v1873_v43  ;;  %2869 = vrot.lane.b32.xlu1 %v2987_v62, %s7317_s30 }
 0x16a   : > { %5500 = vmatmul.mubr.msk.f32.vlgmr.msra.gmra.mrb[8].mxu1 %vm441_vm4, %v7703_v63  ;;  %6021 = vmatprep.subr.bf16.mxu1 %v7318_v8 }
 0x16b   : > { %v1867_v49 = vpop.permute.xlu1 %1866  ;;  %6020 = vmatpush3.bf16.msra.mxu0 %v6019_v32  ;;  %v1869_v50 = vpop.permute.xlu0 %1868  ;;  %5525 = vmatprep.mubr.msk.f32.mxu1 %vm7320_vm0, %v7321_v21 }
 0x16c   : > { %v1870_v51 = vsel %vm396_vm2, %v1867_v49, %v1869_v50  ;;  %5510 = vmatprep.subr.mxu0 %v7321_v21  ;;  %3010 = vrot.lane.b32.xlu0 %v7962_v46, %s7317_s30 }
 0x16d   : > { %3012 = vrot.lane.b32.xlu1 %v3009_v41, %s7317_s30 }
 0x16f   : > { %v6658_v52 = vpop.permute.xlu1 %6657  ;;  %5511 = vmatpush3.msk.msra.mxu0 %vm431_vm3, %v1870_v51  ;;  %v6663_v53 = vpop.permute.xlu0 %6662  ;;  %v8114_v51 = vld [vmem:[%s8950_s2] sm:$0xff] }
 0x170   : > { %v6660_v54 = vunpack.i.h.bf16 %v6658_v52  ;;  %v6659_v55 = vunpack.i.l.bf16 %v6658_v52  ;;  %v6665_v20 = vunpack.i.h.bf16 %v6663_v53  ;;  %v6664_v57 = vunpack.i.l.bf16 %v6663_v53  ;;  %5513 = vmatmul.mubr.msk.f32.vlgmr.msra.gmra.mrb[10].mxu0 %vm441_vm4, %v7703_v63  ;;  %6027 = vmatprep.subr.bf16.mxu0 %v7318_v8 }
 0x171   : > { %5538 = vmatprep.mubr.msk.f32.mxu0 %vm7320_vm0, %v7321_v21 }
 0x172   : > { %v1973_v46 = vsel %vm388_vm1, %v6659_v55, %v6660_v54  ;;  %v1980_v60 = vsel %vm396_vm2, %v6664_v57, %v6665_v20  ;;  %v7154_v20 = vld [vmem:[#allocation2 + $0x38] ss:$0 sps:$4 sm:$0xff]  }
 0x173   : > { %v6668_v62 = vpop.permute.xlu1 %6667  ;;  %v6673_v56 = vpop.permute.xlu0 %6672  ;;  %v2014_v0 = vsel %vm431_vm3, %v1961_v48, %v1973_v46  ;;  %v2015_v2 = vsel %vm431_vm3, %v1980_v60, %v7152_v7 }
 0x174   : > { %v6670_v61 = vunpack.i.h.bf16 %v6668_v62  ;;  %v6669_v4 = vunpack.i.l.bf16 %v6668_v62  ;;  %v6675_v58 = vunpack.i.h.bf16 %v6673_v56  ;;  %v6674_v63 = vunpack.i.l.bf16 %v6673_v56  ;;  %v2247_v62 = vld [vmem:[#allocation2 + $0x34] sm:$0xf] }
 0x175   : > { %v6022_v47 = vpack.c.bf16 %v2015_v2, %v2014_v0 }
 0x176   : > { %v1991_v1 = vsel %vm388_vm1, %v6669_v4, %v6670_v61  ;;  %v1998_v6 = vsel %vm396_vm2, %v6674_v63, %v6675_v58 }
 0x177   : > { %v6678_v5 = vpop.permute.xlu1 %6677  ;;  %6023 = vmatpush3.bf16.msra.mxu1 %v6022_v47  ;;  %v6683_v10 = vpop.permute.xlu0 %6682  ;;  %v2016_v18 = vsel %vm431_vm3, %v1991_v1, %v1998_v6 }
 0x178   : > { %v6680_v11 = vunpack.i.h.bf16 %v6678_v5  ;;  %v6679_v12 = vunpack.i.l.bf16 %v6678_v5  ;;  %v6685_v13 = vunpack.i.h.bf16 %v6683_v10  ;;  %v6684_v3 = vunpack.i.l.bf16 %v6683_v10  ;;  %6024 = vmatprep.subr.bf16.mxu1 %v7318_v8 }
 0x17a   : > { %v2006_v9 = vsel %vm388_vm1, %v6679_v12, %v6680_v11  ;;  %v2116_v25 = vsel %vm388_vm1, %v6684_v3, %v6685_v13 }
 0x17b   : > { %v6688_v28 = vpop.permute.xlu1 %6687  ;;  %v2017_v19 = vsel %vm431_vm3, %v1965_v16, %v2006_v9  ;;  %v6693_v59 = vpop.permute.xlu0 %6692  ;;  %v2157_v15 = vsel %vm431_vm3, %v2104_v27, %v2116_v25  ;;  %v7155_v25 = vld [vmem:[#allocation2 + $0x3c] ss:$0 sps:$4 sm:$0xff]  }
 0x17c   : > { %v6690_v23 = vunpack.i.h.bf16 %v6688_v28  ;;  %v6689_v24 = vunpack.i.l.bf16 %v6688_v28  ;;  %v6025_v26 = vpack.c.bf16 %v2017_v19, %v2016_v18  ;;  %v6695_v30 = vunpack.i.h.bf16 %v6693_v59  ;;  %v2251_v18 = vld [vmem:[#allocation2 + $0x3c] sm:$0xf] }
 0x17d   : > { %v6694_v31 = vunpack.i.l.bf16 %v6693_v59 }
 0x17e   : > { %v2123_v29 = vsel %vm396_vm2, %v6689_v24, %v6690_v23  ;;  %6026 = vmatpush3.bf16.msra.mxu1 %v6025_v26 }
 0x17f   : > { %v6698_v17 = vpop.permute.xlu1 %6697  ;;  %v2158_v38 = vsel %vm431_vm3, %v2123_v29, %v7153_v22  ;;  %v6703_v33 = vpop.permute.xlu0 %6702  ;;  %5523 = vmatprep.subr.mxu1 %v7321_v21  ;;  %v2134_v14 = vsel %vm388_vm1, %v6694_v31, %v6695_v30  ;;  %v2390_v31 = vld [vmem:[#allocation2 + $0x38] sm:$0xf] }
 0x180   : > { %v6700_v34 = vunpack.i.h.bf16 %v6698_v17  ;;  %v6699_v35 = vunpack.i.l.bf16 %v6698_v17  ;;  %v6028_v36 = vpack.c.bf16 %v2158_v38, %v2157_v15  ;;  %v6705_v37 = vunpack.i.h.bf16 %v6703_v33 }
 0x181   : > { %v6704_v39 = vunpack.i.l.bf16 %v6703_v33 }
 0x182   : > { %v2141_v42 = vsel %vm396_vm2, %v6699_v35, %v6700_v34  ;;  %6029 = vmatpush3.bf16.msra.mxu0 %v6028_v36 }
 0x183   : > { %v2010_v43 = vpop.permute.xlu1 %2009  ;;  %v2149_v44 = vsel %vm388_vm1, %v6704_v39, %v6705_v37  ;;  %v2012_v45 = vpop.permute.xlu0 %2011  ;;  %6030 = vmatprep.subr.bf16.mxu0 %v7318_v8  ;;  %v2159_v32 = vsel %vm431_vm3, %v2134_v14, %v2141_v42 }
 0x184   : > { %v2013_v41 = vsel %vm396_vm2, %v2010_v43, %v2012_v45  ;;  %v2160_v49 = vsel %vm431_vm3, %v2108_v40, %v2149_v44  ;;  %v2394_v43 = vld [vmem:[#allocation2 + $0x40] sm:$0xf] }
 0x185   : > { %5524 = vmatpush3.msk.msra.mxu1 %vm431_vm3, %v2013_v41  ;;  %v6031_v50 = vpack.c.bf16 %v2160_v49, %v2159_v32 }
 0x186   : > { %5526 = vmatmul.mubr.msk.f32.vlgmr.msra.gmra.mrb[10].mxu1 %vm441_vm4, %v8114_v51  ;;  %6033 = vmatprep.subr.bf16.mxu1 %v7318_v8 }
 0x187   : > { %v2153_v52 = vpop.permute.xlu1 %2152  ;;  %6032 = vmatpush3.bf16.msra.mxu0 %v6031_v50  ;;  %v2155_v53 = vpop.permute.xlu0 %2154  ;;  %5551 = vmatprep.mubr.msk.f32.mxu1 %vm7320_vm0, %v7321_v21 }
 0x188   : > { %v2156_v7 = vsel %vm396_vm2, %v2153_v52, %v2155_v53  ;;  %5536 = vmatprep.subr.mxu0 %v7321_v21 }
 0x18b   : > { %v6708_v54 = vpop.permute.xlu1 %6707  ;;  %5537 = vmatpush3.msk.msra.mxu0 %vm431_vm3, %v2156_v7  ;;  %v6713_v55 = vpop.permute.xlu0 %6712 }
 0x18c   : > { %v6710_v57 = vunpack.i.h.bf16 %v6708_v54  ;;  %v6709_v48 = vunpack.i.l.bf16 %v6708_v54  ;;  %v6715_v46 = vunpack.i.h.bf16 %v6713_v55  ;;  %v6714_v60 = vunpack.i.l.bf16 %v6713_v55  ;;  %5539 = vmatmul.mubr.msk.f32.vlgmr.msra.gmra.mrb[12].mxu0 %vm441_vm4, %v8114_v51  ;;  %6039 = vmatprep.subr.bf16.mxu0 %v7318_v8 }
 0x18d   : > { %5564 = vmatprep.mubr.msk.f32.mxu0 %vm7320_vm0, %v7321_v21 }
 0x18e   : > { %v2259_v56 = vsel %vm388_vm1, %v6709_v48, %v6710_v57  ;;  %v2266_v0 = vsel %vm396_vm2, %v6714_v60, %v6715_v46  ;;  %v7156_v46 = vld [vmem:[#allocation2 + $0x40] ss:$0 sps:$4 sm:$0xff]  }
 0x18f   : > { %v6718_v2 = vpop.permute.xlu1 %6717  ;;  %v6723_v61 = vpop.permute.xlu0 %6722  ;;  %v2300_v4 = vsel %vm431_vm3, %v2247_v62, %v2259_v56  ;;  %v2301_v58 = vsel %vm431_vm3, %v2266_v0, %v7154_v20 }
 0x190   : > { %v6720_v63 = vunpack.i.h.bf16 %v6718_v2  ;;  %v6719_v47 = vunpack.i.l.bf16 %v6718_v2  ;;  %v6725_v1 = vunpack.i.h.bf16 %v6723_v61  ;;  %v6724_v5 = vunpack.i.l.bf16 %v6723_v61  ;;  %v2533_v2 = vld [vmem:[#allocation2 + $0x3c] sm:$0xf] }
 0x191   : > { %v6034_v6 = vpack.c.bf16 %v2301_v58, %v2300_v4 }
 0x192   : > { %v2277_v10 = vsel %vm388_vm1, %v6719_v47, %v6720_v63  ;;  %v2284_v12 = vsel %vm396_vm2, %v6724_v5, %v6725_v1 }
 0x193   : > { %v6728_v11 = vpop.permute.xlu1 %6727  ;;  %6035 = vmatpush3.bf16.msra.mxu1 %v6034_v6  ;;  %v6733_v13 = vpop.permute.xlu0 %6732  ;;  %v2302_v22 = vsel %vm431_vm3, %v2277_v10, %v2284_v12 }
 0x194   : > { %v6730_v3 = vunpack.i.h.bf16 %v6728_v11  ;;  %v6729_v16 = vunpack.i.l.bf16 %v6728_v11  ;;  %v6735_v9 = vunpack.i.h.bf16 %v6733_v13  ;;  %v6734_v28 = vunpack.i.l.bf16 %v6733_v13  ;;  %6036 = vmatprep.subr.bf16.mxu1 %v7318_v8 }
 0x196   : > { %v2292_v19 = vsel %vm388_vm1, %v6729_v16, %v6730_v3  ;;  %v2402_v29 = vsel %vm388_vm1, %v6734_v28, %v6735_v9 }
 0x197   : > { %v6738_v59 = vpop.permute.xlu1 %6737  ;;  %v2303_v23 = vsel %vm431_vm3, %v2251_v18, %v2292_v19  ;;  %v6743_v24 = vpop.permute.xlu0 %6742  ;;  %v2443_v34 = vsel %vm431_vm3, %v2390_v31, %v2402_v29  ;;  %v7157_v29 = vld [vmem:[#allocation2 + $0x44] ss:$0 sps:$4 sm:$0xff]  }
 0x198   : > { %v6740_v26 = vunpack.i.h.bf16 %v6738_v59  ;;  %v6739_v27 = vunpack.i.l.bf16 %v6738_v59  ;;  %v6037_v30 = vpack.c.bf16 %v2303_v23, %v2302_v22  ;;  %v6745_v15 = vunpack.i.h.bf16 %v6743_v24  ;;  %v2537_v22 = vld [vmem:[#allocation2 + $0x44] sm:$0xf] }
 0x199   : > { %v6744_v38 = vunpack.i.l.bf16 %v6743_v24 }
 0x19a   : > { %v2409_v17 = vsel %vm396_vm2, %v6739_v27, %v6740_v26  ;;  %6038 = vmatpush3.bf16.msra.mxu1 %v6037_v30 }
 0x19b   : > { %v6748_v33 = vpop.permute.xlu1 %6747  ;;  %v2444_v35 = vsel %vm431_vm3, %v2409_v17, %v7155_v25  ;;  %v6753_v36 = vpop.permute.xlu0 %6752  ;;  %5549 = vmatprep.subr.mxu1 %v7321_v21  ;;  %v2420_v45 = vsel %vm388_vm1, %v6744_v38, %v6745_v15  ;;  %v2676_v38 = vld [vmem:[#allocation2 + $0x40] sm:$0xf] }
 0x19c   : > { %v6750_v37 = vunpack.i.h.bf16 %v6748_v33  ;;  %v6749_v39 = vunpack.i.l.bf16 %v6748_v33  ;;  %v6040_v40 = vpack.c.bf16 %v2444_v35, %v2443_v34  ;;  %v6755_v42 = vunpack.i.h.bf16 %v6753_v36 }
 0x19d   : > { %v6754_v14 = vunpack.i.l.bf16 %v6753_v36 }
 0x19e   : > { %v2427_v44 = vsel %vm396_vm2, %v6749_v39, %v6750_v37  ;;  %6041 = vmatpush3.bf16.msra.mxu0 %v6040_v40 }
 0x19f   : > { %v2296_v32 = vpop.permute.xlu1 %2295  ;;  %v2435_v41 = vsel %vm388_vm1, %v6754_v14, %v6755_v42  ;;  %v2298_v49 = vpop.permute.xlu0 %2297  ;;  %6042 = vmatprep.subr.bf16.mxu0 %v7318_v8  ;;  %v2445_v50 = vsel %vm431_vm3, %v2420_v45, %v2427_v44 }
 0x1a0   : > { %v2299_v52 = vsel %vm396_vm2, %v2296_v32, %v2298_v49  ;;  %v2446_v53 = vsel %vm431_vm3, %v2394_v43, %v2435_v41  ;;  %v2680_v32 = vld [vmem:[#allocation2 + $0x48] sm:$0xf] }
 0x1a1   : > { %5550 = vmatpush3.msk.msra.mxu1 %vm431_vm3, %v2299_v52  ;;  %v6043_v7 = vpack.c.bf16 %v2446_v53, %v2445_v50 }
 0x1a2   : > { %5552 = vmatmul.mubr.msk.f32.vlgmr.msra.gmra.mrb[12].mxu1 %vm441_vm4, %v8114_v51  ;;  %6045 = vmatprep.subr.bf16.mxu1 %v7318_v8 }
 0x1a3   : > { %v2439_v54 = vpop.permute.xlu1 %2438  ;;  %6044 = vmatpush3.bf16.msra.mxu0 %v6043_v7  ;;  %v2441_v55 = vpop.permute.xlu0 %2440  ;;  %5577 = vmatprep.mubr.msk.f32.mxu1 %vm7320_vm0, %v7321_v21 }
 0x1a4   : > { %v2442_v20 = vsel %vm396_vm2, %v2439_v54, %v2441_v55  ;;  %5562 = vmatprep.subr.mxu0 %v7321_v21 }
 0x1a7   : > { %v6758_v57 = vpop.permute.xlu1 %6757  ;;  %5563 = vmatpush3.msk.msra.mxu0 %vm431_vm3, %v2442_v20  ;;  %v6763_v48 = vpop.permute.xlu0 %6762 }
 0x1a8   : > { %v6760_v60 = vunpack.i.h.bf16 %v6758_v57  ;;  %v6759_v62 = vunpack.i.l.bf16 %v6758_v57  ;;  %v6765_v56 = vunpack.i.h.bf16 %v6763_v48  ;;  %v6764_v0 = vunpack.i.l.bf16 %v6763_v48  ;;  %5565 = vmatmul.mubr.msk.f32.vlgmr.msra.gmra.mrb[14].mxu0 %vm441_vm4, %v8114_v51  ;;  %6051 = vmatprep.subr.bf16.mxu0 %v7318_v8 }
 0x1a9   : > { %5590 = vmatprep.mubr.msk.f32.mxu0 %vm7320_vm0, %v7321_v21 }
 0x1aa   : > { %v2545_v61 = vsel %vm388_vm1, %v6759_v62, %v6760_v60  ;;  %v2552_v4 = vsel %vm396_vm2, %v6764_v0, %v6765_v56  ;;  %v371_v0 = vlaneseq }
 0x1ab   : > { %v6768_v58 = vpop.permute.xlu1 %6767  ;;  %v6773_v63 = vpop.permute.xlu0 %6772  ;;  %v2586_v47 = vsel %vm431_vm3, %v2533_v2, %v2545_v61  ;;  %v2587_v1 = vsel %vm431_vm3, %v2552_v4, %v7156_v46 }
 0x1ac   : > { %v6770_v5 = vunpack.i.h.bf16 %v6768_v58  ;;  %v6769_v6 = vunpack.i.l.bf16 %v6768_v58  ;;  %v6775_v10 = vunpack.i.h.bf16 %v6773_v63  ;;  %v6774_v11 = vunpack.i.l.bf16 %v6773_v63 }
 0x1ad   : > { %v6046_v12 = vpack.c.bf16 %v2587_v1, %v2586_v47  ;;  %v372_v61 = vand.u32 127, %v371_v0 }
 0x1ae   : > { %v2563_v13 = vsel %vm388_vm1, %v6769_v6, %v6770_v5  ;;  %v2570_v16 = vsel %vm396_vm2, %v6774_v11, %v6775_v10 }
 0x1af   : > { %v6778_v3 = vpop.permute.xlu1 %6777  ;;  %6047 = vmatpush3.bf16.msra.mxu1 %v6046_v12  ;;  %v6783_v9 = vpop.permute.xlu0 %6782  ;;  %v2588_v25 = vsel %vm431_vm3, %v2563_v13, %v2570_v16  ;;  %vm373_vm5 = vcmp.ge.s32.totalorder %v372_v61, 1  ;;  %vm374_vm6 = vcmp.le.s32.totalorder %v372_v61, 16  ;;  %v2819_v13 = vld [vmem:[#allocation2 + $0x44] sm:$0xf] }
 0x1b0   : > { %v6780_v28 = vunpack.i.h.bf16 %v6778_v3  ;;  %v6779_v18 = vunpack.i.l.bf16 %v6778_v3  ;;  %v6785_v19 = vunpack.i.h.bf16 %v6783_v9  ;;  %v6784_v59 = vunpack.i.l.bf16 %v6783_v9  ;;  %6048 = vmatprep.subr.bf16.mxu1 %v7318_v8  ;;  %vm8205_vm7 = vmand %vm373_vm5, %vm374_vm6  ;;  %v7162_v9 = vld [vmem:[#allocation2 + $0x48] ss:$0 sps:$4 sm:$0xff]  }
 0x1b1   : > { %vm8349_vm9 = vmpackc.low %vm8205_vm7, %vm7323_vm8 }
 0x1b2   : > { %v2578_v23 = vsel %vm388_vm1, %v6779_v18, %v6780_v28  ;;  %v2688_v17 = vsel %vm388_vm1, %v6784_v59, %v6785_v19  ;;  %vm8359_vm10 = vmpackc.low %vm7323_vm8, %vm8205_vm7 }
 0x1b3   : > { %v6788_v24 = vpop.permute.xlu1 %6787  ;;  %v2589_v26 = vsel %vm431_vm3, %v2537_v22, %v2578_v23  ;;  %v6793_v27 = vpop.permute.xlu0 %6792  ;;  %v2729_v37 = vsel %vm431_vm3, %v2676_v38, %v2688_v17  ;;  %v2962_v17 = vld [vmem:[#allocation2 + $0x48] sm:$0xf] }
 0x1b4   : > { %v6790_v30 = vunpack.i.h.bf16 %v6788_v24  ;;  %v6789_v31 = vunpack.i.l.bf16 %v6788_v24  ;;  %v6049_v15 = vpack.c.bf16 %v2589_v26, %v2588_v25  ;;  %v6795_v34 = vunpack.i.h.bf16 %v6793_v27 }
 0x1b5   : > { %v6794_v35 = vunpack.i.l.bf16 %v6793_v27 }
 0x1b6   : > { %v2695_v33 = vsel %vm396_vm2, %v6789_v31, %v6790_v30  ;;  %6050 = vmatpush3.bf16.msra.mxu1 %v6049_v15 }
 0x1b7   : > { %v6798_v36 = vpop.permute.xlu1 %6797  ;;  %v2730_v39 = vsel %vm431_vm3, %v2695_v33, %v7157_v29  ;;  %v6803_v40 = vpop.permute.xlu0 %6802  ;;  %5575 = vmatprep.subr.mxu1 %v7321_v21  ;;  %v2706_v49 = vsel %vm388_vm1, %v6794_v35, %v6795_v34 }
 0x1b8   : > { %v6800_v42 = vunpack.i.h.bf16 %v6798_v36  ;;  %v6799_v14 = vunpack.i.l.bf16 %v6798_v36  ;;  %v6052_v43 = vpack.c.bf16 %v2730_v39, %v2729_v37  ;;  %v6805_v44 = vunpack.i.h.bf16 %v6803_v40  ;;  %v7163_v36 = vld [vmem:[#allocation2 + $0x4c] ss:$0 sps:$4 sm:$0xff]  }
 0x1b9   : > { %v6804_v45 = vunpack.i.l.bf16 %v6803_v40 }
 0x1ba   : > { %v2713_v41 = vsel %vm396_vm2, %v6799_v14, %v6800_v42  ;;  %6053 = vmatpush3.bf16.msra.mxu0 %v6052_v43 }
 0x1bb   : > { %v2721_v50 = vsel %vm388_vm1, %v6804_v45, %v6805_v44  ;;  %v2582_v52 = vpop.permute.xlu1 %2581  ;;  %v2584_v53 = vpop.permute.xlu0 %2583  ;;  %6054 = vmatprep.subr.bf16.mxu0 %v7318_v8  ;;  %v2731_v7 = vsel %vm431_vm3, %v2706_v49, %v2713_v41 }
 0x1bc   : > { %v2585_v54 = vsel %vm396_vm2, %v2582_v52, %v2584_v53  ;;  %v2732_v55 = vsel %vm431_vm3, %v2680_v32, %v2721_v50  ;;  %v2823_v32 = vld [vmem:[#allocation2 + $0x4c] sm:$0xf] }
 0x1bd   : > { %5576 = vmatpush3.msk.msra.mxu1 %vm431_vm3, %v2585_v54  ;;  %v6055_v20 = vpack.c.bf16 %v2732_v55, %v2731_v7 }
 0x1be   : > { %5578 = vmatmul.mubr.msk.f32.vlgmr.msra.gmra.mrb[14].mxu1 %vm441_vm4, %v8114_v51  ;;  %v513_v57 = vpop.f32.mrb[0].mxu0  ;;  %6057 = vmatprep.subr.bf16.mxu1 %v7318_v8 }
 0x1bf   : > { %6056 = vmatpush3.bf16.msra.mxu0 %v6055_v20  ;;  %v2725_v48 = vpop.permute.xlu1 %2724  ;;  %v5384_v46 = vpop.f32.mrb[1].mxu0  ;;  %5603 = vmatprep.mubr.msk.f32.mxu1 %vm7320_vm0, %v7321_v21 }
 0x1c0   : > { %v2727_v60 = vpop.permute.xlu0 %2726  ;;  %5588 = vmatprep.subr.mxu0 %v7321_v21 }
 0x1c1   : > { %v2728_v62 = vsel %vm396_vm2, %v2725_v48, %v2727_v60 }
 0x1c3   : > { %5589 = vmatpush3.msk.msra.mxu0 %vm431_vm3, %v2728_v62 }
 0x1c4   : > { %5591 = vmatmul.mubr.msk.f32.vlgmr.msra.gmra.mrb[16].mxu0 %vm441_vm4, %v8114_v51  ;;  %v6809_v56 = vpop.permute.xlu0 %6808  ;;  %6063 = vmatprep.subr.bf16.mxu0 %v7318_v8 }
 0x1c5   : > { %5616 = vmatprep.mubr.msk.f32.mxu0 %vm7320_vm0, %v7321_v21  ;;  %v6811_v4 = vunpack.i.h.bf16 %v6809_v56  ;;  %v6810_v58 = vunpack.i.l.bf16 %v6809_v56 }
 0x1c7   : > { %v2831_v12 = vsel %vm388_vm1, %v6810_v58, %v6811_v4 }
 0x1c8   : > { %v6819_v2 = vpop.permute.xlu0 %6818  ;;  %v2872_v25 = vsel %vm431_vm3, %v2819_v13, %v2831_v12 }
 0x1c9   : > { %v6821_v5 = vunpack.i.h.bf16 %v6819_v2  ;;  %v6820_v6 = vunpack.i.l.bf16 %v6819_v2 }
 0x1cb   : > { %v2974_v23 = vsel %vm388_vm1, %v6820_v6, %v6821_v5  ;;  %v2966_v5 = vld [vmem:[#allocation2 + $0x50] sm:$0xf] }
 0x1cc   : > { %v6829_v63 = vpop.permute.xlu0 %6828  ;;  %v3015_v14 = vsel %vm431_vm3, %v2962_v17, %v2974_v23 }
 0x1cd   : > { %v6831_v33 = vunpack.i.h.bf16 %v6829_v63  ;;  %v6830_v34 = vunpack.i.l.bf16 %v6829_v63 }
 0x1cf   : > { %v2849_v52 = vsel %vm388_vm1, %v6830_v34, %v6831_v33 }
 0x1d0   : > { %v8201_v47 = vpop.permute.xlu1 %438  ;;  %v6839_v59 = vpop.permute.xlu0 %6838 }
 0x1d1   : > { %v6841_v24 = vunpack.i.h.bf16 %v6839_v59  ;;  %v6840_v31 = vunpack.i.l.bf16 %v6839_v59 }
 0x1d2   : > { %v657_v1 = vpop.f32.mrb[0].mxu1 }
 0x1d3   : > { %v658_v10 = vadd.f32 %v657_v1, %v8201_v47  ;;  %v5397_v11 = vpop.f32.mrb[1].mxu1  ;;  %v2864_v45 = vsel %vm388_vm1, %v6840_v31, %v6841_v24 }
 0x1d4   : > { %v6814_v16 = vpop.permute.xlu1 %6813  ;;  %v6849_v55 = vpop.permute.xlu0 %6848  ;;  %v2875_v20 = vsel %vm431_vm3, %v2823_v32, %v2864_v45 }
 0x1d5   : > { %v8209_v28 = vmax.f32 %v658_v10, 0.0  ;;  %v6816_v18 = vunpack.i.h.bf16 %v6814_v16  ;;  %v6815_v19 = vunpack.i.l.bf16 %v6814_v16  ;;  %v6851_v48 = vunpack.i.h.bf16 %v6849_v55 }
 0x1d6   : > { %v799_v22 = vpop.f32.mrb[2].mxu0  ;;  %v6850_v46 = vunpack.i.l.bf16 %v6849_v55 }
 0x1d7   : > { %v672_v26 = vsel %vm8205_vm7, %v8209_v28, 0.0  ;;  %v800_v27 = vadd.f32 %v799_v22, %v8201_v47  ;;  %v5410_v29 = vpop.f32.mrb[3].mxu0  ;;  %v2838_v30 = vsel %vm396_vm2, %v6815_v19, %v6816_v18 }
 0x1d8   : > { %v6857_v15 = vpack.i.bf16 %v672_v26, %v7321_v21  ;;  %v6824_v38 = vpop.permute.xlu1 %6823  ;;  %v2873_v35 = vsel %vm431_vm3, %v2838_v30, %v7162_v9  ;;  %v2999_v4 = vsel %vm396_vm2, %v6850_v46, %v6851_v48  ;;  %v2868_v6 = vpop.permute.xlu0 %2867 }
 0x1d9   : > { %v8220_v37 = vmax.f32 %v800_v27, 0.0  ;;  %v6826_v39 = vunpack.i.h.bf16 %v6824_v38  ;;  %v6825_v40 = vunpack.i.l.bf16 %v6824_v38  ;;  %v6058_v42 = vpack.c.bf16 %v2873_v35, %v2872_v25 }
 0x1da   : > { %6858 = vrot.lane.b32.xlu0 %v6857_v15, %s7319_s9 }
 0x1db   : > { %v815_v43 = vsel %vm8205_vm7, %v8220_v37, 0.0  ;;  %v2981_v44 = vsel %vm396_vm2, %v6825_v40, %v6826_v39  ;;  %6059 = vmatpush3.bf16.msra.mxu1 %v6058_v42 }
 0x1dc   : > { %v6867_v41 = vpack.i.bf16 %v815_v43, %v672_v26  ;;  %v6834_v49 = vpop.permute.xlu1 %6833  ;;  %6060 = vmatprep.subr.bf16.mxu1 %v7318_v8  ;;  %v3016_v50 = vsel %vm431_vm3, %v2981_v44, %v7163_v36 }
 0x1dd   : > { %v6836_v53 = vunpack.i.h.bf16 %v6834_v49  ;;  %v6835_v7 = vunpack.i.l.bf16 %v6834_v49  ;;  %v6064_v54 = vpack.c.bf16 %v3016_v50, %v3015_v14 }
 0x1de   : > { %6863 = vrot.lane.b32.xlu0 %v6857_v15, %s7317_s30  ;;  %6868 = vrot.lane.b32.xlu1 %v6867_v41, %s7319_s9  ;;  %v3011_v22 = vpop.permute.xlu0 %3010 }
 0x1df   : > { %v2856_v57 = vsel %vm396_vm2, %v6835_v7, %v6836_v53  ;;  %6065 = vmatpush3.bf16.msra.mxu0 %v6064_v54 }
 0x1e0   : > { %v6844_v60 = vpop.permute.xlu1 %6843  ;;  %v2874_v62 = vsel %vm431_vm3, %v2849_v52, %v2856_v57  ;;  %6066 = vmatprep.subr.bf16.mxu0 %v7318_v8 }
 0x1e1   : > { %v6846_v56 = vunpack.i.h.bf16 %v6844_v60  ;;  %v6845_v0 = vunpack.i.l.bf16 %v6844_v60  ;;  %v6061_v2 = vpack.c.bf16 %v2875_v20, %v2874_v62 }
 0x1e2   : > { %6873 = vrot.lane.b32.xlu1 %v6867_v41, %s7317_s30 }
 0x1e3   : > { %v2992_v61 = vsel %vm388_vm1, %v6845_v0, %v6846_v56  ;;  %6062 = vmatpush3.bf16.msra.mxu1 %v6061_v2 }
 0x1e4   : > { %v6854_v58 = vpop.permute.xlu1 %6853  ;;  %5601 = vmatprep.subr.mxu1 %v7321_v21  ;;  %v3017_v10 = vsel %vm431_vm3, %v2992_v61, %v2999_v4 }
 0x1e5   : > { %v6856_v63 = vunpack.i.h.bf16 %v6854_v58  ;;  %v6855_v1 = vunpack.i.l.bf16 %v6854_v58 }
 0x1e6   : > { %3128 = vrot.lane.b32.xlu1 %v815_v43, %s7317_s30 }
 0x1e7   : > { %v3007_v11 = vsel %vm388_vm1, %v6855_v1, %v6856_v63 }
 0x1e8   : > { %v2870_v12 = vpop.permute.xlu1 %2869  ;;  %v3018_v13 = vsel %vm431_vm3, %v2966_v5, %v3007_v11 }
 0x1e9   : > { %v2871_v16 = vsel %vm396_vm2, %v2868_v6, %v2870_v12  ;;  %v6067_v9 = vpack.c.bf16 %v3018_v13, %v3017_v10 }
 0x1ea   : > { %v942_v18 = vpop.f32.mrb[2].mxu1  ;;  %5602 = vmatpush3.msk.msra.mxu1 %vm431_vm3, %v2871_v16 }
 0x1eb   : > { %v943_v19 = vadd.f32 %v942_v18, %v8201_v47  ;;  %v5423_v59 = vpop.f32.mrb[3].mxu1  ;;  %6068 = vmatpush3.bf16.msra.mxu0 %v6067_v9  ;;  %6069 = vmatprep.subr.bf16.mxu1 %v7318_v8 }
 0x1ec   : > { %v3013_v23 = vpop.permute.xlu1 %3012  ;;  %5604 = vmatmul.mubr.msk.f32.vlgmr.msra.gmra.mrb[16].mxu1 %vm441_vm4, %v8114_v51  ;;  %5614 = vmatprep.subr.mxu0 %v7321_v21 }
 0x1ed   : > { %v8253_v24 = vmax.f32 %v943_v19, 0.0  ;;  %v3014_v25 = vsel %vm396_vm2, %v3011_v22, %v3013_v23  ;;  %5637 = vmatprep.mubr.msk.f32.mxu1 %vm7320_vm0, %v7321_v21 }
 0x1ef   : > { %v958_v26 = vsel %vm8205_vm7, %v8253_v24, 0.0  ;;  %v1085_v27 = vpop.f32.mrb[4].mxu0  ;;  %5615 = vmatpush3.msk.msra.mxu0 %vm431_vm3, %v3014_v25 }
 0x1f0   : > { %v1086_v29 = vadd.f32 %v1085_v27, %v8201_v47  ;;  %v6877_v30 = vpack.i.bf16 %v958_v26, %v815_v43  ;;  %v5436_v31 = vpop.f32.mrb[5].mxu0  ;;  %6083 = vmatprep.subr.bf16.mxu0 %v7318_v8  ;;  %5617 = vmatmul.mubr.msk.f32.vlgmr.msra.gmra.mrb[18].mxu0 %vm441_vm4, %v8114_v51 }
 0x1f1   : > { %5658 = vmatprep.mubr.msk.f32.mxu0 %vm7320_vm0, %v7321_v21 }
 0x1f2   : > { %v8266_v17 = vmax.f32 %v1086_v29, 0.0  ;;  %6878 = vrot.lane.b32.xlu0 %v6877_v30, %s7319_s9 }
 0x1f4   : > { %v1101_v15 = vsel %vm8205_vm7, %v8266_v17, 0.0 }
 0x1f5   : > { %v6892_v38 = vpack.i.bf16 %v1101_v15, %v958_v26 }
 0x1f6   : > { %3245 = vrot.lane.b32.xlu0 %v958_v26, %s7317_s30 }
 0x1f7   : > { %6893 = vrot.lane.b32.xlu1 %v6892_v38, %s7319_s9 }
 0x1fa   : > { %3137 = vrot.lane.b32.xlu0 %v958_v26, %s7317_s30 }
 0x1fb   : > { %3254 = vrot.lane.b32.xlu1 %v1101_v15, %s7317_s30 }
 0x1fe   : > { %6883 = vrot.lane.b32.xlu0 %v6877_v30, %s7319_s9 }
 0x1ff   : > { %6898 = vrot.lane.b32.xlu1 %v6892_v38, %s7319_s9 }
 0x202   : > { %6888 = vrot.lane.b32.xlu0 %v6877_v30, %s7317_s30 }
 0x203   : > { %6903 = vrot.lane.b32.xlu1 %v6892_v38, %s7317_s30 }
 0x206   : > { %v1228_v51 = vpop.f32.mrb[4].mxu1 }
 0x207   : > { %v1229_v33 = vadd.f32 %v1228_v51, %v8201_v47  ;;  %3353 = vrot.lane.b32.xlu1 %v1101_v15, %s7317_s30  ;;  %v5449_v34 = vpop.f32.mrb[5].mxu1 }
 0x209   : > { %v8284_v35 = vmax.f32 %v1229_v33, 0.0 }
 0x20b   : > { %v1244_v36 = vsel %vm8205_vm7, %v8284_v35, 0.0  ;;  %v1371_v39 = vpop.f32.mrb[6].mxu0 }
 0x20c   : > { %v1372_v40 = vadd.f32 %v1371_v39, %v8201_v47  ;;  %v6907_v42 = vpack.i.bf16 %v1244_v36, %v1101_v15  ;;  %v5462_v14 = vpop.f32.mrb[7].mxu0 }
 0x20e   : > { %v8290_v43 = vmax.f32 %v1372_v40, 0.0  ;;  %6908 = vrot.lane.b32.xlu0 %v6907_v42, %s7319_s9 }
 0x210   : > { %v1387_v44 = vsel %vm8205_vm7, %v8290_v43, 0.0 }
 0x211   : > { %v6922_v45 = vpack.i.bf16 %v1387_v44, %v1244_v36 }
 0x212   : > { %3461 = vrot.lane.b32.xlu0 %v1244_v36, %s7317_s30 }
 0x213   : > { %6923 = vrot.lane.b32.xlu1 %v6922_v45, %s7319_s9 }
 0x216   : > { %3362 = vrot.lane.b32.xlu0 %v1244_v36, %s7317_s30 }
 0x217   : > { %3470 = vrot.lane.b32.xlu1 %v1387_v44, %s7317_s30 }
 0x21a   : > { %6913 = vrot.lane.b32.xlu0 %v6907_v42, %s7319_s9 }
 0x21b   : > { %6928 = vrot.lane.b32.xlu1 %v6922_v45, %s7319_s9 }
 0x21e   : > { %6918 = vrot.lane.b32.xlu0 %v6907_v42, %s7317_s30 }
 0x21f   : > { %6933 = vrot.lane.b32.xlu1 %v6922_v45, %s7317_s30 }
 0x221   : > { %v1514_v32 = vpop.f32.mrb[6].mxu1 }
 0x222   : > { %v1515_v41 = vadd.f32 %v1514_v32, %v8201_v47  ;;  %v5475_v49 = vpop.f32.mrb[7].mxu1 }
 0x223   : > { %3569 = vrot.lane.b32.xlu1 %v1387_v44, %s7317_s30 }
 0x224   : > { %v8306_v50 = vmax.f32 %v1515_v41, 0.0 }
 0x226   : > { %v1530_v52 = vsel %vm8205_vm7, %v8306_v50, 0.0 }
 0x227   : > { %v1657_v53 = vpop.f32.mrb[8].mxu0  ;;  %v6937_v7 = vpack.i.bf16 %v1530_v52, %v1387_v44 }
 0x228   : > { %v1658_v54 = vadd.f32 %v1657_v53, %v8201_v47  ;;  %v5488_v55 = vpop.f32.mrb[9].mxu0 }
 0x229   : > { %6938 = vrot.lane.b32.xlu0 %v6937_v7, %s7319_s9 }
 0x22a   : > { %v8313_v20 = vmax.f32 %v1658_v54, 0.0 }
 0x22c   : > { %v1673_v57 = vsel %vm8205_vm7, %v8313_v20, 0.0 }
 0x22d   : > { %3677 = vrot.lane.b32.xlu0 %v1530_v52, %s7317_s30  ;;  %v6952_v48 = vpack.i.bf16 %v1673_v57, %v1530_v52 }
 0x22f   : > { %6953 = vrot.lane.b32.xlu1 %v6952_v48, %s7319_s9 }
 0x231   : > { %3578 = vrot.lane.b32.xlu0 %v1530_v52, %s7317_s30 }
 0x233   : > { %3686 = vrot.lane.b32.xlu1 %v1673_v57, %s7317_s30 }
 0x235   : > { %6943 = vrot.lane.b32.xlu0 %v6937_v7, %s7319_s9 }
 0x237   : > { %6958 = vrot.lane.b32.xlu1 %v6952_v48, %s7319_s9 }
 0x239   : > { %6948 = vrot.lane.b32.xlu0 %v6937_v7, %s7317_s30 }
 0x23b   : > { %6963 = vrot.lane.b32.xlu1 %v6952_v48, %s7317_s30 }
 0x23d   : > { %v1800_v46 = vpop.f32.mrb[8].mxu1 }
 0x23e   : > { %v1801_v60 = vadd.f32 %v1800_v46, %v8201_v47  ;;  %v5501_v62 = vpop.f32.mrb[9].mxu1 }
 0x23f   : > { %3785 = vrot.lane.b32.xlu1 %v1673_v57, %s7317_s30 }
 0x240   : > { %v8328_v56 = vmax.f32 %v1801_v60, 0.0 }
 0x242   : > { %v1816_v0 = vsel %vm8205_vm7, %v8328_v56, 0.0 }
 0x243   : > { %v1943_v2 = vpop.f32.mrb[10].mxu0  ;;  %v6967_v61 = vpack.i.bf16 %v1816_v0, %v1673_v57 }
 0x244   : > { %v1944_v4 = vadd.f32 %v1943_v2, %v8201_v47  ;;  %v5514_v58 = vpop.f32.mrb[11].mxu0 }
 0x245   : > { %6968 = vrot.lane.b32.xlu0 %v6967_v61, %s7319_s9 }
 0x246   : > { %v8335_v63 = vmax.f32 %v1944_v4, 0.0 }
 0x248   : > { %v1959_v1 = vsel %vm8205_vm7, %v8335_v63, 0.0 }
 0x249   : > { %3893 = vrot.lane.b32.xlu0 %v1816_v0, %s7317_s30  ;;  %v6982_v5 = vpack.i.bf16 %v1959_v1, %v1816_v0 }
 0x24b   : > { %6983 = vrot.lane.b32.xlu1 %v6982_v5, %s7319_s9 }
 0x24c   : > { %v6859_v6 = vpop.permute.xlu0 %6858 }
 0x24d   : > { %v6861_v10 = vunpack.i.h.bf16 %v6859_v6  ;;  %v6860_v11 = vunpack.i.l.bf16 %v6859_v6  ;;  %3794 = vrot.lane.b32.xlu0 %v1816_v0, %s7317_s30 }
 0x24f   : > { %v3115_v12 = vsel %vm388_vm1, %v6860_v11, %v6861_v10  ;;  %3902 = vrot.lane.b32.xlu1 %v1959_v1, %s7317_s30 }
 0x250   : > { %v6070_v13 = vpack.c.bf16 %v3115_v12, %v7321_v21  ;;  %v6864_v16 = vpop.permute.xlu0 %6863  ;;  %v6869_v9 = vpop.permute.xlu1 %6868 }
 0x251   : > { %v6866_v18 = vunpack.i.h.bf16 %v6864_v16  ;;  %v6865_v19 = vunpack.i.l.bf16 %v6864_v16  ;;  %v6871_v59 = vunpack.i.h.bf16 %v6869_v9  ;;  %v6870_v22 = vunpack.i.l.bf16 %v6869_v9  ;;  %6973 = vrot.lane.b32.xlu0 %v6967_v61, %s7319_s9 }
 0x252   : > { %6071 = vmatpush3.bf16.msra.mxu1 %v6070_v13 }
 0x253   : > { %v3121_v25 = vsel %vm396_vm2, %v6865_v19, %v6866_v18  ;;  %v3232_v26 = vsel %vm388_vm1, %v6870_v22, %v6871_v59  ;;  %6988 = vrot.lane.b32.xlu1 %v6982_v5, %s7319_s9  ;;  %6072 = vmatprep.subr.bf16.mxu1 %v7318_v8 }
 0x254   : > { %v6073_v29 = vpack.c.bf16 %v8209_v28, %v3121_v25  ;;  %v6084_v30 = vpack.c.bf16 %v3232_v26, %v8209_v28  ;;  %v6874_v31 = vpop.permute.xlu1 %6873 }
 0x255   : > { %v6876_v15 = vunpack.i.h.bf16 %v6874_v31  ;;  %v6875_v38 = vunpack.i.l.bf16 %v6874_v31  ;;  %6978 = vrot.lane.b32.xlu0 %v6967_v61, %s7317_s30 }
 0x256   : > { %6075 = vmatpush3.bf16.msk.msra.mxu1 %vm8349_vm9, %v6073_v29  ;;  %6086 = vmatpush3.bf16.msk.msra.mxu0 %vm8359_vm10, %v6084_v30 }
 0x257   : > { %v3238_v51 = vsel %vm396_vm2, %v6875_v38, %v6876_v15  ;;  %6993 = vrot.lane.b32.xlu1 %v6982_v5, %s7317_s30  ;;  %6087 = vmatprep.subr.bf16.mxu0 %v7318_v8 }
 0x258   : > { %v6088_v33 = vpack.c.bf16 %v8220_v37, %v3238_v51  ;;  %6076 = vmatprep.subr.bf16.mxu1 %v7318_v8  ;;  %v3129_v41 = vpop.permute.xlu1 %3128 }
 0x259   : > { %v2086_v28 = vpop.f32.mrb[10].mxu1  ;;  %v3130_v54 = vsel %vm396_vm2, %v6866_v18, %v3129_v41 }
 0x25a   : > { %v2087_v34 = vadd.f32 %v2086_v28, %v8201_v47  ;;  %6090 = vmatpush3.bf16.msk.msra.mxu0 %vm8349_vm9, %v6088_v33  ;;  %v5527_v36 = vpop.f32.mrb[11].mxu1 }
 0x25b   : > { %4001 = vrot.lane.b32.xlu1 %v1959_v1, %s7317_s30  ;;  %6091 = vmatprep.subr.bf16.mxu0 %v7318_v8 }
 0x25c   : > { %v8380_v39 = vmax.f32 %v2087_v34, 0.0 }
 0x25e   : > { %v2102_v40 = vsel %vm8205_vm7, %v8380_v39, 0.0 }
 0x25f   : > { %v2229_v42 = vpop.f32.mrb[12].mxu0  ;;  %v6997_v14 = vpack.i.bf16 %v2102_v40, %v1959_v1 }
 0x260   : > { %v2230_v44 = vadd.f32 %v2229_v42, %v8201_v47  ;;  %v5540_v45 = vpop.f32.mrb[13].mxu0 }
 0x261   : > { %6998 = vrot.lane.b32.xlu0 %v6997_v14, %s7319_s9 }
 0x262   : > { %v8387_v32 = vmax.f32 %v2230_v44, 0.0 }
 0x264   : > { %v8392_v49 = vsel %vm8205_vm7, %v8387_v32, 0.0  ;;  %v6879_v52 = vpop.permute.xlu0 %6878 }
 0x265   : > { %v6881_v53 = vunpack.i.h.bf16 %v6879_v52  ;;  %v6880_v7 = vunpack.i.l.bf16 %v6879_v52  ;;  %4109 = vrot.lane.b32.xlu0 %v2102_v40, %s7317_s30  ;;  %v7012_v55 = vpack.i.bf16 %v8392_v49, %v2102_v40 }
 0x267   : > { %v3126_v57 = vsel %vm388_vm1, %v6861_v10, %v6880_v7  ;;  %7013 = vrot.lane.b32.xlu1 %v7012_v55, %s7319_s9  ;;  %v3243_v48 = vsel %vm388_vm1, %v6871_v59, %v6881_v53  ;;  %v8428_v59 = vld [vmem:[%s8952_s4] sm:$0xff] }
 0x268   : > { %v6077_v46 = vpack.c.bf16 %v3130_v54, %v3126_v57  ;;  %v3246_v60 = vpop.permute.xlu0 %3245 }
 0x269   : > { %v3247_v62 = vsel %vm396_vm2, %v6876_v15, %v3246_v60  ;;  %v6894_v0 = vpop.permute.xlu1 %6893  ;;  %4010 = vrot.lane.b32.xlu0 %v2102_v40, %s7317_s30 }
 0x26a   : > { %v6092_v2 = vpack.c.bf16 %v3247_v62, %v3243_v48  ;;  %v6896_v61 = vunpack.i.h.bf16 %v6894_v0  ;;  %v6895_v4 = vunpack.i.l.bf16 %v6894_v0  ;;  %6078 = vmatpush3.bf16.msra.mxu1 %v6077_v46 }
 0x26b   : > { %4118 = vrot.lane.b32.xlu1 %v8392_v49, %s7317_s30  ;;  %6079 = vmatprep.subr.bf16.mxu1 %v7318_v8 }
 0x26c   : > { %v3252_v58 = vsel %vm388_vm1, %v6881_v53, %v6896_v61  ;;  %v3135_v1 = vsel %vm388_vm1, %v6880_v7, %v6895_v4  ;;  %v3138_v5 = vpop.permute.xlu0 %3137  ;;  %6093 = vmatpush3.bf16.msra.mxu0 %v6092_v2 }
 0x26d   : > { %v6095_v6 = vpack.c.bf16 %v3252_v58, %v8253_v24  ;;  %v6080_v10 = vpack.c.bf16 %v3135_v1, %v8220_v37  ;;  %v3255_v11 = vpop.permute.xlu1 %3254  ;;  %7003 = vrot.lane.b32.xlu0 %v6997_v14, %s7319_s9  ;;  %6094 = vmatprep.subr.bf16.mxu0 %v7318_v8  ;;  %v3139_v12 = vsel %vm396_vm2, %v3129_v41, %v3138_v5 }
 0x26e   : > { %v3256_v16 = vsel %vm396_vm2, %v3246_v60, %v3255_v11 }
 0x26f   : > { %6082 = vmatpush3.bf16.msk.msra.mxu1 %vm8359_vm10, %v6080_v10  ;;  %7018 = vrot.lane.b32.xlu1 %v7012_v55, %s7319_s9 }
 0x270   : > { %v8415_v13 = vpop.permute.xlu0 %6883  ;;  %6097 = vmatpush3.bf16.msk.msra.mxu0 %vm8359_vm10, %v6095_v6  ;;  %5635 = vmatprep.subr.mxu1 %v7321_v21 }
 0x271   : > { %v6886_v9 = vunpack.i.h.bf16 %v8415_v13  ;;  %v6885_v18 = vunpack.i.l.bf16 %v8415_v13  ;;  %v6899_v19 = vpop.permute.xlu1 %6898  ;;  %7008 = vrot.lane.b32.xlu0 %v6997_v14, %s7317_s30  ;;  %5656 = vmatprep.subr.mxu0 %v7321_v21 }
 0x272   : > { %v6901_v22 = vunpack.i.h.bf16 %v6899_v19  ;;  %v6900_v25 = vunpack.i.l.bf16 %v6899_v19 }
 0x273   : > { %v3340_v26 = vsel %vm388_vm1, %v6885_v18, %v6886_v9  ;;  %5636 = vmatpush3.msra.mxu1 %v3139_v12  ;;  %7023 = vrot.lane.b32.xlu1 %v7012_v55, %s7317_s30 }
 0x274   : > { %v6099_v29 = vpack.c.bf16 %v3340_v26, %v8220_v37  ;;  %v3448_v30 = vsel %vm388_vm1, %v6900_v25, %v6901_v22  ;;  %v6889_v31 = vpop.permute.xlu0 %6888  ;;  %5638 = vmatmul.mubr.msk.f32.vlgmr.msra.gmra.mrb[18].mxu1 %vm3146_vm11, %v8428_v59  ;;  %5657 = vmatpush3.msra.mxu0 %v3256_v16 }
 0x275   : > { %v6114_v15 = vpack.c.bf16 %v3448_v30, %v8253_v24  ;;  %v6891_v38 = vunpack.i.h.bf16 %v6889_v31  ;;  %v6890_v51 = vunpack.i.l.bf16 %v6889_v31  ;;  %v6904_v33 = vpop.permute.xlu1 %6903  ;;  %5659 = vmatmul.mubr.msk.f32.vlgmr.msra.gmra.mrb[20].mxu0 %vm3146_vm11, %v8428_v59  ;;  %6098 = vmatprep.subr.bf16.mxu1 %v7318_v8  ;;  %v2372_v28 = vpop.f32.mrb[12].mxu1 }
 0x276   : > { %v6906_v34 = vunpack.i.h.bf16 %v6904_v33  ;;  %v6905_v37 = vunpack.i.l.bf16 %v6904_v33  ;;  %v2373_v36 = vadd.f32 %v2372_v28, %v8201_v47  ;;  %6101 = vmatpush3.bf16.msk.msra.mxu1 %vm8359_vm10, %v6099_v29  ;;  %6113 = vmatprep.subr.bf16.mxu0 %v7318_v8  ;;  %v5553_v40 = vpop.f32.mrb[13].mxu1 }
 0x277   : > { %v3346_v42 = vsel %vm396_vm2, %v6890_v51, %v6891_v38  ;;  %6116 = vmatpush3.bf16.msk.msra.mxu0 %vm8359_vm10, %v6114_v15  ;;  %4217 = vrot.lane.b32.xlu1 %v8392_v49, %s7317_s30 }
 0x278   : > { %v6103_v14 = vpack.c.bf16 %v8253_v24, %v3346_v42  ;;  %v3454_v44 = vsel %vm396_vm2, %v6905_v37, %v6906_v34  ;;  %v8451_v45 = vmax.f32 %v2373_v36, 0.0  ;;  %6102 = vmatprep.subr.bf16.mxu1 %v7318_v8  ;;  %6117 = vmatprep.subr.bf16.mxu0 %v7318_v8 }
 0x279   : > { %v6118_v41 = vpack.c.bf16 %v8266_v17, %v3454_v44  ;;  %5679 = vmatprep.mubr.msk.f32.mxu1 %vm7320_vm0, %v7321_v21  ;;  %5700 = vmatprep.mubr.msk.f32.mxu0 %vm7320_vm0, %v7321_v21  ;;  %v3354_v57 = vpop.permute.xlu1 %3353 }
 0x27a   : > { %v2388_v24 = vsel %vm8205_vm7, %v8451_v45, 0.0  ;;  %6105 = vmatpush3.bf16.msk.msra.mxu1 %vm8349_vm9, %v6103_v14  ;;  %v3355_v62 = vsel %vm396_vm2, %v6891_v38, %v3354_v57 }
 0x27b   : > { %v2515_v52 = vpop.f32.mrb[14].mxu0  ;;  %6120 = vmatpush3.bf16.msk.msra.mxu0 %vm8349_vm9, %v6118_v41  ;;  %v7027_v53 = vpack.i.bf16 %v2388_v24, %v8392_v49  ;;  %6106 = vmatprep.subr.bf16.mxu1 %v7318_v8 }
 0x27c   : > { %v2516_v7 = vadd.f32 %v2515_v52, %v8201_v47  ;;  %v5566_v54 = vpop.f32.mrb[15].mxu0  ;;  %6121 = vmatprep.subr.bf16.mxu0 %v7318_v8 }
 0x27d   : > { %7028 = vrot.lane.b32.xlu0 %v7027_v53, %s7319_s9 }
 0x27e   : > { %v8472_v55 = vmax.f32 %v2516_v7, 0.0 }
 0x280   : > { %v8477_v48 = vsel %vm8205_vm7, %v8472_v55, 0.0  ;;  %v6909_v46 = vpop.permute.xlu0 %6908 }
 0x281   : > { %v6911_v60 = vunpack.i.h.bf16 %v6909_v46  ;;  %v6910_v49 = vunpack.i.l.bf16 %v6909_v46  ;;  %4325 = vrot.lane.b32.xlu0 %v2388_v24, %s7317_s30  ;;  %v7042_v0 = vpack.i.bf16 %v8477_v48, %v2388_v24 }
 0x283   : > { %v3351_v2 = vsel %vm388_vm1, %v6886_v9, %v6910_v49  ;;  %7043 = vrot.lane.b32.xlu1 %v7042_v0, %s7319_s9  ;;  %v3459_v61 = vsel %vm388_vm1, %v6901_v22, %v6911_v60 }
 0x284   : > { %v6107_v4 = vpack.c.bf16 %v3355_v62, %v3351_v2  ;;  %v3462_v58 = vpop.permute.xlu0 %3461 }
 0x285   : > { %v3463_v1 = vsel %vm396_vm2, %v6906_v34, %v3462_v58  ;;  %v6924_v5 = vpop.permute.xlu1 %6923  ;;  %4226 = vrot.lane.b32.xlu0 %v2388_v24, %s7317_s30 }
 0x286   : > { %v6122_v6 = vpack.c.bf16 %v3463_v1, %v3459_v61  ;;  %v6926_v10 = vunpack.i.h.bf16 %v6924_v5  ;;  %v6925_v11 = vunpack.i.l.bf16 %v6924_v5  ;;  %6108 = vmatpush3.bf16.msra.mxu1 %v6107_v4 }
 0x287   : > { %4334 = vrot.lane.b32.xlu1 %v8477_v48, %s7317_s30  ;;  %6109 = vmatprep.subr.bf16.mxu1 %v7318_v8 }
 0x288   : > { %v3468_v12 = vsel %vm388_vm1, %v6911_v60, %v6926_v10  ;;  %v3360_v13 = vsel %vm388_vm1, %v6910_v49, %v6925_v11  ;;  %v3363_v16 = vpop.permute.xlu0 %3362  ;;  %6123 = vmatpush3.bf16.msra.mxu0 %v6122_v6 }
 0x289   : > { %v6125_v9 = vpack.c.bf16 %v3468_v12, %v8284_v35  ;;  %v6110_v18 = vpack.c.bf16 %v3360_v13, %v8266_v17  ;;  %v3471_v19 = vpop.permute.xlu1 %3470  ;;  %7033 = vrot.lane.b32.xlu0 %v7027_v53, %s7319_s9  ;;  %6124 = vmatprep.subr.bf16.mxu0 %v7318_v8  ;;  %v3364_v30 = vsel %vm396_vm2, %v3354_v57, %v3363_v16 }
 0x28a   : > { %v3472_v38 = vsel %vm396_vm2, %v3462_v58, %v3471_v19 }
 0x28b   : > { %6112 = vmatpush3.bf16.msk.msra.mxu1 %vm8359_vm10, %v6110_v18  ;;  %7048 = vrot.lane.b32.xlu1 %v7042_v0, %s7319_s9 }
 0x28c   : > { %v8499_v22 = vpop.permute.xlu0 %6913  ;;  %6127 = vmatpush3.bf16.msk.msra.mxu0 %vm8359_vm10, %v6125_v9  ;;  %5677 = vmatprep.subr.mxu1 %v7321_v21 }
 0x28d   : > { %v6916_v25 = vunpack.i.h.bf16 %v8499_v22  ;;  %v6915_v26 = vunpack.i.l.bf16 %v8499_v22  ;;  %v8506_v29 = vpop.permute.xlu1 %6928  ;;  %7038 = vrot.lane.b32.xlu0 %v7027_v53, %s7317_s30  ;;  %5698 = vmatprep.subr.mxu0 %v7321_v21 }
 0x28e   : > { %v6931_v31 = vunpack.i.h.bf16 %v8506_v29  ;;  %v6930_v15 = vunpack.i.l.bf16 %v8506_v29 }
 0x28f   : > { %v3556_v51 = vsel %vm388_vm1, %v6915_v26, %v6916_v25  ;;  %5678 = vmatpush3.msra.mxu1 %v3364_v30  ;;  %7053 = vrot.lane.b32.xlu1 %v7042_v0, %s7317_s30 }
 0x290   : > { %v6129_v33 = vpack.c.bf16 %v3556_v51, %v8266_v17  ;;  %v3664_v28 = vsel %vm388_vm1, %v6930_v15, %v6931_v31  ;;  %v6919_v34 = vpop.permute.xlu0 %6918  ;;  %5680 = vmatmul.mubr.msk.f32.vlgmr.msra.gmra.mrb[20].mxu1 %vm3146_vm11, %v8428_v59  ;;  %5699 = vmatpush3.msra.mxu0 %v3472_v38 }
 0x291   : > { %v6144_v37 = vpack.c.bf16 %v3664_v28, %v8284_v35  ;;  %v6921_v36 = vunpack.i.h.bf16 %v6919_v34  ;;  %v6920_v40 = vunpack.i.l.bf16 %v6919_v34  ;;  %v6934_v42 = vpop.permute.xlu1 %6933  ;;  %5701 = vmatmul.mubr.msk.f32.vlgmr.msra.gmra.mrb[22].mxu0 %vm3146_vm11, %v8428_v59  ;;  %6128 = vmatprep.subr.bf16.mxu1 %v7318_v8  ;;  %v2658_v14 = vpop.f32.mrb[14].mxu1 }
 0x292   : > { %v6936_v44 = vunpack.i.h.bf16 %v6934_v42  ;;  %v6935_v17 = vunpack.i.l.bf16 %v6934_v42  ;;  %v2659_v41 = vadd.f32 %v2658_v14, %v8201_v47  ;;  %6131 = vmatpush3.bf16.msk.msra.mxu1 %vm8359_vm10, %v6129_v33  ;;  %6143 = vmatprep.subr.bf16.mxu0 %v7318_v8  ;;  %v5579_v24 = vpop.f32.mrb[15].mxu1 }
 0x293   : > { %v3562_v52 = vsel %vm396_vm2, %v6920_v40, %v6921_v36  ;;  %6146 = vmatpush3.bf16.msk.msra.mxu0 %vm8359_vm10, %v6144_v37  ;;  %4433 = vrot.lane.b32.xlu1 %v8477_v48, %s7317_s30 }
 0x294   : > { %v6133_v53 = vpack.c.bf16 %v8284_v35, %v3562_v52  ;;  %v3670_v7 = vsel %vm396_vm2, %v6935_v17, %v6936_v44  ;;  %v8535_v54 = vmax.f32 %v2659_v41, 0.0  ;;  %6132 = vmatprep.subr.bf16.mxu1 %v7318_v8  ;;  %6147 = vmatprep.subr.bf16.mxu0 %v7318_v8 }
 0x295   : > { %v6148_v57 = vpack.c.bf16 %v8290_v43, %v3670_v7  ;;  %5721 = vmatprep.mubr.msk.f32.mxu1 %vm7320_vm0, %v7321_v21  ;;  %5742 = vmatprep.mubr.msk.f32.mxu0 %vm7320_vm0, %v7321_v21  ;;  %v3570_v2 = vpop.permute.xlu1 %3569 }
 0x296   : > { %v2674_v35 = vsel %vm8205_vm7, %v8535_v54, 0.0  ;;  %6135 = vmatpush3.bf16.msk.msra.mxu1 %vm8349_vm9, %v6133_v53  ;;  %v3571_v1 = vsel %vm396_vm2, %v6921_v36, %v3570_v2 }
 0x297   : > { %v2801_v46 = vpop.f32.mrb[16].mxu0  ;;  %6150 = vmatpush3.bf16.msk.msra.mxu0 %vm8349_vm9, %v6148_v57  ;;  %v8552_v60 = vpack.i.bf16 %v2674_v35, %v8477_v48  ;;  %6136 = vmatprep.subr.bf16.mxu1 %v7318_v8 }
 0x298   : > { %v2802_v49 = vadd.f32 %v2801_v46, %v8201_v47  ;;  %v5592_v62 = vpop.f32.mrb[17].mxu0  ;;  %6151 = vmatprep.subr.bf16.mxu0 %v7318_v8 }
 0x299   : > { %7058 = vrot.lane.b32.xlu0 %v8552_v60, %s7319_s9  ;;  %v370_v62 = vld [vmem:[%s8953_s5] sm:$0xff] }
 0x29a   : > { %v8559_v0 = vmax.f32 %v2802_v49, 0.0 }
 0x29b   : > { %v6939_v61 = vpop.permute.xlu0 %6938 }
 0x29c   : > { %v8564_v4 = vsel %vm8205_vm7, %v8559_v0, 0.0  ;;  %v6941_v48 = vunpack.i.h.bf16 %v6939_v61  ;;  %v6940_v58 = vunpack.i.l.bf16 %v6939_v61 }
 0x29d   : > { %4541 = vrot.lane.b32.xlu0 %v2674_v35, %s7317_s30  ;;  %v7072_v47 = vpack.i.bf16 %v8564_v4, %v2674_v35 }
 0x29e   : > { %v3567_v5 = vsel %vm388_vm1, %v6916_v25, %v6940_v58  ;;  %v3675_v11 = vsel %vm388_vm1, %v6931_v31, %v6941_v48 }
 0x29f   : > { %v6137_v6 = vpack.c.bf16 %v3571_v1, %v3567_v5  ;;  %7073 = vrot.lane.b32.xlu1 %v7072_v47, %s7319_s9  ;;  %v3678_v10 = vpop.permute.xlu0 %3677 }
 0x2a0   : > { %v3679_v3 = vsel %vm396_vm2, %v6936_v44, %v3678_v10 }
 0x2a1   : > { %v6152_v12 = vpack.c.bf16 %v3679_v3, %v3675_v11  ;;  %v6954_v13 = vpop.permute.xlu1 %6953  ;;  %6138 = vmatpush3.bf16.msra.mxu1 %v6137_v6  ;;  %4758 = vrot.lane.b32.xlu0 %v7321_v21, %s7317_s30 }
 0x2a2   : > { %v6956_v16 = vunpack.i.h.bf16 %v6954_v13  ;;  %v6955_v9 = vunpack.i.l.bf16 %v6954_v13  ;;  %6139 = vmatprep.subr.bf16.mxu1 %v7318_v8 }
 0x2a3   : > { %4550 = vrot.lane.b32.xlu1 %v8564_v4, %s7317_s30  ;;  %v3579_v18 = vpop.permute.xlu0 %3578  ;;  %6153 = vmatpush3.bf16.msra.mxu0 %v6152_v12 }
 0x2a4   : > { %v3684_v19 = vsel %vm388_vm1, %v6941_v48, %v6956_v16  ;;  %v3576_v22 = vsel %vm388_vm1, %v6940_v58, %v6955_v9  ;;  %6154 = vmatprep.subr.bf16.mxu0 %v7318_v8  ;;  %v3580_v51 = vsel %vm396_vm2, %v3570_v2, %v3579_v18 }
 0x2a5   : > { %v6155_v25 = vpack.c.bf16 %v3684_v19, %v8306_v50  ;;  %v6140_v26 = vpack.c.bf16 %v3576_v22, %v8290_v43  ;;  %v3687_v29 = vpop.permute.xlu1 %3686  ;;  %4442 = vrot.lane.b32.xlu0 %v2674_v35, %s7317_s30 }
 0x2a6   : > { %v3688_v37 = vsel %vm396_vm2, %v3678_v10, %v3687_v29 }
 0x2a7   : > { %6142 = vmatpush3.bf16.msk.msra.mxu1 %vm8359_vm10, %v6140_v26  ;;  %7078 = vrot.lane.b32.xlu1 %v7072_v47, %s7319_s9  ;;  %v6944_v30 = vpop.permute.xlu0 %6943 }
 0x2a8   : > { %v6946_v31 = vunpack.i.h.bf16 %v6944_v30  ;;  %v6945_v15 = vunpack.i.l.bf16 %v6944_v30  ;;  %6157 = vmatpush3.bf16.msk.msra.mxu0 %vm8359_vm10, %v6155_v25  ;;  %5719 = vmatprep.subr.mxu1 %v7321_v21 }
 0x2a9   : > { %v6959_v38 = vpop.permute.xlu1 %6958  ;;  %7063 = vrot.lane.b32.xlu0 %v8552_v60, %s7319_s9  ;;  %5740 = vmatprep.subr.mxu0 %v7321_v21 }
 0x2aa   : > { %v3772_v33 = vsel %vm388_vm1, %v6945_v15, %v6946_v31  ;;  %v6961_v28 = vunpack.i.h.bf16 %v6959_v38  ;;  %v6960_v34 = vunpack.i.l.bf16 %v6959_v38 }
 0x2ab   : > { %v6159_v36 = vpack.c.bf16 %v3772_v33, %v8290_v43  ;;  %5720 = vmatpush3.msra.mxu1 %v3580_v51  ;;  %7083 = vrot.lane.b32.xlu1 %v7072_v47, %s7317_s30  ;;  %v6949_v40 = vpop.permute.xlu0 %6948 }
 0x2ac   : > { %v3880_v42 = vsel %vm388_vm1, %v6960_v34, %v6961_v28  ;;  %v6951_v14 = vunpack.i.h.bf16 %v6949_v40  ;;  %v6950_v44 = vunpack.i.l.bf16 %v6949_v40  ;;  %5722 = vmatmul.mubr.msk.f32.vlgmr.msra.gmra.mrb[22].mxu1 %vm3146_vm11, %v8428_v59  ;;  %5741 = vmatpush3.msra.mxu0 %v3688_v37 }
 0x2ad   : > { %v6174_v17 = vpack.c.bf16 %v3880_v42, %v8306_v50  ;;  %v6964_v41 = vpop.permute.xlu1 %6963  ;;  %5743 = vmatmul.mubr.msk.f32.vlgmr.msra.gmra.mrb[24].mxu0 %vm3146_vm11, %v8428_v59  ;;  %6158 = vmatprep.subr.bf16.mxu1 %v7318_v8 }
 0x2ae   : > { %v3778_v43 = vsel %vm396_vm2, %v6950_v44, %v6951_v14  ;;  %v6966_v24 = vunpack.i.h.bf16 %v6964_v41  ;;  %v6965_v52 = vunpack.i.l.bf16 %v6964_v41  ;;  %6161 = vmatpush3.bf16.msk.msra.mxu1 %vm8359_vm10, %v6159_v36  ;;  %6173 = vmatprep.subr.bf16.mxu0 %v7318_v8 }
 0x2af   : > { %v6163_v53 = vpack.c.bf16 %v8306_v50, %v3778_v43  ;;  %7068 = vrot.lane.b32.xlu0 %v8552_v60, %s7317_s30  ;;  %6176 = vmatpush3.bf16.msk.msra.mxu0 %vm8359_vm10, %v6174_v17  ;;  %v7087_v50 = vpack.i.bf16 %v7321_v21, %v8564_v4 }
 0x2b0   : > { %v3886_v7 = vsel %vm396_vm2, %v6965_v52, %v6966_v24  ;;  %4649 = vrot.lane.b32.xlu1 %v8564_v4, %s7317_s30  ;;  %6162 = vmatprep.subr.bf16.mxu1 %v7318_v8 }
 0x2b1   : > { %v6178_v57 = vpack.c.bf16 %v8313_v20, %v3886_v7  ;;  %6177 = vmatprep.subr.bf16.mxu0 %v7318_v8  ;;  %5763 = vmatprep.mubr.msk.f32.mxu1 %vm7320_vm0, %v7321_v21  ;;  %v3786_v35 = vpop.permute.xlu1 %3785 }
 0x2b2   : > { %6165 = vmatpush3.bf16.msk.msra.mxu1 %vm8349_vm9, %v6163_v53  ;;  %5784 = vmatprep.mubr.msk.f32.mxu0 %vm7320_vm0, %v7321_v21  ;;  %v3787_v2 = vsel %vm396_vm2, %v6951_v14, %v3786_v35 }
 0x2b3   : > { %7088 = vrot.lane.b32.xlu0 %v7087_v50, %s7319_s9  ;;  %6180 = vmatpush3.bf16.msk.msra.mxu0 %vm8349_vm9, %v6178_v57 }
 0x2b4   : > { %7093 = vrot.lane.b32.xlu1 %v7321_v21, %s7319_s9  ;;  %6166 = vmatprep.subr.bf16.mxu1 %v7318_v8 }
 0x2b5   : > { %6181 = vmatprep.subr.bf16.mxu0 %v7318_v8 }
 0x2b7   : > { %v6969_v46 = vpop.permute.xlu0 %6968  ;;  %4766 = vrot.lane.b32.xlu0 %v7321_v21, %s7319_s9  ;;  %s5051_s9 = sshll.u32 %s7305_s24, 11  ;;  %s4849_s24 = scalar_lea.sflag [#allocation6], %s7513_s16 }
 0x2b8   : > { %7098 = vrot.lane.b32.xlu1 %v7321_v21, %s7317_s30  ;;  %v6971_v60 = vunpack.i.h.bf16 %v6969_v46  ;;  %v6970_v49 = vunpack.i.l.bf16 %v6969_v46  ;;  %s8897_s7 = scalar_lea.hbm %s8954_s6, %s5051_s9 }
 0x2ba   : > { %v3783_v61 = vsel %vm388_vm1, %v6946_v31, %v6970_v49  ;;  %v3891_v58 = vsel %vm388_vm1, %v6961_v28, %v6971_v60 }
 0x2bb   : > { %v6167_v4 = vpack.c.bf16 %v3787_v2, %v3783_v61  ;;  %v3894_v48 = vpop.permute.xlu0 %3893  ;;  %4772 = vrot.lane.b32.xlu0 %v7321_v21, %s7317_s30  ;;  %s8862_s30 = scalar_lea.vmem [#allocation9], %s4989_s27 }
 0x2bc   : > { %3143 = vperm.xlu1 %6806, %v370_v62   ;;  %v3895_v47 = vsel %vm396_vm2, %v6966_v24, %v3894_v48  ;;  %s4865_s17 = sshll.u32 %s8862_s30, 4  ;;  %s8899_s17 = int_to_ptr.vmem [resolvable:$true] %s4865_s17 }
 0x2bd   : > { %v6182_v1 = vpack.c.bf16 %v3895_v47, %v3891_v58  ;;  %v6984_v5 = vpop.permute.xlu1 %6983  ;;  %6168 = vmatpush3.bf16.msra.mxu1 %v6167_v4  ;;  %s7227_s13 = scalar_lea.vmem %s8899_s17, 2048  ;;  %p7234_p10 = scmp.lt.s32.totalorder %s8899_s17, %s7232_s29 }
 0x2be   : > { %v6986_v6 = vunpack.i.h.bf16 %v6984_v5  ;;  %v6985_v10 = vunpack.i.l.bf16 %v6984_v5  ;;  %6169 = vmatprep.subr.bf16.mxu1 %v7318_v8  ;;  %p7228_p0 = scmp.ne.s32.totalorder %s8899_s17, %s7227_s13  ;;  %p7235_p12 = scmp.lt.s32.totalorder %s7233_s8, %s7227_s13 }
 0x2bf   : > { %v3795_v11 = vpop.permute.xlu0 %3794  ;;  %6183 = vmatpush3.bf16.msra.mxu0 %v6182_v1  ;;  %v2944_v3 = vpop.f32.mrb[16].mxu1 }
 0x2c0   : > { %v3900_v12 = vsel %vm388_vm1, %v6971_v60, %v6986_v6  ;;  %v3792_v13 = vsel %vm388_vm1, %v6970_v49, %v6985_v10  ;;  %6184 = vmatprep.subr.bf16.mxu0 %v7318_v8  ;;  %v5605_v16 = vpop.f32.mrb[17].mxu1  ;;  %v3796_v30 = vsel %vm396_vm2, %v3786_v35, %v3795_v11  ;;  %p7229_p7 = pnand %p7228_p0, %p8979_p5  ;;  %p7236_p1 = por %p7235_p12, %p7234_p10 }
 0x2c1   : > { %v6185_v9 = vpack.c.bf16 %v3900_v12, %v8328_v56  ;;  %v6170_v18 = vpack.c.bf16 %v3792_v13, %v8313_v20  ;;  %v3903_v19 = vpop.permute.xlu1 %3902 }
 0x2c2   : > { %v3904_v38 = vsel %vm396_vm2, %v3894_v48, %v3903_v19  ;;  %p7230_p4 = pneg %p7229_p7 }
 0x2c3   : > { %6172 = vmatpush3.bf16.msk.msra.mxu1 %vm8359_vm10, %v6170_v18  ;;  %v6974_v22 = vpop.permute.xlu0 %6973  ;;  %6187 = vmatpush3.bf16.msk.msra.mxu0 %vm8359_vm10, %v6185_v9  ;;  %v3087_v29 = vpop.f32.mrb[18].mxu0 }
 0x2c4   : > { %v6976_v25 = vunpack.i.h.bf16 %v6974_v22  ;;  %v6975_v26 = vunpack.i.l.bf16 %v6974_v22  ;;  %5761 = vmatprep.subr.mxu1 %v7321_v21  ;;  %5782 = vmatprep.subr.mxu0 %v7321_v21  ;;  %v5618_v15 = vpop.f32.mrb[19].mxu0  ;;  %p7237_p2 = pnand %p7236_p1, %p7230_p4 }
 0x2c5   : > { %v6989_v31 = vpop.permute.xlu1 %6988 }
 0x2c6   : > { %v3988_v51 = vsel %vm388_vm1, %v6975_v26, %v6976_v25  ;;  %v6991_v33 = vunpack.i.h.bf16 %v6989_v31  ;;  %v6990_v28 = vunpack.i.l.bf16 %v6989_v31 }
 0x2c7   : > { %v6189_v34 = vpack.c.bf16 %v3988_v51, %v8313_v20  ;;  %5762 = vmatpush3.msra.mxu1 %v3796_v30  ;;  %v6979_v37 = vpop.permute.xlu0 %6978  ;;  %5783 = vmatpush3.msra.mxu0 %v3904_v38 }
 0x2c8   : > { %v4096_v36 = vsel %vm388_vm1, %v6990_v28, %v6991_v33  ;;  %v6981_v40 = vunpack.i.h.bf16 %v6979_v37  ;;  %v6980_v42 = vunpack.i.l.bf16 %v6979_v37  ;;  %5764 = vmatmul.mubr.msk.f32.vlgmr.msra.gmra.mrb[24].mxu1 %vm3146_vm11, %v8428_v59  ;;  %5785 = vmatmul.mubr.msk.f32.vlgmr.msra.gmra.mrb[26].mxu0 %vm3146_vm11, %v8428_v59 }
 0x2c9   : > { %v6204_v14 = vpack.c.bf16 %v4096_v36, %v8328_v56  ;;  %v6994_v44 = vpop.permute.xlu1 %6993  ;;  %6188 = vmatprep.subr.bf16.mxu1 %v7318_v8  ;;  %6203 = vmatprep.subr.bf16.mxu0 %v7318_v8 }
 0x2ca   : > { %v3994_v20 = vsel %vm396_vm2, %v6980_v42, %v6981_v40  ;;  %v6996_v17 = vunpack.i.h.bf16 %v6994_v44  ;;  %v6995_v41 = vunpack.i.l.bf16 %v6994_v44  ;;  %6191 = vmatpush3.bf16.msk.msra.mxu1 %vm8359_vm10, %v6189_v34  ;;  %5805 = vmatprep.mubr.msk.f32.mxu1 %vm7320_vm0, %v7321_v21 }
 0x2cb   : > { %v6193_v43 = vpack.c.bf16 %v8328_v56, %v3994_v20  ;;  %6206 = vmatpush3.bf16.msk.msra.mxu0 %vm8359_vm10, %v6204_v14  ;;  %6192 = vmatprep.subr.bf16.mxu1 %v7318_v8 }
 0x2cc   : > { %v4102_v24 = vsel %vm396_vm2, %v6995_v41, %v6996_v17  ;;  %6207 = vmatprep.subr.bf16.mxu0 %v7318_v8  ;;  %5826 = vmatprep.mubr.msk.f32.mxu0 %vm7320_vm0, %v7321_v21 }
 0x2cd   : > { %v6208_v52 = vpack.c.bf16 %v8335_v63, %v4102_v24  ;;  %v4002_v56 = vpop.permute.xlu1 %4001 }
 0x2ce   : > { %6195 = vmatpush3.bf16.msk.msra.mxu1 %vm8349_vm9, %v6193_v43  ;;  %v4003_v50 = vsel %vm396_vm2, %v6981_v40, %v4002_v56 }
 0x2cf   : > { %6210 = vmatpush3.bf16.msk.msra.mxu0 %vm8349_vm9, %v6208_v52  ;;  %6196 = vmatprep.subr.bf16.mxu1 %v7318_v8 }
 0x2d0   : > { %6211 = vmatprep.subr.bf16.mxu0 %v7318_v8 }
 0x2d3   : > { %v6999_v53 = vpop.permute.xlu0 %6998 }
 0x2d4   : > { %v7001_v7 = vunpack.i.h.bf16 %v6999_v53  ;;  %v7000_v57 = vunpack.i.l.bf16 %v6999_v53 }
 0x2d6   : > { %v3999_v35 = vsel %vm388_vm1, %v6976_v25, %v7000_v57  ;;  %v4107_v49 = vsel %vm388_vm1, %v6991_v33, %v7001_v7 }
 0x2d7   : > { %v6197_v46 = vpack.c.bf16 %v4003_v50, %v3999_v35  ;;  %v4110_v60 = vpop.permute.xlu0 %4109 }
 0x2d8   : > { %v4111_v62 = vsel %vm396_vm2, %v6996_v17, %v4110_v60 }
 0x2d9   : > { %v6212_v2 = vpack.c.bf16 %v4111_v62, %v4107_v49  ;;  %v7014_v61 = vpop.permute.xlu1 %7013  ;;  %6198 = vmatpush3.bf16.msra.mxu1 %v6197_v46 }
 0x2da   : > { %v7016_v4 = vunpack.i.h.bf16 %v7014_v61  ;;  %v7015_v48 = vunpack.i.l.bf16 %v7014_v61  ;;  %6199 = vmatprep.subr.bf16.mxu1 %v7318_v8 }
 0x2db   : > { %v4011_v58 = vpop.permute.xlu0 %4010  ;;  %6213 = vmatpush3.bf16.msra.mxu0 %v6212_v2 }
 0x2dc   : > { %v4116_v47 = vsel %vm388_vm1, %v7001_v7, %v7016_v4  ;;  %v4008_v1 = vsel %vm388_vm1, %v7000_v57, %v7015_v48  ;;  %6214 = vmatprep.subr.bf16.mxu0 %v7318_v8  ;;  %v4012_v13 = vsel %vm396_vm2, %v4002_v56, %v4011_v58 }
 0x2dd   : > { %v6215_v5 = vpack.c.bf16 %v4116_v47, %v8380_v39  ;;  %v6200_v6 = vpack.c.bf16 %v4008_v1, %v8335_v63  ;;  %v4119_v10 = vpop.permute.xlu1 %4118 }
 0x2de   : > { %v4120_v9 = vsel %vm396_vm2, %v4110_v60, %v4119_v10 }
 0x2df   : > { %6202 = vmatpush3.bf16.msk.msra.mxu1 %vm8359_vm10, %v6200_v6  ;;  %v7004_v11 = vpop.permute.xlu0 %7003  ;;  %6217 = vmatpush3.bf16.msk.msra.mxu0 %vm8359_vm10, %v6215_v5 }
 0x2e0   : > { %v7006_v3 = vunpack.i.h.bf16 %v7004_v11  ;;  %v7005_v12 = vunpack.i.l.bf16 %v7004_v11  ;;  %5803 = vmatprep.subr.mxu1 %v7321_v21  ;;  %5824 = vmatprep.subr.mxu0 %v7321_v21 }
 0x2e1   : > { %v7019_v16 = vpop.permute.xlu1 %7018 }
 0x2e2   : > { %v4204_v18 = vsel %vm388_vm1, %v7005_v12, %v7006_v3  ;;  %v7021_v19 = vunpack.i.h.bf16 %v7019_v16  ;;  %v7020_v22 = vunpack.i.l.bf16 %v7019_v16 }
 0x2e3   : > { %v6219_v25 = vpack.c.bf16 %v4204_v18, %v8335_v63  ;;  %5804 = vmatpush3.msra.mxu1 %v4012_v13  ;;  %v7009_v26 = vpop.permute.xlu0 %7008  ;;  %5825 = vmatpush3.msra.mxu0 %v4120_v9 }
 0x2e4   : > { %v4312_v29 = vsel %vm388_vm1, %v7020_v22, %v7021_v19  ;;  %v7011_v30 = vunpack.i.h.bf16 %v7009_v26  ;;  %v7010_v31 = vunpack.i.l.bf16 %v7009_v26  ;;  %5806 = vmatmul.mubr.msk.f32.vlgmr.msra.gmra.mrb[26].mxu1 %vm3146_vm11, %v8428_v59  ;;  %5827 = vmatmul.mubr.msk.f32.vlgmr.msra.gmra.mrb[28].mxu0 %vm3146_vm11, %v8428_v59 }
 0x2e5   : > { %v6234_v15 = vpack.c.bf16 %v4312_v29, %v8380_v39  ;;  %v7024_v38 = vpop.permute.xlu1 %7023  ;;  %6218 = vmatprep.subr.bf16.mxu1 %v7318_v8  ;;  %6233 = vmatprep.subr.bf16.mxu0 %v7318_v8 }
 0x2e6   : > { %v4210_v63 = vsel %vm396_vm2, %v7010_v31, %v7011_v30  ;;  %v7026_v51 = vunpack.i.h.bf16 %v7024_v38  ;;  %v7025_v33 = vunpack.i.l.bf16 %v7024_v38  ;;  %6221 = vmatpush3.bf16.msk.msra.mxu1 %vm8359_vm10, %v6219_v25  ;;  %5847 = vmatprep.mubr.msk.f32.mxu1 %vm7320_vm0, %v7321_v21 }
 0x2e7   : > { %v6223_v28 = vpack.c.bf16 %v8380_v39, %v4210_v63  ;;  %6236 = vmatpush3.bf16.msk.msra.mxu0 %vm8359_vm10, %v6234_v15  ;;  %6222 = vmatprep.subr.bf16.mxu1 %v7318_v8 }
 0x2e8   : > { %v4318_v34 = vsel %vm396_vm2, %v7025_v33, %v7026_v51  ;;  %6237 = vmatprep.subr.bf16.mxu0 %v7318_v8  ;;  %5868 = vmatprep.mubr.msk.f32.mxu0 %vm7320_vm0, %v7321_v21 }
 0x2e9   : > { %v6238_v37 = vpack.c.bf16 %v8387_v32, %v4318_v34  ;;  %v4218_v39 = vpop.permute.xlu1 %4217 }
 0x2ea   : > { %6225 = vmatpush3.bf16.msk.msra.mxu1 %vm8349_vm9, %v6223_v28  ;;  %v4219_v14 = vsel %vm396_vm2, %v7011_v30, %v4218_v39 }
 0x2eb   : > { %6240 = vmatpush3.bf16.msk.msra.mxu0 %vm8349_vm9, %v6238_v37  ;;  %6226 = vmatprep.subr.bf16.mxu1 %v7318_v8 }
 0x2ec   : > { %6241 = vmatprep.subr.bf16.mxu0 %v7318_v8 }
 0x2ef   : > { %v7029_v36 = vpop.permute.xlu0 %7028 }
 0x2f0   : > { %v7031_v40 = vunpack.i.h.bf16 %v7029_v36  ;;  %v7030_v42 = vunpack.i.l.bf16 %v7029_v36 }
 0x2f2   : > { %v4215_v44 = vsel %vm388_vm1, %v7006_v3, %v7030_v42  ;;  %v4323_v41 = vsel %vm388_vm1, %v7021_v19, %v7031_v40 }
 0x2f3   : > { %v6227_v20 = vpack.c.bf16 %v4219_v14, %v4215_v44  ;;  %v4326_v17 = vpop.permute.xlu0 %4325 }
 0x2f4   : > { %v4327_v43 = vsel %vm396_vm2, %v7026_v51, %v4326_v17 }
 0x2f5   : > { %v6242_v24 = vpack.c.bf16 %v4327_v43, %v4323_v41  ;;  %v7044_v52 = vpop.permute.xlu1 %7043  ;;  %6228 = vmatpush3.bf16.msra.mxu1 %v6227_v20 }
 0x2f6   : > { %v7046_v56 = vunpack.i.h.bf16 %v7044_v52  ;;  %v7045_v53 = vunpack.i.l.bf16 %v7044_v52  ;;  %6229 = vmatprep.subr.bf16.mxu1 %v7318_v8 }
 0x2f7   : > { %v4227_v7 = vpop.permute.xlu0 %4226  ;;  %6243 = vmatpush3.bf16.msra.mxu0 %v6242_v24 }
 0x2f8   : > { %v4332_v57 = vsel %vm388_vm1, %v7031_v40, %v7046_v56  ;;  %v4224_v50 = vsel %vm388_vm1, %v7030_v42, %v7045_v53  ;;  %6244 = vmatprep.subr.bf16.mxu0 %v7318_v8  ;;  %v4228_v61 = vsel %vm396_vm2, %v4218_v39, %v4227_v7 }
 0x2f9   : > { %v6245_v35 = vpack.c.bf16 %v4332_v57, %v8451_v45  ;;  %v6230_v46 = vpack.c.bf16 %v4224_v50, %v8387_v32  ;;  %v4335_v60 = vpop.permute.xlu1 %4334 }
 0x2fa   : > { %v4336_v48 = vsel %vm396_vm2, %v4326_v17, %v4335_v60 }
 0x2fb   : > { %6232 = vmatpush3.bf16.msk.msra.mxu1 %vm8359_vm10, %v6230_v46  ;;  %v7034_v49 = vpop.permute.xlu0 %7033  ;;  %6247 = vmatpush3.bf16.msk.msra.mxu0 %vm8359_vm10, %v6245_v35 }
 0x2fc   : > { %v7036_v62 = vunpack.i.h.bf16 %v7034_v49  ;;  %v7035_v2 = vunpack.i.l.bf16 %v7034_v49  ;;  %5845 = vmatprep.subr.mxu1 %v7321_v21  ;;  %5866 = vmatprep.subr.mxu0 %v7321_v21 }
 0x2fd   : > { %v7049_v4 = vpop.permute.xlu1 %7048 }
 0x2fe   : > { %v4420_v58 = vsel %vm388_vm1, %v7035_v2, %v7036_v62  ;;  %v7051_v47 = vunpack.i.h.bf16 %v7049_v4  ;;  %v7050_v1 = vunpack.i.l.bf16 %v7049_v4 }
 0x2ff   : > { %v6249_v5 = vpack.c.bf16 %v4420_v58, %v8387_v32  ;;  %5846 = vmatpush3.msra.mxu1 %v4228_v61  ;;  %v7039_v6 = vpop.permute.xlu0 %7038  ;;  %5867 = vmatpush3.msra.mxu0 %v4336_v48 }
 0x300   : > { %v4528_v10 = vsel %vm388_vm1, %v7050_v1, %v7051_v47  ;;  %v7041_v11 = vunpack.i.h.bf16 %v7039_v6  ;;  %v7040_v3 = vunpack.i.l.bf16 %v7039_v6  ;;  %5848 = vmatmul.mubr.msk.f32.vlgmr.msra.gmra.mrb[28].mxu1 %vm3146_vm11, %v8428_v59  ;;  %5869 = vmatmul.mubr.msk.f32.vlgmr.msra.gmra.mrb[30].mxu0 %vm3146_vm11, %v8428_v59 }
 0x301   : > { %v6264_v12 = vpack.c.bf16 %v4528_v10, %v8451_v45  ;;  %v7054_v13 = vpop.permute.xlu1 %7053  ;;  %6248 = vmatprep.subr.bf16.mxu1 %v7318_v8  ;;  %6263 = vmatprep.subr.bf16.mxu0 %v7318_v8 }
 0x302   : > { %v4426_v32 = vsel %vm396_vm2, %v7040_v3, %v7041_v11  ;;  %v7056_v16 = vunpack.i.h.bf16 %v7054_v13  ;;  %v7055_v9 = vunpack.i.l.bf16 %v7054_v13  ;;  %6251 = vmatpush3.bf16.msk.msra.mxu1 %vm8359_vm10, %v6249_v5  ;;  %5889 = vmatprep.mubr.msk.f32.mxu1 %vm7320_vm0, %v7321_v21 }
 0x303   : > { %v6253_v18 = vpack.c.bf16 %v8451_v45, %v4426_v32  ;;  %6266 = vmatpush3.bf16.msk.msra.mxu0 %vm8359_vm10, %v6264_v12  ;;  %6252 = vmatprep.subr.bf16.mxu1 %v7318_v8 }
 0x304   : > { %v4534_v19 = vsel %vm396_vm2, %v7055_v9, %v7056_v16  ;;  %6267 = vmatprep.subr.bf16.mxu0 %v7318_v8  ;;  %5910 = vmatprep.mubr.msk.f32.mxu0 %vm7320_vm0, %v7321_v21 }
 0x305   : > { %v6268_v22 = vpack.c.bf16 %v8472_v55, %v4534_v19  ;;  %v4434_v45 = vpop.permute.xlu1 %4433 }
 0x306   : > { %6255 = vmatpush3.bf16.msk.msra.mxu1 %vm8349_vm9, %v6253_v18  ;;  %v4435_v30 = vsel %vm396_vm2, %v7041_v11, %v4434_v45 }
 0x307   : > { %6270 = vmatpush3.bf16.msk.msra.mxu0 %vm8349_vm9, %v6268_v22  ;;  %6256 = vmatprep.subr.bf16.mxu1 %v7318_v8 }
 0x308   : > { %6271 = vmatprep.subr.bf16.mxu0 %v7318_v8 }
 0x30b   : > { %v7059_v25 = vpop.permute.xlu0 %7058 }
 0x30c   : > { %v7061_v26 = vunpack.i.h.bf16 %v7059_v25  ;;  %v7060_v29 = vunpack.i.l.bf16 %v7059_v25 }
 0x30e   : > { %v4431_v31 = vsel %vm388_vm1, %v7036_v62, %v7060_v29  ;;  %v4539_v63 = vsel %vm388_vm1, %v7051_v47, %v7061_v26 }
 0x30f   : > { %v6257_v15 = vpack.c.bf16 %v4435_v30, %v4431_v31  ;;  %v4542_v38 = vpop.permute.xlu0 %4541 }
 0x310   : > { %v4543_v51 = vsel %vm396_vm2, %v7056_v16, %v4542_v38 }
 0x311   : > { %v6272_v33 = vpack.c.bf16 %v4543_v51, %v4539_v63  ;;  %v7074_v28 = vpop.permute.xlu1 %7073  ;;  %6258 = vmatpush3.bf16.msra.mxu1 %v6257_v15 }
 0x312   : > { %v7076_v34 = vunpack.i.h.bf16 %v7074_v28  ;;  %v7075_v37 = vunpack.i.l.bf16 %v7074_v28  ;;  %6259 = vmatprep.subr.bf16.mxu1 %v7318_v8 }
 0x313   : > { %v4759_v39 = vpop.permute.xlu0 %4758  ;;  %6273 = vmatpush3.bf16.msra.mxu0 %v6272_v33 }
 0x314   : > { %v4548_v36 = vsel %vm388_vm1, %v7061_v26, %v7076_v34  ;;  %v4440_v40 = vsel %vm388_vm1, %v7060_v29, %v7075_v37  ;;  %6274 = vmatprep.subr.bf16.mxu0 %v7318_v8 }
 0x315   : > { %v6275_v42 = vpack.c.bf16 %v4548_v36, %v8535_v54  ;;  %v6260_v14 = vpack.c.bf16 %v4440_v40, %v8472_v55  ;;  %v4551_v44 = vpop.permute.xlu1 %4550 }
 0x316   : > { %v4552_v43 = vsel %vm396_vm2, %v4542_v38, %v4551_v44 }
 0x317   : > { %6262 = vmatpush3.bf16.msk.msra.mxu1 %vm8359_vm10, %v6260_v14  ;;  %v4443_v20 = vpop.permute.xlu0 %4442  ;;  %6277 = vmatpush3.bf16.msk.msra.mxu0 %vm8359_vm10, %v6275_v42 }
 0x318   : > { %v4444_v17 = vsel %vm396_vm2, %v4434_v45, %v4443_v20  ;;  %5887 = vmatprep.subr.mxu1 %v7321_v21  ;;  %5908 = vmatprep.subr.mxu0 %v7321_v21 }
 0x319   : > { %v7079_v41 = vpop.permute.xlu1 %7078 }
 0x31a   : > { %v7081_v24 = vunpack.i.h.bf16 %v7079_v41  ;;  %v7080_v52 = vunpack.i.l.bf16 %v7079_v41 }
 0x31b   : > { %5888 = vmatpush3.msra.mxu1 %v4444_v17  ;;  %v7064_v56 = vpop.permute.xlu0 %7063  ;;  %5909 = vmatpush3.msra.mxu0 %v4552_v43 }
 0x31c   : > { %v4745_v53 = vsel %vm388_vm1, %v7080_v52, %v7081_v24  ;;  %v7066_v7 = vunpack.i.h.bf16 %v7064_v56  ;;  %v7065_v57 = vunpack.i.l.bf16 %v7064_v56  ;;  %5890 = vmatmul.mubr.msk.f32.vlgmr.msra.gmra.mrb[30].mxu1 %vm3146_vm11, %v8428_v59  ;;  %5911 = vmatmul.mubr.msk.f32.vlgmr.msra.gmra.mrb[32].mxu0 %vm3146_vm11, %v8428_v59 }
 0x31d   : > { %v6294_v50 = vpack.c.bf16 %v4745_v53, %v8535_v54  ;;  %v7084_v35 = vpop.permute.xlu1 %7083  ;;  %6293 = vmatprep.subr.bf16.mxu0 %v7318_v8  ;;  %6278 = vmatprep.subr.bf16.mxu1 %v7318_v8 }
 0x31e   : > { %v4636_v46 = vsel %vm388_vm1, %v7065_v57, %v7066_v7  ;;  %v7086_v60 = vunpack.i.h.bf16 %v7084_v35  ;;  %v7085_v49 = vunpack.i.l.bf16 %v7084_v35  ;;  %5931 = vmatprep.mubr.msk.f32.mxu1 %vm7320_vm0, %v7321_v21  ;;  %5952 = vmatprep.mubr.msk.f32.mxu0 %vm7320_vm0, %v7321_v21 }
 0x31f   : > { %v6279_v62 = vpack.c.bf16 %v4636_v46, %v8472_v55  ;;  %6296 = vmatpush3.bf16.msk.msra.mxu0 %vm8359_vm10, %v6294_v50 }
 0x320   : > { %v4751_v59 = vsel %vm396_vm2, %v7085_v49, %v7086_v60  ;;  %6297 = vmatprep.subr.bf16.mxu0 %v7318_v8  ;;  %v4760_v12 = vsel %vm396_vm2, %v7086_v60, %v4759_v39 }
 0x321   : > { %v6298_v2 = vpack.c.bf16 %v8559_v0, %v4751_v59  ;;  %v7069_v61 = vpop.permute.xlu0 %7068  ;;  %6281 = vmatpush3.bf16.msk.msra.mxu1 %vm8359_vm10, %v6279_v62 }
 0x322   : > { %v7071_v4 = vunpack.i.h.bf16 %v7069_v61  ;;  %v7070_v48 = vunpack.i.l.bf16 %v7069_v61  ;;  %v4650_v58 = vpop.permute.xlu1 %4649  ;;  %6282 = vmatprep.subr.bf16.mxu1 %v7318_v8 }
 0x323   : > { %6300 = vmatpush3.bf16.msk.msra.mxu0 %vm8349_vm9, %v6298_v2 }
 0x324   : > { %v4642_v55 = vsel %vm396_vm2, %v7070_v48, %v7071_v4  ;;  %6301 = vmatprep.subr.bf16.mxu0 %v7318_v8  ;;  %v4651_v13 = vsel %vm396_vm2, %v7071_v4, %v4650_v58 }
 0x325   : > { %v6283_v47 = vpack.c.bf16 %v8535_v54, %v4642_v55  ;;  %v7089_v1 = vpop.permute.xlu0 %7088 }
 0x326   : > { %v7091_v5 = vunpack.i.h.bf16 %v7089_v1  ;;  %v7090_v6 = vunpack.i.l.bf16 %v7089_v1  ;;  %v7094_v10 = vpop.permute.xlu1 %7093 }
 0x327   : > { %v7096_v11 = vunpack.i.h.bf16 %v7094_v10  ;;  %v7095_v3 = vunpack.i.l.bf16 %v7094_v10  ;;  %6285 = vmatpush3.bf16.msk.msra.mxu1 %vm8349_vm9, %v6283_v47 }
 0x328   : > { %v4647_v32 = vsel %vm388_vm1, %v7066_v7, %v7090_v6  ;;  %v4756_v16 = vsel %vm388_vm1, %v7081_v24, %v7091_v5  ;;  %6286 = vmatprep.subr.bf16.mxu1 %v7318_v8 }
 0x329   : > { %v6287_v54 = vpack.c.bf16 %v4651_v13, %v4647_v32  ;;  %v6302_v9 = vpack.c.bf16 %v4760_v12, %v4756_v16  ;;  %v4767_v18 = vpop.permute.xlu0 %4766  ;;  %v4656_v19 = vsel %vm388_vm1, %v7090_v6, %v7095_v3 }
 0x32a   : > { %v4768_v22 = vsel %vm388_vm1, %v7096_v11, %v4767_v18  ;;  %v7099_v45 = vpop.permute.xlu1 %7098  ;;  %v6290_v26 = vpack.c.bf16 %v4656_v19, %v8559_v0 }
 0x32b   : > { %v6305_v23 = vpack.c.bf16 %v4768_v22, %v7321_v21  ;;  %6288 = vmatpush3.bf16.msra.mxu1 %v6287_v54  ;;  %6303 = vmatpush3.bf16.msra.mxu0 %v6302_v9  ;;  %v7101_v25 = vunpack.i.h.bf16 %v7099_v45  ;;  %v7100_v30 = vunpack.i.l.bf16 %v7099_v45 }
 0x32c   : > { %6289 = vmatprep.subr.bf16.mxu1 %v7318_v8  ;;  %6304 = vmatprep.subr.bf16.mxu0 %v7318_v8  ;;  %v7165_v8 = vld [vmem:[%s8952_s4] sm:$0xff] }
 0x32d   : > { %v4773_v29 = vpop.permute.xlu0 %4772  ;;  %v4660_v15 = vsel %vm396_vm2, %v4650_v58, %v7100_v30 }
 0x32e   : > { %v4774_v31 = vsel %vm396_vm2, %v7101_v25, %v4773_v29 }
 0x32f   : > { %6292 = vmatpush3.bf16.msk.msra.mxu1 %vm8359_vm10, %v6290_v26  ;;  %6306 = vmatpush3.bf16.msra.mxu0 %v6305_v23 }
 0x330   : > { %5929 = vmatprep.subr.mxu1 %v7321_v21  ;;  %5950 = vmatprep.subr.mxu0 %v7321_v21 }
 0x333   : > { %5930 = vmatpush3.msra.mxu1 %v4660_v15  ;;  %5951 = vmatpush3.msra.mxu0 %v4774_v31 }
 0x334   : > { %5932 = vmatmul.mubr.msk.f32.vlgmr.msra.gmra.mrb[32].mxu1 %vm3146_vm11, %v7165_v8  ;;  %5953 = vmatmul.mubr.msk.f32.vlgmr.msra.gmra.mrb[34].mxu0 %vm3146_vm11, %v7165_v8 }
 0x33b   : > { %v8858_v27 = vpop.permute.xlu1 %3143 }
 0x347   : > { %v3216_v0 = vpop.f32.mrb[18].mxu1 }
 0x348   : > { %v3217_v38 = vadd.f32 %v3216_v0, %v8858_v27  ;;  %v3324_v63 = vpop.f32.mrb[20].mxu0  ;;  %v5639_v21 = vpop.f32.mrb[19].mxu1 }
 0x349   : > { %v3325_v51 = vadd.f32 %v3324_v63, %v8858_v27  ;;  %v5660_v33 = vpop.f32.mrb[21].mxu0 }
 0x34a   : > { %v3220_v28 = vmax.f32 %v3217_v38, 0.0 }
 0x34b   : > { %v3328_v34 = vmax.f32 %v3325_v51, 0.0 }
 0x34c   : > { %3221 = vst [vmem:[%s8862_s30] sm:$0xff] %v3220_v28 }
 0x34d   : > { %3329 = vst [vmem:[%s8862_s30 + $0x8] sm:$0xff] %v3328_v34 }
 0x363   : > { %v3432_v37 = vpop.f32.mrb[20].mxu1 }
 0x364   : > { %v3433_v39 = vadd.f32 %v3432_v37, %v8858_v27  ;;  %v3540_v36 = vpop.f32.mrb[22].mxu0  ;;  %v5681_v40 = vpop.f32.mrb[21].mxu1 }
 0x365   : > { %v3541_v42 = vadd.f32 %v3540_v36, %v8858_v27  ;;  %v5702_v14 = vpop.f32.mrb[23].mxu0 }
 0x366   : > { %v3436_v44 = vmax.f32 %v3433_v39, 0.0 }
 0x367   : > { %v3544_v20 = vmax.f32 %v3541_v42, 0.0 }
 0x368   : > { %3437 = vst [vmem:[%s8862_s30 + $0x10] sm:$0xff] %v3436_v44 }
 0x369   : > { %3545 = vst [vmem:[%s8862_s30 + $0x18] sm:$0xff] %v3544_v20 }
 0x37f   : > { %v3648_v17 = vpop.f32.mrb[22].mxu1 }
 0x380   : > { %v3649_v41 = vadd.f32 %v3648_v17, %v8858_v27  ;;  %v3756_v43 = vpop.f32.mrb[24].mxu0  ;;  %v5723_v24 = vpop.f32.mrb[23].mxu1 }
 0x381   : > { %v3757_v52 = vadd.f32 %v3756_v43, %v8858_v27  ;;  %v5744_v56 = vpop.f32.mrb[25].mxu0 }
 0x382   : > { %v3652_v53 = vmax.f32 %v3649_v41, 0.0 }
 0x383   : > { %v3760_v7 = vmax.f32 %v3757_v52, 0.0 }
 0x384   : > { %3653 = vst [vmem:[%s8862_s30 + $0x20] sm:$0xff] %v3652_v53 }
 0x385   : > { %3761 = vst [vmem:[%s8862_s30 + $0x28] sm:$0xff] %v3760_v7 }
 0x39b   : > { %v3864_v57 = vpop.f32.mrb[24].mxu1  ;;  %v3972_v50 = vpop.f32.mrb[26].mxu0 }
 0x39c   : > { %v3865_v35 = vadd.f32 %v3864_v57, %v8858_v27  ;;  %v3973_v46 = vadd.f32 %v3972_v50, %v8858_v27  ;;  %v5765_v60 = vpop.f32.mrb[25].mxu1  ;;  %v5786_v49 = vpop.f32.mrb[27].mxu0 }
 0x39e   : > { %v3868_v62 = vmax.f32 %v3865_v35, 0.0  ;;  %v3976_v59 = vmax.f32 %v3973_v46, 0.0 }
 0x3a0   : > { %3869 = vst [vmem:[%s8862_s30 + $0x30] sm:$0xff] %v3868_v62  ;;  %3977 = vst [vmem:[%s8862_s30 + $0x38] sm:$0xff] %v3976_v59 }
 0x3b7   : > { %v4080_v2 = vpop.f32.mrb[26].mxu1  ;;  %v4188_v61 = vpop.f32.mrb[28].mxu0 }
 0x3b8   : > { %v4081_v4 = vadd.f32 %v4080_v2, %v8858_v27  ;;  %v4189_v48 = vadd.f32 %v4188_v61, %v8858_v27  ;;  %v5807_v58 = vpop.f32.mrb[27].mxu1  ;;  %v5828_v55 = vpop.f32.mrb[29].mxu0 }
 0x3ba   : > { %v4084_v47 = vmax.f32 %v4081_v4, 0.0  ;;  %v4192_v1 = vmax.f32 %v4189_v48, 0.0 }
 0x3bc   : > { %4085 = vst [vmem:[%s8862_s30 + $0x40] sm:$0xff] %v4084_v47  ;;  %4193 = vst [vmem:[%s8862_s30 + $0x48] sm:$0xff] %v4192_v1 }
 0x3d3   : > { %v4296_v5 = vpop.f32.mrb[28].mxu1  ;;  %v4404_v6 = vpop.f32.mrb[30].mxu0 }
 0x3d4   : > { %v4297_v10 = vadd.f32 %v4296_v5, %v8858_v27  ;;  %v4405_v11 = vadd.f32 %v4404_v6, %v8858_v27  ;;  %v5849_v3 = vpop.f32.mrb[29].mxu1  ;;  %v5870_v12 = vpop.f32.mrb[31].mxu0 }
 0x3d6   : > { %v4300_v13 = vmax.f32 %v4297_v10, 0.0  ;;  %v4408_v32 = vmax.f32 %v4405_v11, 0.0 }
 0x3d8   : > { %4301 = vst [vmem:[%s8862_s30 + $0x50] sm:$0xff] %v4300_v13  ;;  %4409 = vst [vmem:[%s8862_s30 + $0x58] sm:$0xff] %v4408_v32 }
 0x3ef   : > { %v4512_v16 = vpop.f32.mrb[30].mxu1  ;;  %v4620_v54 = vpop.f32.mrb[32].mxu0 }
 0x3f0   : > { %v4513_v9 = vadd.f32 %v4512_v16, %v8858_v27  ;;  %v4621_v18 = vadd.f32 %v4620_v54, %v8858_v27  ;;  %v5891_v19 = vpop.f32.mrb[31].mxu1  ;;  %v5912_v22 = vpop.f32.mrb[33].mxu0 }
 0x3f2   : > { %v4516_v45 = vmax.f32 %v4513_v9, 0.0  ;;  %v4624_v23 = vmax.f32 %v4621_v18, 0.0 }
 0x3f4   : > { %4517 = vst [vmem:[%s8862_s30 + $0x60] sm:$0xff] %v4516_v45  ;;  %4625 = vst [vmem:[%s8862_s30 + $0x68] sm:$0xff] %v4624_v23 }
 0x407   : > { %v4728_v25 = vpop.f32.mrb[32].mxu1  ;;  %v4842_v26 = vpop.f32.mrb[34].mxu0 }
 0x408   : > { %v4729_v29 = vadd.f32 %v4728_v25, %v8858_v27  ;;  %v4843_v30 = vadd.f32 %v4842_v26, %v8858_v27  ;;  %v5933_v31 = vpop.f32.mrb[33].mxu1  ;;  %v5954_v15 = vpop.f32.mrb[35].mxu0 }
 0x40a   : > { %v4732_v8 = vmax.f32 %v4729_v29, 0.0  ;;  %v4846_v0 = vmax.f32 %v4843_v30, 0.0 }
 0x40c   : > { %4733 = vst [vmem:[%s8862_s30 + $0x70] sm:$0xff] %v4732_v8  ;;  %4847 = vst [vmem:[%s8862_s30 + $0x78] sm:$0xff] %v4846_v0 }
 0x40d   : > { %7240 = shalt.err (!%p7237_p2)
}
 0x40e   : > { %s7241_s16 = scalar_lea.hbm %s8897_s7, 2048  ;;  %s7245_s15 = scalar_lea.hbm %s8954_s6, 4096 }
 0x40f   : > { %p7242_p9 = scmp.ne.s32.totalorder %s8897_s7, %s7241_s16  ;;  %p7246_p6 = scmp.lt.u32.totalorder %s8897_s7, %s8954_s6 }
 0x410   : > { %p7247_p13 = scmp.lt.u32.totalorder %s7245_s15, %s7241_s16  ;;  %p7249_p0 = scmp.lt.u32.totalorder %s7241_s16, %s8897_s7 }
 0x411   : > { %p7243_p11 = pnand %p7242_p9, %p8979_p5 }
 0x412   : > { %p7248_p8 = por %p7247_p13, %p7246_p6 }
 0x413   : > { %p7244_p3 = pneg %p7243_p11 }
 0x414   : > { %p7250_p7 = por %p7249_p0, %p7248_p8 }
 0x416   : > { %p7251_p4 = pnand %p7250_p7, %p7244_p3 }
 0x418   : > { %7254 = shalt.err (!%p7251_p4)
}
 0x419   : > { %6311 = dma.vmem_to_hbm [thread:$0]  (%p8979_p5), %s8899_s17, 2048, %s8897_s7, %s4849_s24  }
 0x41a PF: > { %s4877_s30 = sand.u32 1, %s7293_s21   ;;  %p8980_p10 = scmp.ne.s32.totalorder %s8964_s12, 0 }
 0x41b   : > { %p8981_p12 = scmp.ge.s32.totalorder %s7313_s26, 2  ;;  %s4878_s9 = scalar_lea.sflag [#allocation6], %s4877_s30 }
 0x41d   : > { %p6321_p1 = pnand %p8981_p12, %p8980_p10 }
 0x41f   : > { %7288 = dma.done.wait (!%p6321_p1), %s4878_s9, 2048  }
 0x420   : > { %7290 = vsyncadd (!%p6321_p1), %s4878_s9, 4294965248  ;;  %s25_s26 = sadd.s32 1, %s7313_s26   ;;  %s8982_s10 = sld [smem:[#allocation13_spill]] }
 0x421   : > { %p22_p2 = scmp.ge.s32.totalorder %s25_s26, 4   ;;  %s8983_s21 = smov %s7297_s22 }
 0x422   : > { %s8984_s22 = smov %s7301_s23  ;;  %s8985_s23 = smov %s7416_s11 }
 0x423   : > { %s8986_s24 = smov %s7309_s25  ;;  %24 = sbr.rel (!%p22_p2) target bundleno = 10 (0xa), region = 102 }
 0x426   : > { %s8987_s25 = smov %s8982_s10 }
 0x42a   :  { %4883 = vsyncpa [#allocation5], 1 }
 0x42b   :  { %4885 = vsyncpa [#allocation5 + $0x1], 1 }
 0x42c   :  { %4886 = vsyncpa [#allocation8], 1 }
 0x42d   :  { %4888 = vsyncpa [#allocation8 + $0x1], 1 }
 0x42e   :  { %4889 = vsyncpa [#allocation6], 1 }
 0x42f   :  { %4891 = vsyncpa [#allocation6 + $0x1], 1 }

</bundles_post_ra>
